<compile_context>
chip_gen: v6e
topology: v6e:2x2x1
jax: 0.10.0
libtpu: 0.0.40
codegen_flags: <defaults>
</compile_context>

<pallas_src>
import functools
from math import sqrt

import jax
import jax.numpy as jnp
from jax.experimental import pallas as pl
from jax.experimental.pallas import tpu as pltpu

F32 = jnp.float32
BF16 = jnp.bfloat16

ROW_TILE = 512            # row-tile target for M-gridded kernels
# VMEM budget sized for v7x (64 MiB physical / 32 MiB scoped default); the
# <=512-row x full-channel tiles used here stay far below this cap even when
# double-buffered, and it is safe on v5e/v6e (128 MiB physical) as well.
VMEM_LIMIT_BYTES = 32 * 1024 * 1024


def _cparams(dimension_semantics):
    return pltpu.CompilerParams(dimension_semantics=dimension_semantics,
                                vmem_limit_bytes=VMEM_LIMIT_BYTES)


def _row_tile(m, target=ROW_TILE):
    # Full extent for small M (block == array is always legal); otherwise an
    # 8-aligned tile (Pallas masks the ragged last block).
    return m if m <= target else target


def _dot_nt(a, b):
    """a: (M, K), b: (N, K) -> (M, N), contracting last dims, f32 accumulation."""
    return jax.lax.dot_general(a, b, (((1,), (1,)), ((), ())),
                               preferred_element_type=jnp.float32)


def _gelu_exact(x):
    # Exact (erf) GELU; erf via Abramowitz-Stegun 7.1.26 (|err| < 2e-7) so only
    # exp/mul/add/where are needed inside the kernel (no erf lowering relied on).
    z = x * 0.7071067811865476
    a = jnp.abs(z)
    t = 1.0 / (1.0 + 0.3275911 * a)
    poly = t * (0.254829592 + t * (-0.284496736 + t * (1.421413741
             + t * (-1.453152027 + t * 1.061405429))))
    erf_abs = 1.0 - poly * jnp.exp(-(a * a))
    erf = jnp.where(z < 0.0, -erf_abs, erf_abs)
    return 0.5 * x * (1.0 + erf)


def _softmax_rows(s):
    s = s - jnp.max(s, axis=-1, keepdims=True)
    p = jnp.exp(s)
    return p * pl.reciprocal(jnp.sum(p, axis=-1, keepdims=True), approx=True)


# --------------------------------------------------------------------------
# Row-tiled linear (+ optional bias / residual / ReLU)
# --------------------------------------------------------------------------
def _linear_kernel(*refs, has_bias, has_residual, activation):
    x_ref, w_ref = refs[0], refs[1]
    idx = 2
    b_ref = r_ref = None
    if has_bias:
        b_ref = refs[idx]; idx += 1
    if has_residual:
        r_ref = refs[idx]; idx += 1
    o_ref = refs[idx]
    acc = jnp.dot(x_ref[...], w_ref[...], preferred_element_type=jnp.float32)
    if has_bias:
        acc = acc + b_ref[...]
    if has_residual:
        acc = acc + r_ref[...]
    if activation == "relu":
        acc = jnp.maximum(acc, 0.0)
    o_ref[...] = acc.astype(o_ref.dtype)


def linear(x, w, b=None, residual=None, activation=None):
    """Row-tiled (x @ w [+ b] [+ residual]) [ReLU]; bf16 operands, f32 accumulation."""
    M, K = x.shape
    N = w.shape[1]
    tm = _row_tile(M)
    in_specs = [pl.BlockSpec((tm, K), lambda i: (i, 0)),
                pl.BlockSpec((K, N), lambda i: (0, 0))]
    args = [x.astype(BF16), w.astype(BF16)]
    if b is not None:
        in_specs.append(pl.BlockSpec((1, N), lambda i: (0, 0)))
        args.append(jnp.asarray(b, F32).reshape(1, N))
    if residual is not None:
        in_specs.append(pl.BlockSpec((tm, N), lambda i: (i, 0)))
        args.append(residual.astype(F32))
    return pl.pallas_call(
        functools.partial(_linear_kernel, has_bias=b is not None,
                          has_residual=residual is not None, activation=activation),
        grid=(pl.cdiv(M, tm),),
        in_specs=in_specs,
        out_specs=pl.BlockSpec((tm, N), lambda i: (i, 0)),
        out_shape=jax.ShapeDtypeStruct((M, N), F32),
        compiler_params=_cparams(("parallel",)),
    )(*args)


# --------------------------------------------------------------------------
# Fused LayerNorm + Linear  (skeleton head)
# --------------------------------------------------------------------------
def _ln_linear_kernel(x_ref, g_ref, b_ref, w_ref, bias_ref, o_ref, *, eps):
    x = x_ref[...].astype(jnp.float32)
    mu = jnp.mean(x, axis=-1, keepdims=True)
    xc = x - mu
    var = jnp.mean(xc * xc, axis=-1, keepdims=True)
    y = xc * jax.lax.rsqrt(var + eps) * g_ref[...] + b_ref[...]
    acc = jnp.dot(y.astype(BF16), w_ref[...], preferred_element_type=jnp.float32)
    o_ref[...] = (acc + bias_ref[...]).astype(o_ref.dtype)


def ln_linear(x, g, b, w, bias, eps=1e-5):
    M, D = x.shape
    N = w.shape[1]
    tm = _row_tile(M)
    return pl.pallas_call(
        functools.partial(_ln_linear_kernel, eps=eps),
        grid=(pl.cdiv(M, tm),),
        in_specs=[pl.BlockSpec((tm, D), lambda i: (i, 0)),
                  pl.BlockSpec((1, D), lambda i: (0, 0)),
                  pl.BlockSpec((1, D), lambda i: (0, 0)),
                  pl.BlockSpec((D, N), lambda i: (0, 0)),
                  pl.BlockSpec((1, N), lambda i: (0, 0))],
        out_specs=pl.BlockSpec((tm, N), lambda i: (i, 0)),
        out_shape=jax.ShapeDtypeStruct((M, N), F32),
        compiler_params=_cparams(("parallel",)),
    )(x.astype(F32), g.reshape(1, D).astype(F32), b.reshape(1, D).astype(F32),
      w.astype(BF16), jnp.asarray(bias, F32).reshape(1, N))


# --------------------------------------------------------------------------
# Fused LayerNorm + FF1 + GELU + FF2 (+ residual)  (transformer FFN, final head)
# --------------------------------------------------------------------------
def _ln_ffn_kernel(x_ref, g_ref, b_ref, w1_ref, b1_ref, w2_ref, b2_ref, o_ref,
                   *, eps, add_residual):
    x = x_ref[...].astype(jnp.float32)
    mu = jnp.mean(x, axis=-1, keepdims=True)
    xc = x - mu
    var = jnp.mean(xc * xc, axis=-1, keepdims=True)
    y = xc * jax.lax.rsqrt(var + eps) * g_ref[...] + b_ref[...]
    h = jnp.dot(y.astype(BF16), w1_ref[...], preferred_element_type=jnp.float32)
    h = _gelu_exact(h + b1_ref[...])
    out = jnp.dot(h.astype(BF16), w2_ref[...], preferred_element_type=jnp.float32)
    out = out + b2_ref[...]
    if add_residual:
        out = out + x
    o_ref[...] = out.astype(o_ref.dtype)


def ln_ffn(x, g, b, w1, b1, w2, b2, add_residual, eps=1e-5):
    M, D = x.shape
    H = w1.shape[1]
    Dout = w2.shape[1]
    tm = _row_tile(M)
    return pl.pallas_call(
        functools.partial(_ln_ffn_kernel, eps=eps, add_residual=add_residual),
        grid=(pl.cdiv(M, tm),),
        in_specs=[pl.BlockSpec((tm, D), lambda i: (i, 0)),
                  pl.BlockSpec((1, D), lambda i: (0, 0)),
                  pl.BlockSpec((1, D), lambda i: (0, 0)),
                  pl.BlockSpec((D, H), lambda i: (0, 0)),
                  pl.BlockSpec((1, H), lambda i: (0, 0)),
                  pl.BlockSpec((H, Dout), lambda i: (0, 0)),
                  pl.BlockSpec((1, Dout), lambda i: (0, 0))],
        out_specs=pl.BlockSpec((tm, Dout), lambda i: (i, 0)),
        out_shape=jax.ShapeDtypeStruct((M, Dout), F32),
        compiler_params=_cparams(("parallel",)),
    )(x.astype(F32), g.reshape(1, D).astype(F32), b.reshape(1, D).astype(F32),
      w1.astype(BF16), jnp.asarray(b1, F32).reshape(1, H),
      w2.astype(BF16), jnp.asarray(b2, F32).reshape(1, Dout))


# --------------------------------------------------------------------------
# Fused PreNorm multi-head self-attention block (LN + QKV + MHA + proj + residual)
# --------------------------------------------------------------------------
def _attn_block_kernel(x_ref, g_ref, bln_ref, wqkv_ref, wo_ref, bo_ref, o_ref,
                       *, heads, dim_head, eps):
    # One batch element per grid step; all heads handled here so every
    # intermediate store is lane-dense (T, heads*dim_head) / (T, dim).
    # TODO(synk): for very long sequences, stream the KV axis (online softmax)
    #             so the (T, T) score tile never has to fit VMEM at once.
    x = x_ref[0].astype(jnp.float32)                            # (T, dim)
    mu = jnp.mean(x, axis=-1, keepdims=True)
    xc = x - mu
    var = jnp.mean(xc * xc, axis=-1, keepdims=True)
    y = xc * jax.lax.rsqrt(var + eps) * g_ref[...] + bln_ref[...]
    qkv = jnp.dot(y.astype(BF16), wqkv_ref[...],
                  preferred_element_type=jnp.float32)           # (T, 3*inner)
    inner = heads * dim_head
    scale = dim_head ** -0.5
    head_outs = []
    for h in range(heads):
        lo = h * dim_head
        q = qkv[:, lo:lo + dim_head]
        k = qkv[:, inner + lo:inner + lo + dim_head]
        v = qkv[:, 2 * inner + lo:2 * inner + lo + dim_head]
        p = _softmax_rows(_dot_nt(q.astype(BF16), k.astype(BF16)) * scale)
        head_outs.append(jnp.dot(p.astype(BF16), v.astype(BF16),
                                 preferred_element_type=jnp.float32))
    o = jnp.concatenate(head_outs, axis=-1)                     # (T, inner)
    proj = jnp.dot(o.astype(BF16), wo_ref[...],
                   preferred_element_type=jnp.float32) + bo_ref[...]
    o_ref[0] = (x + proj).astype(o_ref.dtype)


def attn_block(x, g, b, w_qkv, w_out, b_out, heads, dim_head):
    B, T, dim = x.shape
    inner = heads * dim_head
    return pl.pallas_call(
        functools.partial(_attn_block_kernel, heads=heads, dim_head=dim_head, eps=1e-5),
        grid=(B,),
        in_specs=[pl.BlockSpec((1, T, dim), lambda i: (i, 0, 0)),
                  pl.BlockSpec((1, dim), lambda i: (0, 0)),
                  pl.BlockSpec((1, dim), lambda i: (0, 0)),
                  pl.BlockSpec((dim, 3 * inner), lambda i: (0, 0)),
                  pl.BlockSpec((inner, dim), lambda i: (0, 0)),
                  pl.BlockSpec((1, dim), lambda i: (0, 0))],
        out_specs=pl.BlockSpec((1, T, dim), lambda i: (i, 0, 0)),
        out_shape=jax.ShapeDtypeStruct((B, T, dim), F32),
        compiler_params=_cparams(("parallel",)),
    )(x.astype(F32), g.reshape(1, dim).astype(F32), b.reshape(1, dim).astype(F32),
      w_qkv.astype(BF16), w_out.astype(BF16),
      jnp.asarray(b_out, F32).reshape(1, dim))


# --------------------------------------------------------------------------
# Memory-bank cross attention (forward_mem)
# --------------------------------------------------------------------------
def _mem_attn_kernel(y_ref, m_ref, o_ref, *, scale):
    y = y_ref[0].astype(BF16)                                   # (T, dim)
    m = m_ref[...].astype(BF16)                                 # (mem, dim)
    p = _softmax_rows(_dot_nt(y, m) * scale)                    # (T, mem) f32
    o_ref[0] = jnp.dot(p.astype(BF16), m,
                       preferred_element_type=jnp.float32).astype(o_ref.dtype)


def mem_attention(y, m_key, scale):
    B, T, D = y.shape
    Mn = m_key.shape[0]
    return pl.pallas_call(
        functools.partial(_mem_attn_kernel, scale=scale),
        grid=(B,),
        in_specs=[pl.BlockSpec((1, T, D), lambda i: (i, 0, 0)),
                  pl.BlockSpec((Mn, D), lambda i: (0, 0))],
        out_specs=pl.BlockSpec((1, T, D), lambda i: (i, 0, 0)),
        out_shape=jax.ShapeDtypeStruct((B, T, D), F32),
        compiler_params=_cparams(("parallel",)),
    )(y.astype(F32), m_key.astype(F32))


# --------------------------------------------------------------------------
# Fused QueryAttention (q/k/v projections + MHA + out projection)
# --------------------------------------------------------------------------
def _query_attn_kernel(q_ref, c_ref, wq_ref, wk_ref, wv_ref, wo_ref, bo_ref, o_ref,
                       *, heads, dim_head):
    qin = q_ref[0].astype(BF16)                                 # (J, fd)
    cin = c_ref[0].astype(BF16)                                 # (N, fd)
    q = jnp.dot(qin, wq_ref[...], preferred_element_type=jnp.float32)
    k = jnp.dot(cin, wk_ref[...], preferred_element_type=jnp.float32)
    v = jnp.dot(cin, wv_ref[...], preferred_element_type=jnp.float32)
    scale = dim_head ** -0.5
    head_outs = []
    for h in range(heads):
        lo = h * dim_head
        sl = slice(lo, lo + dim_head)
        p = _softmax_rows(_dot_nt(q[:, sl].astype(BF16), k[:, sl].astype(BF16)) * scale)
        head_outs.append(jnp.dot(p.astype(BF16), v[:, sl].astype(BF16),
                                 preferred_element_type=jnp.float32))
    o = jnp.concatenate(head_outs, axis=-1)                     # (J, inner)
    out = jnp.dot(o.astype(BF16), wo_ref[...], preferred_element_type=jnp.float32)
    o_ref[0] = (out + bo_ref[...]).astype(o_ref.dtype)


def query_attention(qin, ctx, wq, wk, wv, wo, bo, heads, dim_head):
    B, J, fd = qin.shape
    N = ctx.shape[1]
    inner = heads * dim_head
    return pl.pallas_call(
        functools.partial(_query_attn_kernel, heads=heads, dim_head=dim_head),
        grid=(B,),
        in_specs=[pl.BlockSpec((1, J, fd), lambda i: (i, 0, 0)),
                  pl.BlockSpec((1, N, fd), lambda i: (i, 0, 0)),
                  pl.BlockSpec((fd, inner), lambda i: (0, 0)),
                  pl.BlockSpec((fd, inner), lambda i: (0, 0)),
                  pl.BlockSpec((fd, inner), lambda i: (0, 0)),
                  pl.BlockSpec((inner, fd), lambda i: (0, 0)),
                  pl.BlockSpec((1, fd), lambda i: (0, 0))],
        out_specs=pl.BlockSpec((1, J, fd), lambda i: (i, 0, 0)),
        out_shape=jax.ShapeDtypeStruct((B, J, fd), F32),
        compiler_params=_cparams(("parallel",)),
    )(qin.astype(F32), ctx.astype(F32), wq.astype(BF16), wk.astype(BF16),
      wv.astype(BF16), wo.astype(BF16), jnp.asarray(bo, F32).reshape(1, fd))


# --------------------------------------------------------------------------
# Tube embedding: single fused (4+Cf, D) matmul + max pooling over neighbors
# --------------------------------------------------------------------------
def _tube_embed_kernel(x_ref, w_ref, o_ref):
    s = jnp.dot(x_ref[0], w_ref[...], preferred_element_type=jnp.float32)

    @pl.when(pl.program_id(1) == 0)
    def _():
        o_ref[...] = s

    @pl.when(pl.program_id(1) > 0)
    def _():
        o_ref[...] = jnp.maximum(o_ref[...], s)


def tube_embed(x, w):
    """x: (S, R, 4+Cf) [disp || feat], w: (4+Cf, D) stacked conv_d/conv_f weights.
    Output block stays resident across the S (reduction, last, 'arbitrary')
    axis; the R axis is tiled and 'parallel'."""
    S, R, Cin = x.shape
    D = w.shape[1]
    tr = _row_tile(R)
    return pl.pallas_call(
        _tube_embed_kernel,
        grid=(pl.cdiv(R, tr), S),
        in_specs=[pl.BlockSpec((1, tr, Cin), lambda r, s: (s, r, 0)),
                  pl.BlockSpec((Cin, D), lambda r, s: (0, 0))],
        out_specs=pl.BlockSpec((tr, D), lambda r, s: (r, 0)),
        out_shape=jax.ShapeDtypeStruct((R, D), F32),
        compiler_params=_cparams(("parallel", "arbitrary")),
    )(x.astype(BF16), w.astype(BF16))


# --------------------------------------------------------------------------
# Deconv tail: 3-NN weighted interpolation + split-weight conv + BN-fold + ReLU
# --------------------------------------------------------------------------
def _interp_conv_kernel(g_ref, w3_ref, of_ref, wa_ref, wb_ref, o_ref, *, C):
    g = g_ref[...].astype(jnp.float32)                          # (tm, 3*C)
    w3 = w3_ref[...].astype(jnp.float32)                        # (tm, 3)
    interp = (g[:, :C] * w3[:, 0:1]
              + g[:, C:2 * C] * w3[:, 1:2]
              + g[:, 2 * C:] * w3[:, 2:3])
    acc = jnp.dot(interp.astype(BF16), wa_ref[...], preferred_element_type=jnp.float32)
    acc = acc + jnp.dot(of_ref[...], wb_ref[...], preferred_element_type=jnp.float32)
    o_ref[...] = jnp.maximum(acc, 0.0).astype(o_ref.dtype)


def interp_conv(gathered, wts, orig_feat, wa, wb):
    M, threeC = gathered.shape
    C = threeC // 3
    C0 = orig_feat.shape[1]
    D = wa.shape[1]
    tm = _row_tile(M)
    return pl.pallas_call(
        functools.partial(_interp_conv_kernel, C=C),
        grid=(pl.cdiv(M, tm),),
        in_specs=[pl.BlockSpec((tm, threeC), lambda i: (i, 0)),
                  pl.BlockSpec((tm, 3), lambda i: (i, 0)),
                  pl.BlockSpec((tm, C0), lambda i: (i, 0)),
                  pl.BlockSpec((C, D), lambda i: (0, 0)),
                  pl.BlockSpec((C0, D), lambda i: (0, 0))],
        out_specs=pl.BlockSpec((tm, D), lambda i: (i, 0)),
        out_shape=jax.ShapeDtypeStruct((M, D), F32),
        compiler_params=_cparams(("parallel",)),
    )(gathered.astype(F32), wts.astype(F32), orig_feat.astype(BF16),
      wa.astype(BF16), wb.astype(BF16))


# --------------------------------------------------------------------------
# MSE reduction (row-tiled, accumulated across an 'arbitrary' grid axis)
# --------------------------------------------------------------------------
def _mse_kernel(a_ref, b_ref, o_ref, *, total_rows, denom, tile):
    i = pl.program_id(0)
    d = a_ref[...].astype(jnp.float32) - b_ref[...].astype(jnp.float32)
    row_ids = jax.lax.broadcasted_iota(jnp.int32, d.shape, 0) + i * tile
    d = jnp.where(row_ids < total_rows, d, 0.0)
    part = jnp.sum(jnp.sum(d * d, axis=1, keepdims=True), axis=0, keepdims=True) / denom

    @pl.when(i == 0)
    def _():
        o_ref[...] = part

    @pl.when(i > 0)
    def _():
        o_ref[...] = o_ref[...] + part


def mse(a, b):
    a2 = a.reshape(-1, a.shape[-1]).astype(F32)
    b2 = b.reshape(-1, b.shape[-1]).astype(F32)
    M, D = a2.shape
    tm = _row_tile(M)
    out = pl.pallas_call(
        functools.partial(_mse_kernel, total_rows=M, denom=float(M * D), tile=tm),
        grid=(pl.cdiv(M, tm),),
        in_specs=[pl.BlockSpec((tm, D), lambda i: (i, 0)),
                  pl.BlockSpec((tm, D), lambda i: (i, 0))],
        out_specs=pl.BlockSpec((1, 1), lambda i: (0, 0)),
        out_shape=jax.ShapeDtypeStruct((1, 1), F32),
        compiler_params=_cparams(("arbitrary",)),
    )(a2, b2)
    return out[0, 0]


# --------------------------------------------------------------------------
# JAX glue: data-dependent neighbor search (FPS / ball query / gathers)
# --------------------------------------------------------------------------
def farthest_point_sample(xyz, n_samples):
    """xyz: (B, N, 3) -> (B, n_samples) int32 (starts at index 0, as pointnet2)."""
    N = xyz.shape[1]

    def one(pts):
        def body(i, state):
            sel, dists = state
            last = pts[sel[i - 1]]
            d = jnp.sum((pts - last) ** 2, axis=-1)
            dists = jnp.minimum(dists, d)
            sel = sel.at[i].set(jnp.argmax(dists).astype(jnp.int32))
            return sel, dists

        sel0 = jnp.zeros((n_samples,), jnp.int32)
        d0 = jnp.full((N,), 1e10, F32)
        sel, _ = jax.lax.fori_loop(1, n_samples, body, (sel0, d0))
        return sel

    return jax.vmap(one)(xyz)


def ball_query(radius, nsample, xyz, new_xyz):
    """xyz: (B, N, 3), new_xyz: (B, n, 3) -> (B, n, nsample) int32."""
    N = xyz.shape[1]
    d2 = jnp.sum((new_xyz[:, :, None, :] - xyz[:, None, :, :]) ** 2, axis=-1)
    in_ball = d2 < radius * radius
    ar = jnp.arange(N, dtype=jnp.int32)
    key = jnp.where(in_ball, ar[None, None, :], N + ar[None, None, :])
    order = jnp.argsort(key, axis=-1).astype(jnp.int32)
    idx = order[..., :nsample]
    cnt = jnp.sum(in_ball, axis=-1, keepdims=True)
    first = idx[..., :1]
    pos = jnp.arange(nsample)[None, None, :]
    idx = jnp.where(pos < cnt, idx, first)
    idx = jnp.where(cnt > 0, idx, 0)
    return idx


def group_points(points, idx):
    """points: (B, N, C), idx: (B, n, k) -> (B, n, k, C)."""
    return jax.vmap(lambda p, i: p[i])(points, idx)


# --------------------------------------------------------------------------
# Modules
# --------------------------------------------------------------------------
def p4d_conv(xyzs, feats, params, cfg):
    """P4DConv. xyzs: (B, L, N, 3); feats: (B, L, C, N) -> ((B, L', n, 3), (B, L', D, n))."""
    B, L, N, _ = xyzs.shape
    radius, nsamples = cfg["radius"], cfg["nsamples"]
    n = N // cfg["spatial_stride"]
    tks, tstride = cfg["temporal_kernel_size"], cfg["temporal_stride"]
    pad0, pad1 = cfg["temporal_padding"]
    trad = (tks - 1) // 2

    feats_cl = jnp.transpose(feats, (0, 1, 3, 2))  # (B, L, N, C) channel-last

    frames_xyz = [xyzs[:, 0]] * pad0 + [xyzs[:, t] for t in range(L)] + [xyzs[:, L - 1]] * pad1
    frames_feat = [feats_cl[:, 0]] * pad0 + [feats_cl[:, t] for t in range(L)] + [feats_cl[:, L - 1]] * pad1

    new_xyzs, disp_all, featg_all = [], [], []
    for t in range(trad, len(frames_xyz) - trad, tstride):
        anchor_idx = farthest_point_sample(frames_xyz[t], n)                   # (B, n)
        anchor_xyz = jax.vmap(lambda p, i: p[i])(frames_xyz[t], anchor_idx)    # (B, n, 3)
        new_xyzs.append(anchor_xyz)
        disp_t, featg_t = [], []
        for i in range(t - trad, t + trad + 1):
            idx = ball_query(radius, nsamples, frames_xyz[i], anchor_xyz)      # (B, n, k)
            nbr_xyz = group_points(frames_xyz[i], idx)                         # (B, n, k, 3)
            xyz_disp = nbr_xyz - anchor_xyz[:, :, None, :]
            t_disp = jnp.full(xyz_disp.shape[:-1] + (1,), float(i - t), F32)
            disp_t.append(jnp.concatenate([xyz_disp, t_disp], axis=-1))        # (B, n, k, 4)
            featg_t.append(group_points(frames_feat[i], idx))                  # (B, n, k, C)
        disp_all.append(jnp.stack(disp_t, axis=2))     # (B, n, K, k, 4)
        featg_all.append(jnp.stack(featg_t, axis=2))   # (B, n, K, k, C)

    Lout = len(new_xyzs)
    new_xyz = jnp.stack(new_xyzs, axis=1)              # (B, Lout, n, 3)
    disp = jnp.stack(disp_all, axis=1)                 # (B, Lout, n, K, k, 4)
    featg = jnp.stack(featg_all, axis=1)               # (B, Lout, n, K, k, C)

    R = B * Lout * n
    S = tks * nsamples
    disp = jnp.transpose(disp, (3, 4, 0, 1, 2, 5)).reshape(S, R, 4)
    featg = jnp.transpose(featg, (3, 4, 0, 1, 2, 5)).reshape(S, R, -1)
    x = jnp.concatenate([disp, featg], axis=-1)                                  # (S, R, 4+C)
    w = jnp.concatenate([params["conv_d_w"], params["conv_f_w"]], axis=0)        # (4+C, D)

    out = tube_embed(x, w)                                                       # (R, D)
    D = w.shape[1]
    new_feat = out.reshape(B, Lout, n, D).transpose(0, 1, 3, 2)                  # (B, Lout, D, n)
    return new_xyz, new_feat


def transformer(x, params, heads, dim_head):
    B, T, dim = x.shape
    for layer in params["layers"]:
        x = attn_block(x, layer["ln1_g"], layer["ln1_b"], layer["w_qkv"],
                       layer["w_out"], layer["b_out"], heads, dim_head)
        x = ln_ffn(x.reshape(B * T, dim), layer["ln2_g"], layer["ln2_b"],
                   layer["w_ff1"], layer["b_ff1"], layer["w_ff2"], layer["b_ff2"],
                   add_residual=True).reshape(B, T, dim)
    return x


def p4d_trans_conv(sub_xyz, orig_xyz, sub_feat, orig_feat, params):
    """P4DTransConv: 3-NN inverse-distance interpolation + (conv1d + BN + ReLU)."""
    B, L, n, _ = sub_xyz.shape
    N = orig_xyz.shape[2]
    C = sub_feat.shape[2]
    C0 = orig_feat.shape[2]

    sx = sub_xyz.reshape(B * L, n, 3)
    ox = orig_xyz.reshape(B * L, N, 3)
    sf = jnp.transpose(sub_feat, (0, 1, 3, 2)).reshape(B * L, n, C)
    of = jnp.transpose(orig_feat, (0, 1, 3, 2)).reshape(B * L, N, C0)

    # TODO(synk): fuse the 3-NN search/gather into the conv kernel via scalar-
    #             prefetched indices (PrefetchScalarGridSpec) for very large N.
    d2 = jnp.sum((ox[:, :, None, :] - sx[:, None, :, :]) ** 2, axis=-1)    # (BL, N, n)
    idx = jnp.argsort(d2, axis=-1)[..., :3]                                # (BL, N, 3)
    dist = jnp.sqrt(jnp.take_along_axis(d2, idx, axis=-1))
    w = 1.0 / (dist + 1e-8)
    w = w / jnp.sum(w, axis=-1, keepdims=True)
    gathered = jax.vmap(lambda f, i: f[i])(sf, idx)                        # (BL, N, 3, C)

    M = B * L * N
    # TODO(synk): BatchNorm folded with eval-mode default running statistics.
    bn_scale = 1.0 / jnp.sqrt(jnp.asarray(1.0 + 1e-5, F32))
    wa = params["w"][:C] * bn_scale
    wb = params["w"][C:] * bn_scale
    out = interp_conv(gathered.reshape(M, 3 * C), w.reshape(M, 3),
                      of.reshape(M, C0), wa, wb)                           # (M, D)
    out = out.reshape(B, L, N, C).transpose(0, 1, 3, 2)                    # (B, L, C, N)
    return orig_xyz, out


# --------------------------------------------------------------------------
# Full P4TransformerDA forward
# --------------------------------------------------------------------------
def p4transformer_da_forward(params, inp, cfg):
    B, L, N, _ = inp.shape
    xyz_in = inp[..., :3]
    feat_in = jnp.transpose(inp[..., 3:], (0, 1, 3, 2))                    # (B, L, C0, N)

    # ---- tube embedding (P4DConv) ----
    xyzs0, features0 = p4d_conv(xyz_in, feat_in, params["tube"], cfg)
    _, Lq, D, Nq = features0.shape
    T = Lq * Nq

    # ---- spatio-temporal positional embedding (fused pos-conv + add + ReLU) ----
    ts = jnp.arange(1, Lq + 1, dtype=F32)[None, :, None, None]
    xyzts = jnp.concatenate([xyzs0, jnp.broadcast_to(ts, (B, Lq, Nq, 1))], axis=-1)
    xyzts = xyzts.reshape(B * T, 4)
    features = jnp.transpose(features0, (0, 1, 3, 2)).reshape(B * T, D)
    embedding = linear(xyzts, params["pos_w"], b=params["pos_b"],
                       residual=features,
                       activation="relu" if cfg["emb_relu"] else None)
    embedding = embedding.reshape(B, T, D)

    # ---- transformer (fused per-layer kernels) ----
    output = transformer(embedding, params["transformer"], cfg["heads"], cfg["dim_head"])

    # ---- memory reconstruction ----
    m_key = jnp.transpose(params["mem"][0], (1, 0))                        # (mem_size, dim)
    output_rec = mem_attention(output, m_key, 1.0 / sqrt(D))
    loss_rec = mse(output_rec, output)

    # ---- deconv (P4DTransConv) ----
    output_feat = output_rec.reshape(B, Lq, Nq, D).transpose(0, 1, 3, 2)   # (B, Lq, D, n)
    _, output_feat = p4d_trans_conv(xyzs0, xyz_in, output_feat, feat_in, params["deconv"])

    J, fd = cfg["num_joints"], cfg["final_dim"]

    # ---- seg head (1x1 Conv2d == channel matmul over all frames) ----
    of_cl = jnp.transpose(output_feat, (0, 1, 3, 2)).reshape(B * L * N, D)
    seg = linear(of_cl, params["seg_w"], b=params["seg_b"]).reshape(B, L, N, J)
    output_seg = jnp.transpose(seg, (0, 1, 3, 2))                          # (B, L, J, N)

    # ---- pc head: only the middle frame is consumed downstream ----
    mid = jnp.transpose(output_feat[:, (L - 1) // 2], (0, 2, 1)).reshape(B * N, D)
    output_pc = linear(mid, params["pc_w"], b=params["pc_b"]).reshape(B, N, fd)

    # ---- skeleton head (fused LayerNorm + Linear) ----
    output_skl = jnp.max(output_rec, axis=1)                               # (B, D)
    output_skl = ln_linear(output_skl, params["skl_ln_g"], params["skl_ln_b"],
                           params["skl_w"], params["skl_b"]).reshape(B, J, fd)

    # ---- QueryAttention: joints attend over point features (fused) ----
    output_skl = query_attention(output_skl, output_pc,
                                 params["fa_wq"], params["fa_wk"], params["fa_wv"],
                                 params["fa_wo"], params["fa_bo"],
                                 cfg["fa_heads"], cfg["fa_dim_head"])

    # ---- final head (fused LN + Linear + GELU + Linear) ----
    y = ln_ffn(output_skl.reshape(B * J, fd), params["fh_ln_g"], params["fh_ln_b"],
               params["fh_w1"], params["fh_b1"], params["fh_w2"], params["fh_b2"],
               add_residual=False)
    output_skl = y.reshape(B, J, 3)[:, None]                               # (B, 1, J, 3)

    return output_skl, output_seg, loss_rec


# --------------------------------------------------------------------------
# Deterministic parameter initialization
# --------------------------------------------------------------------------
def _init(key, shape, scale=0.05):
    return scale * jax.random.normal(key, shape, dtype=F32)


def init_params(key, cfg):
    dim, depth = cfg["dim"], cfg["depth"]
    heads, dim_head, mlp_dim = cfg["heads"], cfg["dim_head"], cfg["mlp_dim"]
    inner = heads * dim_head
    feats = cfg["features"]
    J, fd = cfg["num_joints"], cfg["final_dim"]
    fa_inner = cfg["fa_heads"] * cfg["fa_dim_head"]

    keys = iter(jax.random.split(key, 64))
    nxt = lambda: next(keys)
    p = {}
    p["tube"] = {"conv_d_w": _init(nxt(), (4, dim)), "conv_f_w": _init(nxt(), (feats, dim))}
    p["pos_w"] = _init(nxt(), (4, dim)); p["pos_b"] = _init(nxt(), (dim,))
    layers = []
    for _ in range(depth):
        layers.append(dict(
            ln1_g=jnp.ones((dim,), F32), ln1_b=jnp.zeros((dim,), F32),
            w_qkv=_init(nxt(), (dim, 3 * inner)),
            w_out=_init(nxt(), (inner, dim)), b_out=_init(nxt(), (dim,)),
            ln2_g=jnp.ones((dim,), F32), ln2_b=jnp.zeros((dim,), F32),
            w_ff1=_init(nxt(), (dim, mlp_dim)), b_ff1=_init(nxt(), (mlp_dim,)),
            w_ff2=_init(nxt(), (mlp_dim, dim)), b_ff2=_init(nxt(), (dim,)),
        ))
    p["transformer"] = {"layers": layers}
    p["mem"] = jax.random.normal(nxt(), (1, dim, cfg["mem_size"]), dtype=F32)   # normal_(0, 1)
    p["deconv"] = {"w": _init(nxt(), (dim + feats, dim))}
    p["seg_w"] = _init(nxt(), (dim, J)); p["seg_b"] = _init(nxt(), (J,))
    p["pc_w"] = _init(nxt(), (dim, fd)); p["pc_b"] = _init(nxt(), (fd,))
    p["skl_ln_g"] = jnp.ones((dim,), F32); p["skl_ln_b"] = jnp.zeros((dim,), F32)
    p["skl_w"] = _init(nxt(), (dim, J * fd)); p["skl_b"] = _init(nxt(), (J * fd,))
    p["fa_wq"] = _init(nxt(), (fd, fa_inner)); p["fa_wk"] = _init(nxt(), (fd, fa_inner))
    p["fa_wv"] = _init(nxt(), (fd, fa_inner))
    p["fa_wo"] = _init(nxt(), (fa_inner, fd)); p["fa_bo"] = _init(nxt(), (fd,))
    p["fh_ln_g"] = jnp.ones((fd,), F32); p["fh_ln_b"] = jnp.zeros((fd,), F32)
    p["fh_w1"] = _init(nxt(), (fd, fd)); p["fh_b1"] = _init(nxt(), (fd,))
    p["fh_w2"] = _init(nxt(), (fd, 3)); p["fh_b2"] = _init(nxt(), (3,))
    return p


# --------------------------------------------------------------------------
if __name__ == "__main__":
    cfg = dict(
        radius=0.7, nsamples=4, spatial_stride=4,
        temporal_kernel_size=3, temporal_stride=1, temporal_padding=(1, 1),
        emb_relu=True, dim=32, depth=2, heads=2, dim_head=8, mlp_dim=32,
        output_dim=15, mem_size=8, features=3, fa_heads=8, fa_dim_head=64,
    )
    cfg["num_joints"] = cfg["output_dim"] // 3
    cfg["final_dim"] = cfg["dim"] // 8

    key = jax.random.PRNGKey(0)
    kp, kx, kf = jax.random.split(key, 3)
    params = init_params(kp, cfg)

    B, L, N = 2, 4, 16
    xyz = jax.random.uniform(kx, (B, L, N, 3), dtype=F32)
    feat = jax.random.normal(kf, (B, L, N, cfg["features"]), dtype=F32)
    inp = jnp.concatenate([xyz, feat], axis=-1)   # (B, L, N, 3 + features)

    fwd = jax.jit(lambda p, x: p4transformer_da_forward(p, x, cfg))
    out_skl, out_seg, loss_rec = fwd(params, inp)
    jax.block_until_ready((out_skl, out_seg, loss_rec))

    assert out_skl.shape == (B, 1, cfg["num_joints"], 3)
    assert out_seg.shape == (B, L, cfg["num_joints"], N)
    assert loss_rec.shape == ()
    print("KERNEL_OK")
</pallas_src>

<mosaic_0001>
module attributes {stable_mosaic.version = 11 : i64} {
  func.func @_tube_embed_kernel(%arg0: i32, %arg1: i32, %arg2: memref<1x32x7xbf16, #tpu.memory_space<vmem>>, %arg3: memref<7x32xbf16, #tpu.memory_space<vmem>>, %arg4: memref<32x32xf32, #tpu.memory_space<vmem>>) attributes {dimension_semantics = [#tpu.dimension_semantics<parallel>, #tpu.dimension_semantics<arbitrary>], iteration_bounds = array<i64: 1, 12>, scalar_prefetch = 0 : i64, scratch_operands = 0 : i64, tpu.core_type = #tpu.core_type<tc>, window_params = [{transform_indices = @transform_0, window_bounds = array<i64: 1, 32, 7>}, {pipeline_mode = #tpu.pipeline_mode<synchronous>, transform_indices = @transform_1, window_bounds = array<i64: 7, 32>}, {transform_indices = @transform_2, window_bounds = array<i64: 32, 32>}]} {
    %c0 = arith.constant 0 : index
    %c0_0 = arith.constant 0 : index
    %c0_1 = arith.constant 0 : index
    %0 = vector.load %arg2[%c0, %c0_0, %c0_1] : memref<1x32x7xbf16, #tpu.memory_space<vmem>>, vector<1x32x7xbf16>
    %1 = vector.shape_cast %0 : vector<1x32x7xbf16> to vector<32x7xbf16>
    %c0_2 = arith.constant 0 : index
    %c0_3 = arith.constant 0 : index
    %2 = vector.load %arg3[%c0_2, %c0_3] : memref<7x32xbf16, #tpu.memory_space<vmem>>, vector<7x32xbf16>
    %cst = arith.constant dense<0.000000e+00> : vector<32x32xf32>
    %3 = tpu.matmul %1, %2, %cst {dimension_numbers = #tpu.dot_dimension_numbers<[1], [0], [0], [1], [0, 0, 1, 1], [], []>} : vector<32x7xbf16>, vector<7x32xbf16>, vector<32x32xf32> -> vector<32x32xf32>
    %c0_i32 = arith.constant 0 : i32
    %4 = arith.cmpi eq, %arg1, %c0_i32 : i32
    %5 = arith.extui %4 : i1 to i32
    %c0_i32_4 = arith.constant 0 : i32
    %6 = arith.cmpi ne, %5, %c0_i32_4 : i32
    scf.if %6 {
      %c0_7 = arith.constant 0 : index
      %c0_8 = arith.constant 0 : index
      %10 = vector.load %arg4[%c0_7, %c0_8] : memref<32x32xf32, #tpu.memory_space<vmem>>, vector<32x32xf32>
      tpu.vector_store %arg4[%c0_7, %c0_8], %3 {strides = array<i32>} : memref<32x32xf32, #tpu.memory_space<vmem>>, vector<32x32xf32>,
    } else {
    }
    %c0_i32_5 = arith.constant 0 : i32
    %7 = arith.cmpi sgt, %arg1, %c0_i32_5 : i32
    %8 = arith.extui %7 : i1 to i32
    %c0_i32_6 = arith.constant 0 : i32
    %9 = arith.cmpi ne, %8, %c0_i32_6 : i32
    scf.if %9 {
      %c0_7 = arith.constant 0 : index
      %c0_8 = arith.constant 0 : index
      %10 = vector.load %arg4[%c0_7, %c0_8] : memref<32x32xf32, #tpu.memory_space<vmem>>, vector<32x32xf32>
      %11 = arith.maximumf %10, %3 : vector<32x32xf32>
      %c0_9 = arith.constant 0 : index
      %c0_10 = arith.constant 0 : index
      %12 = vector.load %arg4[%c0_9, %c0_10] : memref<32x32xf32, #tpu.memory_space<vmem>>, vector<32x32xf32>
      tpu.vector_store %arg4[%c0_9, %c0_10], %11 {strides = array<i32>} : memref<32x32xf32, #tpu.memory_space<vmem>>, vector<32x32xf32>,
    } else {
    }
    return
  }
  func.func @transform_0(%arg0: i32, %arg1: i32) -> (i32, i32, i32) {
    %c0_i32 = arith.constant 0 : i32
    %c0_i32_0 = arith.constant 0 : i32
    return %arg1, %arg0, %c0_i32 : i32, i32, i32
  }
  func.func @transform_1(%arg0: i32, %arg1: i32) -> (i32, i32) {
    %c0_i32 = arith.constant 0 : i32
    %c0_i32_0 = arith.constant 0 : i32
    %c0_i32_1 = arith.constant 0 : i32
    return %c0_i32, %c0_i32_0 : i32, i32
  }
  func.func @transform_2(%arg0: i32, %arg1: i32) -> (i32, i32) {
    %c0_i32 = arith.constant 0 : i32
    %c0_i32_0 = arith.constant 0 : i32
    return %arg0, %c0_i32 : i32, i32
  }
}

module attributes {stable_mosaic.version = 11 : i64} {
  func.func @_linear_kernel(%arg0: i32, %arg1: memref<32x4xbf16, #tpu.memory_space<vmem>>, %arg2: memref<4x32xbf16, #tpu.memory_space<vmem>>, %arg3: memref<1x32xf32, #tpu.memory_space<vmem>>, %arg4: memref<32x32xf32, #tpu.memory_space<vmem>>, %arg5: memref<32x32xf32, #tpu.memory_space<vmem>>) attributes {dimension_semantics = [#tpu.dimension_semantics<parallel>], iteration_bounds = array<i64: 1>, scalar_prefetch = 0 : i64, scratch_operands = 0 : i64, tpu.core_type = #tpu.core_type<tc>, window_params = [{transform_indices = @transform_0, window_bounds = array<i64: 32, 4>}, {pipeline_mode = #tpu.pipeline_mode<synchronous>, transform_indices = @transform_1, window_bounds = array<i64: 4, 32>}, {pipeline_mode = #tpu.pipeline_mode<synchronous>, transform_indices = @transform_2, window_bounds = array<i64: 1, 32>}, {transform_indices = @transform_3, window_bounds = array<i64: 32, 32>}, {transform_indices = @transform_4, window_bounds = array<i64: 32, 32>}]} {
    %c0 = arith.constant 0 : index
    %c0_0 = arith.constant 0 : index
    %0 = vector.load %arg1[%c0, %c0_0] : memref<32x4xbf16, #tpu.memory_space<vmem>>, vector<32x4xbf16>
    %c0_1 = arith.constant 0 : index
    %c0_2 = arith.constant 0 : index
    %1 = vector.load %arg2[%c0_1, %c0_2] : memref<4x32xbf16, #tpu.memory_space<vmem>>, vector<4x32xbf16>
    %cst = arith.constant dense<0.000000e+00> : vector<32x32xf32>
    %2 = tpu.matmul %0, %1, %cst {dimension_numbers = #tpu.dot_dimension_numbers<[1], [0], [0], [1], [0, 0, 1, 1], [], []>} : vector<32x4xbf16>, vector<4x32xbf16>, vector<32x32xf32> -> vector<32x32xf32>
    %c0_3 = arith.constant 0 : index
    %c0_4 = arith.constant 0 : index
    %3 = vector.load %arg3[%c0_3, %c0_4] : memref<1x32xf32, #tpu.memory_space<vmem>>, vector<1x32xf32>
    %4 = vector.broadcast %3 : vector<1x32xf32> to vector<32x32xf32>
    %5 = arith.addf %2, %4 : vector<32x32xf32>
    %c0_5 = arith.constant 0 : index
    %c0_6 = arith.constant 0 : index
    %6 = vector.load %arg4[%c0_5, %c0_6] : memref<32x32xf32, #tpu.memory_space<vmem>>, vector<32x32xf32>
    %7 = arith.addf %5, %6 : vector<32x32xf32>
    %cst_7 = arith.constant 0.000000e+00 : f32
    %8 = vector.broadcast %cst_7 : f32 to vector<32x32xf32>
    %9 = arith.maximumf %7, %8 : vector<32x32xf32>
    %c0_8 = arith.constant 0 : index
    %c0_9 = arith.constant 0 : index
    %10 = vector.load %arg5[%c0_8, %c0_9] : memref<32x32xf32, #tpu.memory_space<vmem>>, vector<32x32xf32>
    tpu.vector_store %arg5[%c0_8, %c0_9], %9 {strides = array<i32>} : memref<32x32xf32, #tpu.memory_space<vmem>>, vector<32x32xf32>,
    return
  }
  func.func @transform_0(%arg0: i32) -> (i32, i32) {
    %c0_i32 = arith.constant 0 : i32
    %c0_i32_0 = arith.constant 0 : i32
    return %arg0, %c0_i32 : i32, i32
  }
  func.func @transform_1(%arg0: i32) -> (i32, i32) {
    %c0_i32 = arith.constant 0 : i32
    %c0_i32_0 = arith.constant 0 : i32
    %c0_i32_1 = arith.constant 0 : i32
    return %c0_i32, %c0_i32_0 : i32, i32
  }
  func.func @transform_2(%arg0: i32) -> (i32, i32) {
    %c0_i32 = arith.constant 0 : i32
    %c0_i32_0 = arith.constant 0 : i32
    %c0_i32_1 = arith.constant 0 : i32
    return %c0_i32, %c0_i32_0 : i32, i32
  }
  func.func @transform_3(%arg0: i32) -> (i32, i32) {
    %c0_i32 = arith.constant 0 : i32
    %c0_i32_0 = arith.constant 0 : i32
    return %arg0, %c0_i32 : i32, i32
  }
  func.func @transform_4(%arg0: i32) -> (i32, i32) {
    %c0_i32 = arith.constant 0 : i32
    %c0_i32_0 = arith.constant 0 : i32
    return %arg0, %c0_i32 : i32, i32
  }
}

module attributes {stable_mosaic.version = 11 : i64} {
  func.func @_attn_block_kernel(%arg0: i32, %arg1: memref<1x16x32xf32, #tpu.memory_space<vmem>>, %arg2: memref<1x32xf32, #tpu.memory_space<vmem>>, %arg3: memref<1x32xf32, #tpu.memory_space<vmem>>, %arg4: memref<32x48xbf16, #tpu.memory_space<vmem>>, %arg5: memref<16x32xbf16, #tpu.memory_space<vmem>>, %arg6: memref<1x32xf32, #tpu.memory_space<vmem>>, %arg7: memref<1x16x32xf32, #tpu.memory_space<vmem>>) attributes {dimension_semantics = [#tpu.dimension_semantics<parallel>], iteration_bounds = array<i64: 2>, scalar_prefetch = 0 : i64, scratch_operands = 0 : i64, tpu.core_type = #tpu.core_type<tc>, window_params = [{transform_indices = @transform_0, window_bounds = array<i64: 1, 16, 32>}, {pipeline_mode = #tpu.pipeline_mode<synchronous>, transform_indices = @transform_1, window_bounds = array<i64: 1, 32>}, {pipeline_mode = #tpu.pipeline_mode<synchronous>, transform_indices = @transform_2, window_bounds = array<i64: 1, 32>}, {pipeline_mode = #tpu.pipeline_mode<synchronous>, transform_indices = @transform_3, window_bounds = array<i64: 32, 48>}, {pipeline_mode = #tpu.pipeline_mode<synchronous>, transform_indices = @transform_4, window_bounds = array<i64: 16, 32>}, {pipeline_mode = #tpu.pipeline_mode<synchronous>, transform_indices = @transform_5, window_bounds = array<i64: 1, 32>}, {transform_indices = @transform_6, window_bounds = array<i64: 1, 16, 32>}]} {
    %c0 = arith.constant 0 : index
    %c0_0 = arith.constant 0 : index
    %c0_1 = arith.constant 0 : index
    %0 = vector.load %arg1[%c0, %c0_0, %c0_1] : memref<1x16x32xf32, #tpu.memory_space<vmem>>, vector<1x16x32xf32>
    %1 = vector.shape_cast %0 : vector<1x16x32xf32> to vector<16x32xf32>
    %cst = arith.constant dense<0.000000e+00> : vector<16xf32>
    %2 = vector.multi_reduction <add>, %1, %cst [1] : vector<16x32xf32> to vector<16xf32>
    %3 = vector.shape_cast %2 : vector<16xf32> to vector<16x1xf32>
    %cst_2 = arith.constant 3.200000e+01 : f32
    %4 = vector.broadcast %cst_2 : f32 to vector<16x1xf32>
    %5 = arith.divf %3, %4 : vector<16x1xf32>
    %6 = vector.broadcast %5 : vector<16x1xf32> to vector<16x32xf32>
    %7 = arith.subf %1, %6 : vector<16x32xf32>
    %8 = arith.mulf %7, %7 : vector<16x32xf32>
    %cst_3 = arith.constant dense<0.000000e+00> : vector<16xf32>
    %9 = vector.multi_reduction <add>, %8, %cst_3 [1] : vector<16x32xf32> to vector<16xf32>
    %10 = vector.shape_cast %9 : vector<16xf32> to vector<16x1xf32>
    %cst_4 = arith.constant 3.200000e+01 : f32
    %11 = vector.broadcast %cst_4 : f32 to vector<16x1xf32>
    %12 = arith.divf %10, %11 : vector<16x1xf32>
    %cst_5 = arith.constant 9.99999974E-6 : f32
    %13 = vector.broadcast %cst_5 : f32 to vector<16x1xf32>
    %14 = arith.addf %12, %13 : vector<16x1xf32>
    %15 = math.rsqrt %14 : vector<16x1xf32>
    %16 = vector.broadcast %15 : vector<16x1xf32> to vector<16x32xf32>
    %17 = arith.mulf %7, %16 : vector<16x32xf32>
    %c0_6 = arith.constant 0 : index
    %c0_7 = arith.constant 0 : index
    %18 = vector.load %arg2[%c0_6, %c0_7] : memref<1x32xf32, #tpu.memory_space<vmem>>, vector<1x32xf32>
    %19 = vector.broadcast %18 : vector<1x32xf32> to vector<16x32xf32>
    %20 = arith.mulf %17, %19 : vector<16x32xf32>
    %c0_8 = arith.constant 0 : index
    %c0_9 = arith.constant 0 : index
    %21 = vector.load %arg3[%c0_8, %c0_9] : memref<1x32xf32, #tpu.memory_space<vmem>>, vector<1x32xf32>
    %22 = vector.broadcast %21 : vector<1x32xf32> to vector<16x32xf32>
    %23 = arith.addf %20, %22 : vector<16x32xf32>
    %24 = arith.truncf %23 : vector<16x32xf32> to vector<16x32xbf16>
    %c0_10 = arith.constant 0 : index
    %c0_11 = arith.constant 0 : index
    %25 = vector.load %arg4[%c0_10, %c0_11] : memref<32x48xbf16, #tpu.memory_space<vmem>>, vector<32x48xbf16>
    %cst_12 = arith.constant dense<0.000000e+00> : vector<16x48xf32>
    %26 = tpu.matmul %24, %25, %cst_12 {dimension_numbers = #tpu.dot_dimension_numbers<[1], [0], [0], [1], [0, 0, 1, 1], [], []>} : vector<16x32xbf16>, vector<32x48xbf16>, vector<16x48xf32> -> vector<16x48xf32>
    %27 = vector.extract_strided_slice %26 {offsets = [0, 0], sizes = [16, 8], strides = [1, 1]} : vector<16x48xf32> to vector<16x8xf32>
    %28 = vector.extract_strided_slice %26 {offsets = [0, 16], sizes = [16, 8], strides = [1, 1]} : vector<16x48xf32> to vector<16x8xf32>
    %29 = vector.extract_strided_slice %26 {offsets = [0, 32], sizes = [16, 8], strides = [1, 1]} : vector<16x48xf32> to vector<16x8xf32>
    %30 = arith.truncf %27 : vector<16x8xf32> to vector<16x8xbf16>
    %31 = arith.truncf %28 : vector<16x8xf32> to vector<16x8xbf16>
    %cst_13 = arith.constant dense<0.000000e+00> : vector<16x16xf32>
    %32 = tpu.matmul %30, %31, %cst_13 {dimension_numbers = #tpu.dot_dimension_numbers<[1], [1], [0], [0], [0, 0, 1, 0], [], []>} : vector<16x8xbf16>, vector<16x8xbf16>, vector<16x16xf32> -> vector<16x16xf32>
    %cst_14 = arith.constant 0.353553385 : f32
    %33 = vector.broadcast %cst_14 : f32 to vector<16x16xf32>
    %34 = arith.mulf %32, %33 : vector<16x16xf32>
    %cst_15 = arith.constant dense<0xFF800000> : vector<16xf32>
    %35 = vector.multi_reduction <maximumf>, %34, %cst_15 [1] : vector<16x16xf32> to vector<16xf32>
    %36 = vector.shape_cast %35 : vector<16xf32> to vector<16x1xf32>
    %37 = vector.broadcast %36 : vector<16x1xf32> to vector<16x16xf32>
    %38 = arith.subf %34, %37 : vector<16x16xf32>
    %39 = math.exp %38 : vector<16x16xf32>
    %cst_16 = arith.constant dense<0.000000e+00> : vector<16xf32>
    %40 = vector.multi_reduction <add>, %39, %cst_16 [1] : vector<16x16xf32> to vector<16xf32>
    %41 = vector.shape_cast %40 : vector<16xf32> to vector<16x1xf32>
    %42 = tpu.reciprocal %41 {approx = true} : vector<16x1xf32> -> vector<16x1xf32>
    %43 = vector.broadcast %42 : vector<16x1xf32> to vector<16x16xf32>
    %44 = arith.mulf %39, %43 : vector<16x16xf32>
    %45 = arith.truncf %44 : vector<16x16xf32> to vector<16x16xbf16>
    %46 = arith.truncf %29 : vector<16x8xf32> to vector<16x8xbf16>
    %cst_17 = arith.constant dense<0.000000e+00> : vector<16x8xf32>
    %47 = tpu.matmul %45, %46, %cst_17 {dimension_numbers = #tpu.dot_dimension_numbers<[1], [0], [0], [1], [0, 0, 1, 1], [], []>} : vector<16x16xbf16>, vector<16x8xbf16>, vector<16x8xf32> -> vector<16x8xf32>
    %48 = vector.extract_strided_slice %26 {offsets = [0, 8], sizes = [16, 8], strides = [1, 1]} : vector<16x48xf32> to vector<16x8xf32>
    %49 = vector.extract_strided_slice %26 {offsets = [0, 24], sizes = [16, 8], strides = [1, 1]} : vector<16x48xf32> to vector<16x8xf32>
    %50 = vector.extract_strided_slice %26 {offsets = [0, 40], sizes = [16, 8], strides = [1, 1]} : vector<16x48xf32> to vector<16x8xf32>
    %51 = arith.truncf %48 : vector<16x8xf32> to vector<16x8xbf16>
    %52 = arith.truncf %49 : vector<16x8xf32> to vector<16x8xbf16>
    %cst_18 = arith.constant dense<0.000000e+00> : vector<16x16xf32>
    %53 = tpu.matmul %51, %52, %cst_18 {dimension_numbers = #tpu.dot_dimension_numbers<[1], [1], [0], [0], [0, 0, 1, 0], [], []>} : vector<16x8xbf16>, vector<16x8xbf16>, vector<16x16xf32> -> vector<16x16xf32>
    %cst_19 = arith.constant 0.353553385 : f32
    %54 = vector.broadcast %cst_19 : f32 to vector<16x16xf32>
    %55 = arith.mulf %53, %54 : vector<16x16xf32>
    %cst_20 = arith.constant dense<0xFF800000> : vector<16xf32>
    %56 = vector.multi_reduction <maximumf>, %55, %cst_20 [1] : vector<16x16xf32> to vector<16xf32>
    %57 = vector.shape_cast %56 : vector<16xf32> to vector<16x1xf32>
    %58 = vector.broadcast %57 : vector<16x1xf32> to vector<16x16xf32>
    %59 = arith.subf %55, %58 : vector<16x16xf32>
    %60 = math.exp %59 : vector<16x16xf32>
    %cst_21 = arith.constant dense<0.000000e+00> : vector<16xf32>
    %61 = vector.multi_reduction <add>, %60, %cst_21 [1] : vector<16x16xf32> to vector<16xf32>
    %62 = vector.shape_cast %61 : vector<16xf32> to vector<16x1xf32>
    %63 = tpu.reciprocal %62 {approx = true} : vector<16x1xf32> -> vector<16x1xf32>
    %64 = vector.broadcast %63 : vector<16x1xf32> to vector<16x16xf32>
    %65 = arith.mulf %60, %64 : vector<16x16xf32>
    %66 = arith.truncf %65 : vector<16x16xf32> to vector<16x16xbf16>
    %67 = arith.truncf %50 : vector<16x8xf32> to vector<16x8xbf16>
    %cst_22 = arith.constant dense<0.000000e+00> : vector<16x8xf32>
    %68 = tpu.matmul %66, %67, %cst_22 {dimension_numbers = #tpu.dot_dimension_numbers<[1], [0], [0], [1], [0, 0, 1, 1], [], []>} : vector<16x16xbf16>, vector<16x8xbf16>, vector<16x8xf32> -> vector<16x8xf32>
    %69 = tpu.concatenate %47, %68 in 1 : vector<16x8xf32>, vector<16x8xf32> -> vector<16x16xf32>
    %70 = arith.truncf %69 : vector<16x16xf32> to vector<16x16xbf16>
    %c0_23 = arith.constant 0 : index
    %c0_24 = arith.constant 0 : index
    %71 = vector.load %arg5[%c0_23, %c0_24] : memref<16x32xbf16, #tpu.memory_space<vmem>>, vector<16x32xbf16>
    %cst_25 = arith.constant dense<0.000000e+00> : vector<16x32xf32>
    %72 = tpu.matmul %70, %71, %cst_25 {dimension_numbers = #tpu.dot_dimension_numbers<[1], [0], [0], [1], [0, 0, 1, 1], [], []>} : vector<16x16xbf16>, vector<16x32xbf16>, vector<16x32xf32> -> vector<16x32xf32>
    %c0_26 = arith.constant 0 : index
    %c0_27 = arith.constant 0 : index
    %73 = vector.load %arg6[%c0_26, %c0_27] : memref<1x32xf32, #tpu.memory_space<vmem>>, vector<1x32xf32>
    %74 = vector.broadcast %73 : vector<1x32xf32> to vector<16x32xf32>
    %75 = arith.addf %72, %74 : vector<16x32xf32>
    %76 = arith.addf %1, %75 : vector<16x32xf32>
    %c0_28 = arith.constant 0 : index
    %c0_29 = arith.constant 0 : index
    %c0_30 = arith.constant 0 : index
    %77 = vector.load %arg7[%c0_28, %c0_29, %c0_30] : memref<1x16x32xf32, #tpu.memory_space<vmem>>, vector<1x16x32xf32>
    %78 = vector.shape_cast %77 : vector<1x16x32xf32> to vector<16x32xf32>
    %79 = vector.shape_cast %76 : vector<16x32xf32> to vector<1x16x32xf32>
    tpu.vector_store %arg7[%c0_28, %c0_29, %c0_30], %79 {strides = array<i32>} : memref<1x16x32xf32, #tpu.memory_space<vmem>>, vector<1x16x32xf32>,
    return
  }
  func.func @transform_0(%arg0: i32) -> (i32, i32, i32) {
    %c0_i32 = arith.constant 0 : i32
    %c0_i32_0 = arith.constant 0 : i32
    %c0_i32_1 = arith.constant 0 : i32
    return %arg0, %c0_i32, %c0_i32_0 : i32, i32, i32
  }
  func.func @transform_1(%arg0: i32) -> (i32, i32) {
    %c0_i32 = arith.constant 0 : i32
    %c0_i32_0 = arith.constant 0 : i32
    %c0_i32_1 = arith.constant 0 : i32
    return %c0_i32, %c0_i32_0 : i32, i32
  }
  func.func @transform_2(%arg0: i32) -> (i32, i32) {
    %c0_i32 = arith.constant 0 : i32
    %c0_i32_0 = arith.constant 0 : i32
    %c0_i32_1 = arith.constant 0 : i32
    return %c0_i32, %c0_i32_0 : i32, i32
  }
  func.func @transform_3(%arg0: i32) -> (i32, i32) {
    %c0_i32 = arith.constant 0 : i32
    %c0_i32_0 = arith.constant 0 : i32
    %c0_i32_1 = arith.constant 0 : i32
    return %c0_i32, %c0_i32_0 : i32, i32
  }
  func.func @transform_4(%arg0: i32) -> (i32, i32) {
    %c0_i32 = arith.constant 0 : i32
    %c0_i32_0 = arith.constant 0 : i32
    %c0_i32_1 = arith.constant 0 : i32
    return %c0_i32, %c0_i32_0 : i32, i32
  }
  func.func @transform_5(%arg0: i32) -> (i32, i32) {
    %c0_i32 = arith.constant 0 : i32
    %c0_i32_0 = arith.constant 0 : i32
    %c0_i32_1 = arith.constant 0 : i32
    return %c0_i32, %c0_i32_0 : i32, i32
  }
  func.func @transform_6(%arg0: i32) -> (i32, i32, i32) {
    %c0_i32 = arith.constant 0 : i32
    %c0_i32_0 = arith.constant 0 : i32
    %c0_i32_1 = arith.constant 0 : i32
    return %arg0, %c0_i32, %c0_i32_0 : i32, i32, i32
  }
}

module attributes {stable_mosaic.version = 11 : i64} {
  func.func @_ln_ffn_kernel(%arg0: i32, %arg1: memref<32x32xf32, #tpu.memory_space<vmem>>, %arg2: memref<1x32xf32, #tpu.memory_space<vmem>>, %arg3: memref<1x32xf32, #tpu.memory_space<vmem>>, %arg4: memref<32x32xbf16, #tpu.memory_space<vmem>>, %arg5: memref<1x32xf32, #tpu.memory_space<vmem>>, %arg6: memref<32x32xbf16, #tpu.memory_space<vmem>>, %arg7: memref<1x32xf32, #tpu.memory_space<vmem>>, %arg8: memref<32x32xf32, #tpu.memory_space<vmem>>) attributes {dimension_semantics = [#tpu.dimension_semantics<parallel>], iteration_bounds = array<i64: 1>, scalar_prefetch = 0 : i64, scratch_operands = 0 : i64, tpu.core_type = #tpu.core_type<tc>, window_params = [{transform_indices = @transform_0, window_bounds = array<i64: 32, 32>}, {pipeline_mode = #tpu.pipeline_mode<synchronous>, transform_indices = @transform_1, window_bounds = array<i64: 1, 32>}, {pipeline_mode = #tpu.pipeline_mode<synchronous>, transform_indices = @transform_2, window_bounds = array<i64: 1, 32>}, {pipeline_mode = #tpu.pipeline_mode<synchronous>, transform_indices = @transform_3, window_bounds = array<i64: 32, 32>}, {pipeline_mode = #tpu.pipeline_mode<synchronous>, transform_indices = @transform_4, window_bounds = array<i64: 1, 32>}, {pipeline_mode = #tpu.pipeline_mode<synchronous>, transform_indices = @transform_5, window_bounds = array<i64: 32, 32>}, {pipeline_mode = #tpu.pipeline_mode<synchronous>, transform_indices = @transform_6, window_bounds = array<i64: 1, 32>}, {transform_indices = @transform_7, window_bounds = array<i64: 32, 32>}]} {
    %c0 = arith.constant 0 : index
    %c0_0 = arith.constant 0 : index
    %0 = vector.load %arg1[%c0, %c0_0] : memref<32x32xf32, #tpu.memory_space<vmem>>, vector<32x32xf32>
    %cst = arith.constant dense<0.000000e+00> : vector<32xf32>
    %1 = vector.multi_reduction <add>, %0, %cst [1] : vector<32x32xf32> to vector<32xf32>
    %2 = vector.shape_cast %1 : vector<32xf32> to vector<32x1xf32>
    %cst_1 = arith.constant 3.200000e+01 : f32
    %3 = vector.broadcast %cst_1 : f32 to vector<32x1xf32>
    %4 = arith.divf %2, %3 : vector<32x1xf32>
    %5 = vector.broadcast %4 : vector<32x1xf32> to vector<32x32xf32>
    %6 = arith.subf %0, %5 : vector<32x32xf32>
    %7 = arith.mulf %6, %6 : vector<32x32xf32>
    %cst_2 = arith.constant dense<0.000000e+00> : vector<32xf32>
    %8 = vector.multi_reduction <add>, %7, %cst_2 [1] : vector<32x32xf32> to vector<32xf32>
    %9 = vector.shape_cast %8 : vector<32xf32> to vector<32x1xf32>
    %cst_3 = arith.constant 3.200000e+01 : f32
    %10 = vector.broadcast %cst_3 : f32 to vector<32x1xf32>
    %11 = arith.divf %9, %10 : vector<32x1xf32>
    %cst_4 = arith.constant 9.99999974E-6 : f32
    %12 = vector.broadcast %cst_4 : f32 to vector<32x1xf32>
    %13 = arith.addf %11, %12 : vector<32x1xf32>
    %14 = math.rsqrt %13 : vector<32x1xf32>
    %15 = vector.broadcast %14 : vector<32x1xf32> to vector<32x32xf32>
    %16 = arith.mulf %6, %15 : vector<32x32xf32>
    %c0_5 = arith.constant 0 : index
    %c0_6 = arith.constant 0 : index
    %17 = vector.load %arg2[%c0_5, %c0_6] : memref<1x32xf32, #tpu.memory_space<vmem>>, vector<1x32xf32>
    %18 = vector.broadcast %17 : vector<1x32xf32> to vector<32x32xf32>
    %19 = arith.mulf %16, %18 : vector<32x32xf32>
    %c0_7 = arith.constant 0 : index
    %c0_8 = arith.constant 0 : index
    %20 = vector.load %arg3[%c0_7, %c0_8] : memref<1x32xf32, #tpu.memory_space<vmem>>, vector<1x32xf32>
    %21 = vector.broadcast %20 : vector<1x32xf32> to vector<32x32xf32>
    %22 = arith.addf %19, %21 : vector<32x32xf32>
    %23 = arith.truncf %22 : vector<32x32xf32> to vector<32x32xbf16>
    %c0_9 = arith.constant 0 : index
    %c0_10 = arith.constant 0 : index
    %24 = vector.load %arg4[%c0_9, %c0_10] : memref<32x32xbf16, #tpu.memory_space<vmem>>, vector<32x32xbf16>
    %cst_11 = arith.constant dense<0.000000e+00> : vector<32x32xf32>
    %25 = tpu.matmul %23, %24, %cst_11 {dimension_numbers = #tpu.dot_dimension_numbers<[1], [0], [0], [1], [0, 0, 1, 1], [], []>} : vector<32x32xbf16>, vector<32x32xbf16>, vector<32x32xf32> -> vector<32x32xf32>
    %c0_12 = arith.constant 0 : index
    %c0_13 = arith.constant 0 : index
    %26 = vector.load %arg5[%c0_12, %c0_13] : memref<1x32xf32, #tpu.memory_space<vmem>>, vector<1x32xf32>
    %27 = vector.broadcast %26 : vector<1x32xf32> to vector<32x32xf32>
    %28 = arith.addf %25, %27 : vector<32x32xf32>
    %cst_14 = arith.constant 0.707106769 : f32
    %29 = vector.broadcast %cst_14 : f32 to vector<32x32xf32>
    %30 = arith.mulf %28, %29 : vector<32x32xf32>
    %31 = math.absf %30 : vector<32x32xf32>
    %cst_15 = arith.constant 0.327591091 : f32
    %32 = vector.broadcast %cst_15 : f32 to vector<32x32xf32>
    %33 = arith.mulf %32, %31 : vector<32x32xf32>
    %cst_16 = arith.constant 1.000000e+00 : f32
    %34 = vector.broadcast %cst_16 : f32 to vector<32x32xf32>
    %35 = arith.addf %34, %33 : vector<32x32xf32>
    %cst_17 = arith.constant 1.000000e+00 : f32
    %36 = vector.broadcast %cst_17 : f32 to vector<32x32xf32>
    %37 = arith.divf %36, %35 : vector<32x32xf32>
    %cst_18 = arith.constant 1.06140542 : f32
    %38 = vector.broadcast %cst_18 : f32 to vector<32x32xf32>
    %39 = arith.mulf %37, %38 : vector<32x32xf32>
    %cst_19 = arith.constant -1.45315206 : f32
    %40 = vector.broadcast %cst_19 : f32 to vector<32x32xf32>
    %41 = arith.addf %40, %39 : vector<32x32xf32>
    %42 = arith.mulf %37, %41 : vector<32x32xf32>
    %cst_20 = arith.constant 1.42141378 : f32
    %43 = vector.broadcast %cst_20 : f32 to vector<32x32xf32>
    %44 = arith.addf %43, %42 : vector<32x32xf32>
    %45 = arith.mulf %37, %44 : vector<32x32xf32>
    %cst_21 = arith.constant -0.284496725 : f32
    %46 = vector.broadcast %cst_21 : f32 to vector<32x32xf32>
    %47 = arith.addf %46, %45 : vector<32x32xf32>
    %48 = arith.mulf %37, %47 : vector<32x32xf32>
    %cst_22 = arith.constant 0.254829586 : f32
    %49 = vector.broadcast %cst_22 : f32 to vector<32x32xf32>
    %50 = arith.addf %49, %48 : vector<32x32xf32>
    %51 = arith.mulf %37, %50 : vector<32x32xf32>
    %52 = arith.mulf %31, %31 : vector<32x32xf32>
    %cst_23 = arith.constant 0.000000e+00 : f32
    %53 = vector.broadcast %cst_23 : f32 to vector<32x32xf32>
    %54 = arith.subf %53, %52 : vector<32x32xf32>
    %55 = math.exp %54 : vector<32x32xf32>
    %56 = arith.mulf %51, %55 : vector<32x32xf32>
    %cst_24 = arith.constant 1.000000e+00 : f32
    %57 = vector.broadcast %cst_24 : f32 to vector<32x32xf32>
    %58 = arith.subf %57, %56 : vector<32x32xf32>
    %cst_25 = arith.constant 0.000000e+00 : f32
    %59 = vector.broadcast %cst_25 : f32 to vector<32x32xf32>
    %60 = arith.cmpf olt, %30, %59 : vector<32x32xf32>
    %cst_26 = arith.constant 0.000000e+00 : f32
    %61 = vector.broadcast %cst_26 : f32 to vector<32x32xf32>
    %62 = arith.subf %61, %58 : vector<32x32xf32>
    %63 = arith.select %60, %62, %58 : vector<32x32xi1>, vector<32x32xf32>
    %cst_27 = arith.constant 5.000000e-01 : f32
    %64 = vector.broadcast %cst_27 : f32 to vector<32x32xf32>
    %65 = arith.mulf %64, %28 : vector<32x32xf32>
    %cst_28 = arith.constant 1.000000e+00 : f32
    %66 = vector.broadcast %cst_28 : f32 to vector<32x32xf32>
    %67 = arith.addf %66, %63 : vector<32x32xf32>
    %68 = arith.mulf %65, %67 : vector<32x32xf32>
    %69 = arith.truncf %68 : vector<32x32xf32> to vector<32x32xbf16>
    %c0_29 = arith.constant 0 : index
    %c0_30 = arith.constant 0 : index
    %70 = vector.load %arg6[%c0_29, %c0_30] : memref<32x32xbf16, #tpu.memory_space<vmem>>, vector<32x32xbf16>
    %cst_31 = arith.constant dense<0.000000e+00> : vector<32x32xf32>
    %71 = tpu.matmul %69, %70, %cst_31 {dimension_numbers = #tpu.dot_dimension_numbers<[1], [0], [0], [1], [0, 0, 1, 1], [], []>} : vector<32x32xbf16>, vector<32x32xbf16>, vector<32x32xf32> -> vector<32x32xf32>
    %c0_32 = arith.constant 0 : index
    %c0_33 = arith.constant 0 : index
    %72 = vector.load %arg7[%c0_32, %c0_33] : memref<1x32xf32, #tpu.memory_space<vmem>>, vector<1x32xf32>
    %73 = vector.broadcast %72 : vector<1x32xf32> to vector<32x32xf32>
    %74 = arith.addf %71, %73 : vector<32x32xf32>
    %75 = arith.addf %74, %0 : vector<32x32xf32>
    %c0_34 = arith.constant 0 : index
    %c0_35 = arith.constant 0 : index
    %76 = vector.load %arg8[%c0_34, %c0_35] : memref<32x32xf32, #tpu.memory_space<vmem>>, vector<32x32xf32>
    tpu.vector_store %arg8[%c0_34, %c0_35], %75 {strides = array<i32>} : memref<32x32xf32, #tpu.memory_space<vmem>>, vector<32x32xf32>,
    return
  }
  func.func @transform_0(%arg0: i32) -> (i32, i32) {
    %c0_i32 = arith.constant 0 : i32
    %c0_i32_0 = arith.constant 0 : i32
    return %arg0, %c0_i32 : i32, i32
  }
  func.func @transform_1(%arg0: i32) -> (i32, i32) {
    %c0_i32 = arith.constant 0 : i32
    %c0_i32_0 = arith.constant 0 : i32
    %c0_i32_1 = arith.constant 0 : i32
    return %c0_i32, %c0_i32_0 : i32, i32
  }
  func.func @transform_2(%arg0: i32) -> (i32, i32) {
    %c0_i32 = arith.constant 0 : i32
    %c0_i32_0 = arith.constant 0 : i32
    %c0_i32_1 = arith.constant 0 : i32
    return %c0_i32, %c0_i32_0 : i32, i32
  }
  func.func @transform_3(%arg0: i32) -> (i32, i32) {
    %c0_i32 = arith.constant 0 : i32
    %c0_i32_0 = arith.constant 0 : i32
    %c0_i32_1 = arith.constant 0 : i32
    return %c0_i32, %c0_i32_0 : i32, i32
  }
  func.func @transform_4(%arg0: i32) -> (i32, i32) {
    %c0_i32 = arith.constant 0 : i32
    %c0_i32_0 = arith.constant 0 : i32
    %c0_i32_1 = arith.constant 0 : i32
    return %c0_i32, %c0_i32_0 : i32, i32
  }
  func.func @transform_5(%arg0: i32) -> (i32, i32) {
    %c0_i32 = arith.constant 0 : i32
    %c0_i32_0 = arith.constant 0 : i32
    %c0_i32_1 = arith.constant 0 : i32
    return %c0_i32, %c0_i32_0 : i32, i32
  }
  func.func @transform_6(%arg0: i32) -> (i32, i32) {
    %c0_i32 = arith.constant 0 : i32
    %c0_i32_0 = arith.constant 0 : i32
    %c0_i32_1 = arith.constant 0 : i32
    return %c0_i32, %c0_i32_0 : i32, i32
  }
  func.func @transform_7(%arg0: i32) -> (i32, i32) {
    %c0_i32 = arith.constant 0 : i32
    %c0_i32_0 = arith.constant 0 : i32
    return %arg0, %c0_i32 : i32, i32
  }
}

module attributes {stable_mosaic.version = 11 : i64} {
  func.func @_mse_kernel(%arg0: i32, %arg1: memref<32x32xf32, #tpu.memory_space<vmem>>, %arg2: memref<32x32xf32, #tpu.memory_space<vmem>>, %arg3: memref<1x1xf32, #tpu.memory_space<vmem>>) attributes {dimension_semantics = [#tpu.dimension_semantics<arbitrary>], iteration_bounds = array<i64: 1>, scalar_prefetch = 0 : i64, scratch_operands = 0 : i64, tpu.core_type = #tpu.core_type<tc>, window_params = [{transform_indices = @transform_0, window_bounds = array<i64: 32, 32>}, {transform_indices = @transform_1, window_bounds = array<i64: 32, 32>}, {pipeline_mode = #tpu.pipeline_mode<synchronous>, transform_indices = @transform_2, window_bounds = array<i64: 1, 1>}]} {
    %c0 = arith.constant 0 : index
    %c0_0 = arith.constant 0 : index
    %0 = vector.load %arg1[%c0, %c0_0] : memref<32x32xf32, #tpu.memory_space<vmem>>, vector<32x32xf32>
    %c0_1 = arith.constant 0 : index
    %c0_2 = arith.constant 0 : index
    %1 = vector.load %arg2[%c0_1, %c0_2] : memref<32x32xf32, #tpu.memory_space<vmem>>, vector<32x32xf32>
    %2 = arith.subf %0, %1 : vector<32x32xf32>
    %3 = tpu.iota {dimensions = array<i32: 0>} : vector<32x32xi32>
    %c32_i32 = arith.constant 32 : i32
    %4 = arith.muli %arg0, %c32_i32 : i32
    %5 = vector.broadcast %4 : i32 to vector<32x32xi32>
    %6 = arith.addi %3, %5 : vector<32x32xi32>
    %c32_i32_3 = arith.constant 32 : i32
    %7 = vector.broadcast %c32_i32_3 : i32 to vector<32x32xi32>
    %8 = arith.cmpi slt, %6, %7 : vector<32x32xi32>
    %cst = arith.constant 0.000000e+00 : f32
    %9 = vector.broadcast %cst : f32 to vector<32x32xf32>
    %10 = arith.select %8, %2, %9 : vector<32x32xi1>, vector<32x32xf32>
    %11 = arith.mulf %10, %10 : vector<32x32xf32>
    %cst_4 = arith.constant dense<0.000000e+00> : vector<32xf32>
    %12 = vector.multi_reduction <add>, %11, %cst_4 [1] : vector<32x32xf32> to vector<32xf32>
    %13 = vector.shape_cast %12 : vector<32xf32> to vector<32x1xf32>
    %cst_5 = arith.constant dense<0.000000e+00> : vector<1xf32>
    %14 = vector.multi_reduction <add>, %13, %cst_5 [0] : vector<32x1xf32> to vector<1xf32>
    %15 = vector.shape_cast %14 : vector<1xf32> to vector<1x1xf32>
    %cst_6 = arith.constant 1.024000e+03 : f32
    %16 = vector.broadcast %cst_6 : f32 to vector<1x1xf32>
    %17 = arith.divf %15, %16 : vector<1x1xf32>
    %c0_i32 = arith.constant 0 : i32
    %18 = arith.cmpi eq, %arg0, %c0_i32 : i32
    %19 = arith.extui %18 : i1 to i32
    %c0_i32_7 = arith.constant 0 : i32
    %20 = arith.cmpi ne, %19, %c0_i32_7 : i32
    scf.if %20 {
      %c0_10 = arith.constant 0 : index
      %c0_11 = arith.constant 0 : index
      %24 = vector.load %arg3[%c0_10, %c0_11] : memref<1x1xf32, #tpu.memory_space<vmem>>, vector<1x1xf32>
      tpu.vector_store %arg3[%c0_10, %c0_11], %17 {strides = array<i32>} : memref<1x1xf32, #tpu.memory_space<vmem>>, vector<1x1xf32>,
    } else {
    }
    %c0_i32_8 = arith.constant 0 : i32
    %21 = arith.cmpi sgt, %arg0, %c0_i32_8 : i32
    %22 = arith.extui %21 : i1 to i32
    %c0_i32_9 = arith.constant 0 : i32
    %23 = arith.cmpi ne, %22, %c0_i32_9 : i32
    scf.if %23 {
      %c0_10 = arith.constant 0 : index
      %c0_11 = arith.constant 0 : index
      %24 = vector.load %arg3[%c0_10, %c0_11] : memref<1x1xf32, #tpu.memory_space<vmem>>, vector<1x1xf32>
      %25 = arith.addf %24, %17 : vector<1x1xf32>
      %c0_12 = arith.constant 0 : index
      %c0_13 = arith.constant 0 : index
      %26 = vector.load %arg3[%c0_12, %c0_13] : memref<1x1xf32, #tpu.memory_space<vmem>>, vector<1x1xf32>
      tpu.vector_store %arg3[%c0_12, %c0_13], %25 {strides = array<i32>} : memref<1x1xf32, #tpu.memory_space<vmem>>, vector<1x1xf32>,
    } else {
    }
    return
  }
  func.func @transform_0(%arg0: i32) -> (i32, i32) {
    %c0_i32 = arith.constant 0 : i32
    %c0_i32_0 = arith.constant 0 : i32
    return %arg0, %c0_i32 : i32, i32
  }
  func.func @transform_1(%arg0: i32) -> (i32, i32) {
    %c0_i32 = arith.constant 0 : i32
    %c0_i32_0 = arith.constant 0 : i32
    return %arg0, %c0_i32 : i32, i32
  }
  func.func @transform_2(%arg0: i32) -> (i32, i32) {
    %c0_i32 = arith.constant 0 : i32
    %c0_i32_0 = arith.constant 0 : i32
    %c0_i32_1 = arith.constant 0 : i32
    return %c0_i32, %c0_i32_0 : i32, i32
  }
}

module attributes {stable_mosaic.version = 11 : i64} {
  func.func @_mem_attn_kernel(%arg0: i32, %arg1: memref<1x16x32xf32, #tpu.memory_space<vmem>>, %arg2: memref<8x32xf32, #tpu.memory_space<vmem>>, %arg3: memref<1x16x32xf32, #tpu.memory_space<vmem>>) attributes {dimension_semantics = [#tpu.dimension_semantics<parallel>], iteration_bounds = array<i64: 2>, scalar_prefetch = 0 : i64, scratch_operands = 0 : i64, tpu.core_type = #tpu.core_type<tc>, window_params = [{transform_indices = @transform_0, window_bounds = array<i64: 1, 16, 32>}, {pipeline_mode = #tpu.pipeline_mode<synchronous>, transform_indices = @transform_1, window_bounds = array<i64: 8, 32>}, {transform_indices = @transform_2, window_bounds = array<i64: 1, 16, 32>}]} {
    %c0 = arith.constant 0 : index
    %c0_0 = arith.constant 0 : index
    %c0_1 = arith.constant 0 : index
    %0 = vector.load %arg1[%c0, %c0_0, %c0_1] : memref<1x16x32xf32, #tpu.memory_space<vmem>>, vector<1x16x32xf32>
    %1 = vector.shape_cast %0 : vector<1x16x32xf32> to vector<16x32xf32>
    %2 = arith.truncf %1 : vector<16x32xf32> to vector<16x32xbf16>
    %c0_2 = arith.constant 0 : index
    %c0_3 = arith.constant 0 : index
    %3 = vector.load %arg2[%c0_2, %c0_3] : memref<8x32xf32, #tpu.memory_space<vmem>>, vector<8x32xf32>
    %4 = arith.truncf %3 : vector<8x32xf32> to vector<8x32xbf16>
    %cst = arith.constant dense<0.000000e+00> : vector<16x8xf32>
    %5 = tpu.matmul %2, %4, %cst {dimension_numbers = #tpu.dot_dimension_numbers<[1], [1], [0], [0], [0, 0, 1, 0], [], []>} : vector<16x32xbf16>, vector<8x32xbf16>, vector<16x8xf32> -> vector<16x8xf32>
    %cst_4 = arith.constant 0.176776692 : f32
    %6 = vector.broadcast %cst_4 : f32 to vector<16x8xf32>
    %7 = arith.mulf %5, %6 : vector<16x8xf32>
    %cst_5 = arith.constant dense<0xFF800000> : vector<16xf32>
    %8 = vector.multi_reduction <maximumf>, %7, %cst_5 [1] : vector<16x8xf32> to vector<16xf32>
    %9 = vector.shape_cast %8 : vector<16xf32> to vector<16x1xf32>
    %10 = vector.broadcast %9 : vector<16x1xf32> to vector<16x8xf32>
    %11 = arith.subf %7, %10 : vector<16x8xf32>
    %12 = math.exp %11 : vector<16x8xf32>
    %cst_6 = arith.constant dense<0.000000e+00> : vector<16xf32>
    %13 = vector.multi_reduction <add>, %12, %cst_6 [1] : vector<16x8xf32> to vector<16xf32>
    %14 = vector.shape_cast %13 : vector<16xf32> to vector<16x1xf32>
    %15 = tpu.reciprocal %14 {approx = true} : vector<16x1xf32> -> vector<16x1xf32>
    %16 = vector.broadcast %15 : vector<16x1xf32> to vector<16x8xf32>
    %17 = arith.mulf %12, %16 : vector<16x8xf32>
    %18 = arith.truncf %17 : vector<16x8xf32> to vector<16x8xbf16>
    %cst_7 = arith.constant dense<0.000000e+00> : vector<16x32xf32>
    %19 = tpu.matmul %18, %4, %cst_7 {dimension_numbers = #tpu.dot_dimension_numbers<[1], [0], [0], [1], [0, 0, 1, 1], [], []>} : vector<16x8xbf16>, vector<8x32xbf16>, vector<16x32xf32> -> vector<16x32xf32>
    %c0_8 = arith.constant 0 : index
    %c0_9 = arith.constant 0 : index
    %c0_10 = arith.constant 0 : index
    %20 = vector.load %arg3[%c0_8, %c0_9, %c0_10] : memref<1x16x32xf32, #tpu.memory_space<vmem>>, vector<1x16x32xf32>
    %21 = vector.shape_cast %20 : vector<1x16x32xf32> to vector<16x32xf32>
    %22 = vector.shape_cast %19 : vector<16x32xf32> to vector<1x16x32xf32>
    tpu.vector_store %arg3[%c0_8, %c0_9, %c0_10], %22 {strides = array<i32>} : memref<1x16x32xf32, #tpu.memory_space<vmem>>, vector<1x16x32xf32>,
    return
  }
  func.func @transform_0(%arg0: i32) -> (i32, i32, i32) {
    %c0_i32 = arith.constant 0 : i32
    %c0_i32_0 = arith.constant 0 : i32
    %c0_i32_1 = arith.constant 0 : i32
    return %arg0, %c0_i32, %c0_i32_0 : i32, i32, i32
  }
  func.func @transform_1(%arg0: i32) -> (i32, i32) {
    %c0_i32 = arith.constant 0 : i32
    %c0_i32_0 = arith.constant 0 : i32
    %c0_i32_1 = arith.constant 0 : i32
    return %c0_i32, %c0_i32_0 : i32, i32
  }
  func.func @transform_2(%arg0: i32) -> (i32, i32, i32) {
    %c0_i32 = arith.constant 0 : i32
    %c0_i32_0 = arith.constant 0 : i32
    %c0_i32_1 = arith.constant 0 : i32
    return %arg0, %c0_i32, %c0_i32_0 : i32, i32, i32
  }
}

module attributes {stable_mosaic.version = 11 : i64} {
  func.func @_interp_conv_kernel(%arg0: i32, %arg1: memref<128x96xf32, #tpu.memory_space<vmem>>, %arg2: memref<128x3xf32, #tpu.memory_space<vmem>>, %arg3: memref<128x3xbf16, #tpu.memory_space<vmem>>, %arg4: memref<32x32xbf16, #tpu.memory_space<vmem>>, %arg5: memref<3x32xbf16, #tpu.memory_space<vmem>>, %arg6: memref<128x32xf32, #tpu.memory_space<vmem>>) attributes {dimension_semantics = [#tpu.dimension_semantics<parallel>], iteration_bounds = array<i64: 1>, scalar_prefetch = 0 : i64, scratch_operands = 0 : i64, tpu.core_type = #tpu.core_type<tc>, window_params = [{transform_indices = @transform_0, window_bounds = array<i64: 128, 96>}, {transform_indices = @transform_1, window_bounds = array<i64: 128, 3>}, {transform_indices = @transform_2, window_bounds = array<i64: 128, 3>}, {pipeline_mode = #tpu.pipeline_mode<synchronous>, transform_indices = @transform_3, window_bounds = array<i64: 32, 32>}, {pipeline_mode = #tpu.pipeline_mode<synchronous>, transform_indices = @transform_4, window_bounds = array<i64: 3, 32>}, {transform_indices = @transform_5, window_bounds = array<i64: 128, 32>}]} {
    %c0 = arith.constant 0 : index
    %c0_0 = arith.constant 0 : index
    %0 = vector.load %arg1[%c0, %c0_0] : memref<128x96xf32, #tpu.memory_space<vmem>>, vector<128x96xf32>
    %c0_1 = arith.constant 0 : index
    %c0_2 = arith.constant 0 : index
    %1 = vector.load %arg2[%c0_1, %c0_2] : memref<128x3xf32, #tpu.memory_space<vmem>>, vector<128x3xf32>
    %2 = vector.extract_strided_slice %0 {offsets = [0, 0], sizes = [128, 32], strides = [1, 1]} : vector<128x96xf32> to vector<128x32xf32>
    %3 = vector.extract_strided_slice %1 {offsets = [0, 0], sizes = [128, 1], strides = [1, 1]} : vector<128x3xf32> to vector<128x1xf32>
    %4 = vector.broadcast %3 : vector<128x1xf32> to vector<128x32xf32>
    %5 = arith.mulf %2, %4 : vector<128x32xf32>
    %6 = vector.extract_strided_slice %0 {offsets = [0, 32], sizes = [128, 32], strides = [1, 1]} : vector<128x96xf32> to vector<128x32xf32>
    %7 = vector.extract_strided_slice %1 {offsets = [0, 1], sizes = [128, 1], strides = [1, 1]} : vector<128x3xf32> to vector<128x1xf32>
    %8 = vector.broadcast %7 : vector<128x1xf32> to vector<128x32xf32>
    %9 = arith.mulf %6, %8 : vector<128x32xf32>
    %10 = arith.addf %5, %9 : vector<128x32xf32>
    %11 = vector.extract_strided_slice %0 {offsets = [0, 64], sizes = [128, 32], strides = [1, 1]} : vector<128x96xf32> to vector<128x32xf32>
    %12 = vector.extract_strided_slice %1 {offsets = [0, 2], sizes = [128, 1], strides = [1, 1]} : vector<128x3xf32> to vector<128x1xf32>
    %13 = vector.broadcast %12 : vector<128x1xf32> to vector<128x32xf32>
    %14 = arith.mulf %11, %13 : vector<128x32xf32>
    %15 = arith.addf %10, %14 : vector<128x32xf32>
    %16 = arith.truncf %15 : vector<128x32xf32> to vector<128x32xbf16>
    %c0_3 = arith.constant 0 : index
    %c0_4 = arith.constant 0 : index
    %17 = vector.load %arg4[%c0_3, %c0_4] : memref<32x32xbf16, #tpu.memory_space<vmem>>, vector<32x32xbf16>
    %cst = arith.constant dense<0.000000e+00> : vector<128x32xf32>
    %18 = tpu.matmul %16, %17, %cst {dimension_numbers = #tpu.dot_dimension_numbers<[1], [0], [0], [1], [0, 0, 1, 1], [], []>} : vector<128x32xbf16>, vector<32x32xbf16>, vector<128x32xf32> -> vector<128x32xf32>
    %c0_5 = arith.constant 0 : index
    %c0_6 = arith.constant 0 : index
    %19 = vector.load %arg3[%c0_5, %c0_6] : memref<128x3xbf16, #tpu.memory_space<vmem>>, vector<128x3xbf16>
    %c0_7 = arith.constant 0 : index
    %c0_8 = arith.constant 0 : index
    %20 = vector.load %arg5[%c0_7, %c0_8] : memref<3x32xbf16, #tpu.memory_space<vmem>>, vector<3x32xbf16>
    %cst_9 = arith.constant dense<0.000000e+00> : vector<128x32xf32>
    %21 = tpu.matmul %19, %20, %cst_9 {dimension_numbers = #tpu.dot_dimension_numbers<[1], [0], [0], [1], [0, 0, 1, 1], [], []>} : vector<128x3xbf16>, vector<3x32xbf16>, vector<128x32xf32> -> vector<128x32xf32>
    %22 = arith.addf %18, %21 : vector<128x32xf32>
    %cst_10 = arith.constant 0.000000e+00 : f32
    %23 = vector.broadcast %cst_10 : f32 to vector<128x32xf32>
    %24 = arith.maximumf %22, %23 : vector<128x32xf32>
    %c0_11 = arith.constant 0 : index
    %c0_12 = arith.constant 0 : index
    %25 = vector.load %arg6[%c0_11, %c0_12] : memref<128x32xf32, #tpu.memory_space<vmem>>, vector<128x32xf32>
    tpu.vector_store %arg6[%c0_11, %c0_12], %24 {strides = array<i32>} : memref<128x32xf32, #tpu.memory_space<vmem>>, vector<128x32xf32>,
    return
  }
  func.func @transform_0(%arg0: i32) -> (i32, i32) {
    %c0_i32 = arith.constant 0 : i32
    %c0_i32_0 = arith.constant 0 : i32
    return %arg0, %c0_i32 : i32, i32
  }
  func.func @transform_1(%arg0: i32) -> (i32, i32) {
    %c0_i32 = arith.constant 0 : i32
    %c0_i32_0 = arith.constant 0 : i32
    return %arg0, %c0_i32 : i32, i32
  }
  func.func @transform_2(%arg0: i32) -> (i32, i32) {
    %c0_i32 = arith.constant 0 : i32
    %c0_i32_0 = arith.constant 0 : i32
    return %arg0, %c0_i32 : i32, i32
  }
  func.func @transform_3(%arg0: i32) -> (i32, i32) {
    %c0_i32 = arith.constant 0 : i32
    %c0_i32_0 = arith.constant 0 : i32
    %c0_i32_1 = arith.constant 0 : i32
    return %c0_i32, %c0_i32_0 : i32, i32
  }
  func.func @transform_4(%arg0: i32) -> (i32, i32) {
    %c0_i32 = arith.constant 0 : i32
    %c0_i32_0 = arith.constant 0 : i32
    %c0_i32_1 = arith.constant 0 : i32
    return %c0_i32, %c0_i32_0 : i32, i32
  }
  func.func @transform_5(%arg0: i32) -> (i32, i32) {
    %c0_i32 = arith.constant 0 : i32
    %c0_i32_0 = arith.constant 0 : i32
    return %arg0, %c0_i32 : i32, i32
  }
}

module attributes {stable_mosaic.version = 11 : i64} {
  func.func @_linear_kernel(%arg0: i32, %arg1: memref<32x32xbf16, #tpu.memory_space<vmem>>, %arg2: memref<32x4xbf16, #tpu.memory_space<vmem>>, %arg3: memref<1x4xf32, #tpu.memory_space<vmem>>, %arg4: memref<32x4xf32, #tpu.memory_space<vmem>>) attributes {dimension_semantics = [#tpu.dimension_semantics<parallel>], iteration_bounds = array<i64: 1>, scalar_prefetch = 0 : i64, scratch_operands = 0 : i64, tpu.core_type = #tpu.core_type<tc>, window_params = [{transform_indices = @transform_0, window_bounds = array<i64: 32, 32>}, {pipeline_mode = #tpu.pipeline_mode<synchronous>, transform_indices = @transform_1, window_bounds = array<i64: 32, 4>}, {pipeline_mode = #tpu.pipeline_mode<synchronous>, transform_indices = @transform_2, window_bounds = array<i64: 1, 4>}, {transform_indices = @transform_3, window_bounds = array<i64: 32, 4>}]} {
    %c0 = arith.constant 0 : index
    %c0_0 = arith.constant 0 : index
    %0 = vector.load %arg1[%c0, %c0_0] : memref<32x32xbf16, #tpu.memory_space<vmem>>, vector<32x32xbf16>
    %c0_1 = arith.constant 0 : index
    %c0_2 = arith.constant 0 : index
    %1 = vector.load %arg2[%c0_1, %c0_2] : memref<32x4xbf16, #tpu.memory_space<vmem>>, vector<32x4xbf16>
    %cst = arith.constant dense<0.000000e+00> : vector<32x4xf32>
    %2 = tpu.matmul %0, %1, %cst {dimension_numbers = #tpu.dot_dimension_numbers<[1], [0], [0], [1], [0, 0, 1, 1], [], []>} : vector<32x32xbf16>, vector<32x4xbf16>, vector<32x4xf32> -> vector<32x4xf32>
    %c0_3 = arith.constant 0 : index
    %c0_4 = arith.constant 0 : index
    %3 = vector.load %arg3[%c0_3, %c0_4] : memref<1x4xf32, #tpu.memory_space<vmem>>, vector<1x4xf32>
    %4 = vector.broadcast %3 : vector<1x4xf32> to vector<32x4xf32>
    %5 = arith.addf %2, %4 : vector<32x4xf32>
    %c0_5 = arith.constant 0 : index
    %c0_6 = arith.constant 0 : index
    %6 = vector.load %arg4[%c0_5, %c0_6] : memref<32x4xf32, #tpu.memory_space<vmem>>, vector<32x4xf32>
    tpu.vector_store %arg4[%c0_5, %c0_6], %5 {strides = array<i32>} : memref<32x4xf32, #tpu.memory_space<vmem>>, vector<32x4xf32>,
    return
  }
  func.func @transform_0(%arg0: i32) -> (i32, i32) {
    %c0_i32 = arith.constant 0 : i32
    %c0_i32_0 = arith.constant 0 : i32
    return %arg0, %c0_i32 : i32, i32
  }
  func.func @transform_1(%arg0: i32) -> (i32, i32) {
    %c0_i32 = arith.constant 0 : i32
    %c0_i32_0 = arith.constant 0 : i32
    %c0_i32_1 = arith.constant 0 : i32
    return %c0_i32, %c0_i32_0 : i32, i32
  }
  func.func @transform_2(%arg0: i32) -> (i32, i32) {
    %c0_i32 = arith.constant 0 : i32
    %c0_i32_0 = arith.constant 0 : i32
    %c0_i32_1 = arith.constant 0 : i32
    return %c0_i32, %c0_i32_0 : i32, i32
  }
  func.func @transform_3(%arg0: i32) -> (i32, i32) {
    %c0_i32 = arith.constant 0 : i32
    %c0_i32_0 = arith.constant 0 : i32
    return %arg0, %c0_i32 : i32, i32
  }
}

module attributes {stable_mosaic.version = 11 : i64} {
  func.func @_ln_linear_kernel(%arg0: i32, %arg1: memref<2x32xf32, #tpu.memory_space<vmem>>, %arg2: memref<1x32xf32, #tpu.memory_space<vmem>>, %arg3: memref<1x32xf32, #tpu.memory_space<vmem>>, %arg4: memref<32x20xbf16, #tpu.memory_space<vmem>>, %arg5: memref<1x20xf32, #tpu.memory_space<vmem>>, %arg6: memref<2x20xf32, #tpu.memory_space<vmem>>) attributes {dimension_semantics = [#tpu.dimension_semantics<parallel>], iteration_bounds = array<i64: 1>, scalar_prefetch = 0 : i64, scratch_operands = 0 : i64, tpu.core_type = #tpu.core_type<tc>, window_params = [{transform_indices = @transform_0, window_bounds = array<i64: 2, 32>}, {pipeline_mode = #tpu.pipeline_mode<synchronous>, transform_indices = @transform_1, window_bounds = array<i64: 1, 32>}, {pipeline_mode = #tpu.pipeline_mode<synchronous>, transform_indices = @transform_2, window_bounds = array<i64: 1, 32>}, {pipeline_mode = #tpu.pipeline_mode<synchronous>, transform_indices = @transform_3, window_bounds = array<i64: 32, 20>}, {pipeline_mode = #tpu.pipeline_mode<synchronous>, transform_indices = @transform_4, window_bounds = array<i64: 1, 20>}, {transform_indices = @transform_5, window_bounds = array<i64: 2, 20>}]} {
    %c0 = arith.constant 0 : index
    %c0_0 = arith.constant 0 : index
    %0 = vector.load %arg1[%c0, %c0_0] : memref<2x32xf32, #tpu.memory_space<vmem>>, vector<2x32xf32>
    %cst = arith.constant dense<0.000000e+00> : vector<2xf32>
    %1 = vector.multi_reduction <add>, %0, %cst [1] : vector<2x32xf32> to vector<2xf32>
    %2 = vector.shape_cast %1 : vector<2xf32> to vector<2x1xf32>
    %cst_1 = arith.constant 3.200000e+01 : f32
    %3 = vector.broadcast %cst_1 : f32 to vector<2x1xf32>
    %4 = arith.divf %2, %3 : vector<2x1xf32>
    %5 = vector.broadcast %4 : vector<2x1xf32> to vector<2x32xf32>
    %6 = arith.subf %0, %5 : vector<2x32xf32>
    %7 = arith.mulf %6, %6 : vector<2x32xf32>
    %cst_2 = arith.constant dense<0.000000e+00> : vector<2xf32>
    %8 = vector.multi_reduction <add>, %7, %cst_2 [1] : vector<2x32xf32> to vector<2xf32>
    %9 = vector.shape_cast %8 : vector<2xf32> to vector<2x1xf32>
    %cst_3 = arith.constant 3.200000e+01 : f32
    %10 = vector.broadcast %cst_3 : f32 to vector<2x1xf32>
    %11 = arith.divf %9, %10 : vector<2x1xf32>
    %cst_4 = arith.constant 9.99999974E-6 : f32
    %12 = vector.broadcast %cst_4 : f32 to vector<2x1xf32>
    %13 = arith.addf %11, %12 : vector<2x1xf32>
    %14 = math.rsqrt %13 : vector<2x1xf32>
    %15 = vector.broadcast %14 : vector<2x1xf32> to vector<2x32xf32>
    %16 = arith.mulf %6, %15 : vector<2x32xf32>
    %c0_5 = arith.constant 0 : index
    %c0_6 = arith.constant 0 : index
    %17 = vector.load %arg2[%c0_5, %c0_6] : memref<1x32xf32, #tpu.memory_space<vmem>>, vector<1x32xf32>
    %18 = vector.broadcast %17 : vector<1x32xf32> to vector<2x32xf32>
    %19 = arith.mulf %16, %18 : vector<2x32xf32>
    %c0_7 = arith.constant 0 : index
    %c0_8 = arith.constant 0 : index
    %20 = vector.load %arg3[%c0_7, %c0_8] : memref<1x32xf32, #tpu.memory_space<vmem>>, vector<1x32xf32>
    %21 = vector.broadcast %20 : vector<1x32xf32> to vector<2x32xf32>
    %22 = arith.addf %19, %21 : vector<2x32xf32>
    %23 = arith.truncf %22 : vector<2x32xf32> to vector<2x32xbf16>
    %c0_9 = arith.constant 0 : index
    %c0_10 = arith.constant 0 : index
    %24 = vector.load %arg4[%c0_9, %c0_10] : memref<32x20xbf16, #tpu.memory_space<vmem>>, vector<32x20xbf16>
    %cst_11 = arith.constant dense<0.000000e+00> : vector<2x20xf32>
    %25 = tpu.matmul %23, %24, %cst_11 {dimension_numbers = #tpu.dot_dimension_numbers<[1], [0], [0], [1], [0, 0, 1, 1], [], []>} : vector<2x32xbf16>, vector<32x20xbf16>, vector<2x20xf32> -> vector<2x20xf32>
    %c0_12 = arith.constant 0 : index
    %c0_13 = arith.constant 0 : index
    %26 = vector.load %arg5[%c0_12, %c0_13] : memref<1x20xf32, #tpu.memory_space<vmem>>, vector<1x20xf32>
    %27 = vector.broadcast %26 : vector<1x20xf32> to vector<2x20xf32>
    %28 = arith.addf %25, %27 : vector<2x20xf32>
    %c0_14 = arith.constant 0 : index
    %c0_15 = arith.constant 0 : index
    %29 = vector.load %arg6[%c0_14, %c0_15] : memref<2x20xf32, #tpu.memory_space<vmem>>, vector<2x20xf32>
    tpu.vector_store %arg6[%c0_14, %c0_15], %28 {strides = array<i32>} : memref<2x20xf32, #tpu.memory_space<vmem>>, vector<2x20xf32>,
    return
  }
  func.func @transform_0(%arg0: i32) -> (i32, i32) {
    %c0_i32 = arith.constant 0 : i32
    %c0_i32_0 = arith.constant 0 : i32
    return %arg0, %c0_i32 : i32, i32
  }
  func.func @transform_1(%arg0: i32) -> (i32, i32) {
    %c0_i32 = arith.constant 0 : i32
    %c0_i32_0 = arith.constant 0 : i32
    %c0_i32_1 = arith.constant 0 : i32
    return %c0_i32, %c0_i32_0 : i32, i32
  }
  func.func @transform_2(%arg0: i32) -> (i32, i32) {
    %c0_i32 = arith.constant 0 : i32
    %c0_i32_0 = arith.constant 0 : i32
    %c0_i32_1 = arith.constant 0 : i32
    return %c0_i32, %c0_i32_0 : i32, i32
  }
  func.func @transform_3(%arg0: i32) -> (i32, i32) {
    %c0_i32 = arith.constant 0 : i32
    %c0_i32_0 = arith.constant 0 : i32
    %c0_i32_1 = arith.constant 0 : i32
    return %c0_i32, %c0_i32_0 : i32, i32
  }
  func.func @transform_4(%arg0: i32) -> (i32, i32) {
    %c0_i32 = arith.constant 0 : i32
    %c0_i32_0 = arith.constant 0 : i32
    %c0_i32_1 = arith.constant 0 : i32
    return %c0_i32, %c0_i32_0 : i32, i32
  }
  func.func @transform_5(%arg0: i32) -> (i32, i32) {
    %c0_i32 = arith.constant 0 : i32
    %c0_i32_0 = arith.constant 0 : i32
    return %arg0, %c0_i32 : i32, i32
  }
}

module attributes {stable_mosaic.version = 11 : i64} {
  func.func @_query_attn_kernel(%arg0: i32, %arg1: memref<1x5x4xf32, #tpu.memory_space<vmem>>, %arg2: memref<1x16x4xf32, #tpu.memory_space<vmem>>, %arg3: memref<4x512xbf16, #tpu.memory_space<vmem>>, %arg4: memref<4x512xbf16, #tpu.memory_space<vmem>>, %arg5: memref<4x512xbf16, #tpu.memory_space<vmem>>, %arg6: memref<512x4xbf16, #tpu.memory_space<vmem>>, %arg7: memref<1x4xf32, #tpu.memory_space<vmem>>, %arg8: memref<1x5x4xf32, #tpu.memory_space<vmem>>) attributes {dimension_semantics = [#tpu.dimension_semantics<parallel>], iteration_bounds = array<i64: 2>, scalar_prefetch = 0 : i64, scratch_operands = 0 : i64, tpu.core_type = #tpu.core_type<tc>, window_params = [{transform_indices = @transform_0, window_bounds = array<i64: 1, 5, 4>}, {transform_indices = @transform_1, window_bounds = array<i64: 1, 16, 4>}, {pipeline_mode = #tpu.pipeline_mode<synchronous>, transform_indices = @transform_2, window_bounds = array<i64: 4, 512>}, {pipeline_mode = #tpu.pipeline_mode<synchronous>, transform_indices = @transform_3, window_bounds = array<i64: 4, 512>}, {pipeline_mode = #tpu.pipeline_mode<synchronous>, transform_indices = @transform_4, window_bounds = array<i64: 4, 512>}, {pipeline_mode = #tpu.pipeline_mode<synchronous>, transform_indices = @transform_5, window_bounds = array<i64: 512, 4>}, {pipeline_mode = #tpu.pipeline_mode<synchronous>, transform_indices = @transform_6, window_bounds = array<i64: 1, 4>}, {transform_indices = @transform_7, window_bounds = array<i64: 1, 5, 4>}]} {
    %c0 = arith.constant 0 : index
    %c0_0 = arith.constant 0 : index
    %c0_1 = arith.constant 0 : index
    %0 = vector.load %arg1[%c0, %c0_0, %c0_1] : memref<1x5x4xf32, #tpu.memory_space<vmem>>, vector<1x5x4xf32>
    %1 = vector.shape_cast %0 : vector<1x5x4xf32> to vector<5x4xf32>
    %2 = arith.truncf %1 : vector<5x4xf32> to vector<5x4xbf16>
    %c0_2 = arith.constant 0 : index
    %c0_3 = arith.constant 0 : index
    %c0_4 = arith.constant 0 : index
    %3 = vector.load %arg2[%c0_2, %c0_3, %c0_4] : memref<1x16x4xf32, #tpu.memory_space<vmem>>, vector<1x16x4xf32>
    %4 = vector.shape_cast %3 : vector<1x16x4xf32> to vector<16x4xf32>
    %5 = arith.truncf %4 : vector<16x4xf32> to vector<16x4xbf16>
    %c0_5 = arith.constant 0 : index
    %c0_6 = arith.constant 0 : index
    %6 = vector.load %arg3[%c0_5, %c0_6] : memref<4x512xbf16, #tpu.memory_space<vmem>>, vector<4x512xbf16>
    %cst = arith.constant dense<0.000000e+00> : vector<5x512xf32>
    %7 = tpu.matmul %2, %6, %cst {dimension_numbers = #tpu.dot_dimension_numbers<[1], [0], [0], [1], [0, 0, 1, 1], [], []>} : vector<5x4xbf16>, vector<4x512xbf16>, vector<5x512xf32> -> vector<5x512xf32>
    %c0_7 = arith.constant 0 : index
    %c0_8 = arith.constant 0 : index
    %8 = vector.load %arg4[%c0_7, %c0_8] : memref<4x512xbf16, #tpu.memory_space<vmem>>, vector<4x512xbf16>
    %cst_9 = arith.constant dense<0.000000e+00> : vector<16x512xf32>
    %9 = tpu.matmul %5, %8, %cst_9 {dimension_numbers = #tpu.dot_dimension_numbers<[1], [0], [0], [1], [0, 0, 1, 1], [], []>} : vector<16x4xbf16>, vector<4x512xbf16>, vector<16x512xf32> -> vector<16x512xf32>
    %c0_10 = arith.constant 0 : index
    %c0_11 = arith.constant 0 : index
    %10 = vector.load %arg5[%c0_10, %c0_11] : memref<4x512xbf16, #tpu.memory_space<vmem>>, vector<4x512xbf16>
    %cst_12 = arith.constant dense<0.000000e+00> : vector<16x512xf32>
    %11 = tpu.matmul %5, %10, %cst_12 {dimension_numbers = #tpu.dot_dimension_numbers<[1], [0], [0], [1], [0, 0, 1, 1], [], []>} : vector<16x4xbf16>, vector<4x512xbf16>, vector<16x512xf32> -> vector<16x512xf32>
    %12 = vector.extract_strided_slice %7 {offsets = [0, 0], sizes = [5, 64], strides = [1, 1]} : vector<5x512xf32> to vector<5x64xf32>
    %13 = arith.truncf %12 : vector<5x64xf32> to vector<5x64xbf16>
    %14 = vector.extract_strided_slice %9 {offsets = [0, 0], sizes = [16, 64], strides = [1, 1]} : vector<16x512xf32> to vector<16x64xf32>
    %15 = arith.truncf %14 : vector<16x64xf32> to vector<16x64xbf16>
    %cst_13 = arith.constant dense<0.000000e+00> : vector<5x16xf32>
    %16 = tpu.matmul %13, %15, %cst_13 {dimension_numbers = #tpu.dot_dimension_numbers<[1], [1], [0], [0], [0, 0, 1, 0], [], []>} : vector<5x64xbf16>, vector<16x64xbf16>, vector<5x16xf32> -> vector<5x16xf32>
    %cst_14 = arith.constant 1.250000e-01 : f32
    %17 = vector.broadcast %cst_14 : f32 to vector<5x16xf32>
    %18 = arith.mulf %16, %17 : vector<5x16xf32>
    %cst_15 = arith.constant dense<0xFF800000> : vector<5xf32>
    %19 = vector.multi_reduction <maximumf>, %18, %cst_15 [1] : vector<5x16xf32> to vector<5xf32>
    %20 = vector.shape_cast %19 : vector<5xf32> to vector<5x1xf32>
    %21 = vector.broadcast %20 : vector<5x1xf32> to vector<5x16xf32>
    %22 = arith.subf %18, %21 : vector<5x16xf32>
    %23 = math.exp %22 : vector<5x16xf32>
    %cst_16 = arith.constant dense<0.000000e+00> : vector<5xf32>
    %24 = vector.multi_reduction <add>, %23, %cst_16 [1] : vector<5x16xf32> to vector<5xf32>
    %25 = vector.shape_cast %24 : vector<5xf32> to vector<5x1xf32>
    %26 = tpu.reciprocal %25 {approx = true} : vector<5x1xf32> -> vector<5x1xf32>
    %27 = vector.broadcast %26 : vector<5x1xf32> to vector<5x16xf32>
    %28 = arith.mulf %23, %27 : vector<5x16xf32>
    %29 = arith.truncf %28 : vector<5x16xf32> to vector<5x16xbf16>
    %30 = vector.extract_strided_slice %11 {offsets = [0, 0], sizes = [16, 64], strides = [1, 1]} : vector<16x512xf32> to vector<16x64xf32>
    %31 = arith.truncf %30 : vector<16x64xf32> to vector<16x64xbf16>
    %cst_17 = arith.constant dense<0.000000e+00> : vector<5x64xf32>
    %32 = tpu.matmul %29, %31, %cst_17 {dimension_numbers = #tpu.dot_dimension_numbers<[1], [0], [0], [1], [0, 0, 1, 1], [], []>} : vector<5x16xbf16>, vector<16x64xbf16>, vector<5x64xf32> -> vector<5x64xf32>
    %33 = vector.extract_strided_slice %7 {offsets = [0, 64], sizes = [5, 64], strides = [1, 1]} : vector<5x512xf32> to vector<5x64xf32>
    %34 = arith.truncf %33 : vector<5x64xf32> to vector<5x64xbf16>
    %35 = vector.extract_strided_slice %9 {offsets = [0, 64], sizes = [16, 64], strides = [1, 1]} : vector<16x512xf32> to vector<16x64xf32>
    %36 = arith.truncf %35 : vector<16x64xf32> to vector<16x64xbf16>
    %cst_18 = arith.constant dense<0.000000e+00> : vector<5x16xf32>
    %37 = tpu.matmul %34, %36, %cst_18 {dimension_numbers = #tpu.dot_dimension_numbers<[1], [1], [0], [0], [0, 0, 1, 0], [], []>} : vector<5x64xbf16>, vector<16x64xbf16>, vector<5x16xf32> -> vector<5x16xf32>
    %cst_19 = arith.constant 1.250000e-01 : f32
    %38 = vector.broadcast %cst_19 : f32 to vector<5x16xf32>
    %39 = arith.mulf %37, %38 : vector<5x16xf32>
    %cst_20 = arith.constant dense<0xFF800000> : vector<5xf32>
    %40 = vector.multi_reduction <maximumf>, %39, %cst_20 [1] : vector<5x16xf32> to vector<5xf32>
    %41 = vector.shape_cast %40 : vector<5xf32> to vector<5x1xf32>
    %42 = vector.broadcast %41 : vector<5x1xf32> to vector<5x16xf32>
    %43 = arith.subf %39, %42 : vector<5x16xf32>
    %44 = math.exp %43 : vector<5x16xf32>
    %cst_21 = arith.constant dense<0.000000e+00> : vector<5xf32>
    %45 = vector.multi_reduction <add>, %44, %cst_21 [1] : vector<5x16xf32> to vector<5xf32>
    %46 = vector.shape_cast %45 : vector<5xf32> to vector<5x1xf32>
    %47 = tpu.reciprocal %46 {approx = true} : vector<5x1xf32> -> vector<5x1xf32>
    %48 = vector.broadcast %47 : vector<5x1xf32> to vector<5x16xf32>
    %49 = arith.mulf %44, %48 : vector<5x16xf32>
    %50 = arith.truncf %49 : vector<5x16xf32> to vector<5x16xbf16>
    %51 = vector.extract_strided_slice %11 {offsets = [0, 64], sizes = [16, 64], strides = [1, 1]} : vector<16x512xf32> to vector<16x64xf32>
    %52 = arith.truncf %51 : vector<16x64xf32> to vector<16x64xbf16>
    %cst_22 = arith.constant dense<0.000000e+00> : vector<5x64xf32>
    %53 = tpu.matmul %50, %52, %cst_22 {dimension_numbers = #tpu.dot_dimension_numbers<[1], [0], [0], [1], [0, 0, 1, 1], [], []>} : vector<5x16xbf16>, vector<16x64xbf16>, vector<5x64xf32> -> vector<5x64xf32>
    %54 = vector.extract_strided_slice %7 {offsets = [0, 128], sizes = [5, 64], strides = [1, 1]} : vector<5x512xf32> to vector<5x64xf32>
    %55 = arith.truncf %54 : vector<5x64xf32> to vector<5x64xbf16>
    %56 = vector.extract_strided_slice %9 {offsets = [0, 128], sizes = [16, 64], strides = [1, 1]} : vector<16x512xf32> to vector<16x64xf32>
    %57 = arith.truncf %56 : vector<16x64xf32> to vector<16x64xbf16>
    %cst_23 = arith.constant dense<0.000000e+00> : vector<5x16xf32>
    %58 = tpu.matmul %55, %57, %cst_23 {dimension_numbers = #tpu.dot_dimension_numbers<[1], [1], [0], [0], [0, 0, 1, 0], [], []>} : vector<5x64xbf16>, vector<16x64xbf16>, vector<5x16xf32> -> vector<5x16xf32>
    %cst_24 = arith.constant 1.250000e-01 : f32
    %59 = vector.broadcast %cst_24 : f32 to vector<5x16xf32>
    %60 = arith.mulf %58, %59 : vector<5x16xf32>
    %cst_25 = arith.constant dense<0xFF800000> : vector<5xf32>
    %61 = vector.multi_reduction <maximumf>, %60, %cst_25 [1] : vector<5x16xf32> to vector<5xf32>
    %62 = vector.shape_cast %61 : vector<5xf32> to vector<5x1xf32>
    %63 = vector.broadcast %62 : vector<5x1xf32> to vector<5x16xf32>
    %64 = arith.subf %60, %63 : vector<5x16xf32>
    %65 = math.exp %64 : vector<5x16xf32>
    %cst_26 = arith.constant dense<0.000000e+00> : vector<5xf32>
    %66 = vector.multi_reduction <add>, %65, %cst_26 [1] : vector<5x16xf32> to vector<5xf32>
    %67 = vector.shape_cast %66 : vector<5xf32> to vector<5x1xf32>
    %68 = tpu.reciprocal %67 {approx = true} : vector<5x1xf32> -> vector<5x1xf32>
    %69 = vector.broadcast %68 : vector<5x1xf32> to vector<5x16xf32>
    %70 = arith.mulf %65, %69 : vector<5x16xf32>
    %71 = arith.truncf %70 : vector<5x16xf32> to vector<5x16xbf16>
    %72 = vector.extract_strided_slice %11 {offsets = [0, 128], sizes = [16, 64], strides = [1, 1]} : vector<16x512xf32> to vector<16x64xf32>
    %73 = arith.truncf %72 : vector<16x64xf32> to vector<16x64xbf16>
    %cst_27 = arith.constant dense<0.000000e+00> : vector<5x64xf32>
    %74 = tpu.matmul %71, %73, %cst_27 {dimension_numbers = #tpu.dot_dimension_numbers<[1], [0], [0], [1], [0, 0, 1, 1], [], []>} : vector<5x16xbf16>, vector<16x64xbf16>, vector<5x64xf32> -> vector<5x64xf32>
    %75 = vector.extract_strided_slice %7 {offsets = [0, 192], sizes = [5, 64], strides = [1, 1]} : vector<5x512xf32> to vector<5x64xf32>
    %76 = arith.truncf %75 : vector<5x64xf32> to vector<5x64xbf16>
    %77 = vector.extract_strided_slice %9 {offsets = [0, 192], sizes = [16, 64], strides = [1, 1]} : vector<16x512xf32> to vector<16x64xf32>
    %78 = arith.truncf %77 : vector<16x64xf32> to vector<16x64xbf16>
    %cst_28 = arith.constant dense<0.000000e+00> : vector<5x16xf32>
    %79 = tpu.matmul %76, %78, %cst_28 {dimension_numbers = #tpu.dot_dimension_numbers<[1], [1], [0], [0], [0, 0, 1, 0], [], []>} : vector<5x64xbf16>, vector<16x64xbf16>, vector<5x16xf32> -> vector<5x16xf32>
    %cst_29 = arith.constant 1.250000e-01 : f32
    %80 = vector.broadcast %cst_29 : f32 to vector<5x16xf32>
    %81 = arith.mulf %79, %80 : vector<5x16xf32>
    %cst_30 = arith.constant dense<0xFF800000> : vector<5xf32>
    %82 = vector.multi_reduction <maximumf>, %81, %cst_30 [1] : vector<5x16xf32> to vector<5xf32>
    %83 = vector.shape_cast %82 : vector<5xf32> to vector<5x1xf32>
    %84 = vector.broadcast %83 : vector<5x1xf32> to vector<5x16xf32>
    %85 = arith.subf %81, %84 : vector<5x16xf32>
    %86 = math.exp %85 : vector<5x16xf32>
    %cst_31 = arith.constant dense<0.000000e+00> : vector<5xf32>
    %87 = vector.multi_reduction <add>, %86, %cst_31 [1] : vector<5x16xf32> to vector<5xf32>
    %88 = vector.shape_cast %87 : vector<5xf32> to vector<5x1xf32>
    %89 = tpu.reciprocal %88 {approx = true} : vector<5x1xf32> -> vector<5x1xf32>
    %90 = vector.broadcast %89 : vector<5x1xf32> to vector<5x16xf32>
    %91 = arith.mulf %86, %90 : vector<5x16xf32>
    %92 = arith.truncf %91 : vector<5x16xf32> to vector<5x16xbf16>
    %93 = vector.extract_strided_slice %11 {offsets = [0, 192], sizes = [16, 64], strides = [1, 1]} : vector<16x512xf32> to vector<16x64xf32>
    %94 = arith.truncf %93 : vector<16x64xf32> to vector<16x64xbf16>
    %cst_32 = arith.constant dense<0.000000e+00> : vector<5x64xf32>
    %95 = tpu.matmul %92, %94, %cst_32 {dimension_numbers = #tpu.dot_dimension_numbers<[1], [0], [0], [1], [0, 0, 1, 1], [], []>} : vector<5x16xbf16>, vector<16x64xbf16>, vector<5x64xf32> -> vector<5x64xf32>
    %96 = vector.extract_strided_slice %7 {offsets = [0, 256], sizes = [5, 64], strides = [1, 1]} : vector<5x512xf32> to vector<5x64xf32>
    %97 = arith.truncf %96 : vector<5x64xf32> to vector<5x64xbf16>
    %98 = vector.extract_strided_slice %9 {offsets = [0, 256], sizes = [16, 64], strides = [1, 1]} : vector<16x512xf32> to vector<16x64xf32>
    %99 = arith.truncf %98 : vector<16x64xf32> to vector<16x64xbf16>
    %cst_33 = arith.constant dense<0.000000e+00> : vector<5x16xf32>
    %100 = tpu.matmul %97, %99, %cst_33 {dimension_numbers = #tpu.dot_dimension_numbers<[1], [1], [0], [0], [0, 0, 1, 0], [], []>} : vector<5x64xbf16>, vector<16x64xbf16>, vector<5x16xf32> -> vector<5x16xf32>
    %cst_34 = arith.constant 1.250000e-01 : f32
    %101 = vector.broadcast %cst_34 : f32 to vector<5x16xf32>
    %102 = arith.mulf %100, %101 : vector<5x16xf32>
    %cst_35 = arith.constant dense<0xFF800000> : vector<5xf32>
    %103 = vector.multi_reduction <maximumf>, %102, %cst_35 [1] : vector<5x16xf32> to vector<5xf32>
    %104 = vector.shape_cast %103 : vector<5xf32> to vector<5x1xf32>
    %105 = vector.broadcast %104 : vector<5x1xf32> to vector<5x16xf32>
    %106 = arith.subf %102, %105 : vector<5x16xf32>
    %107 = math.exp %106 : vector<5x16xf32>
    %cst_36 = arith.constant dense<0.000000e+00> : vector<5xf32>
    %108 = vector.multi_reduction <add>, %107, %cst_36 [1] : vector<5x16xf32> to vector<5xf32>
    %109 = vector.shape_cast %108 : vector<5xf32> to vector<5x1xf32>
    %110 = tpu.reciprocal %109 {approx = true} : vector<5x1xf32> -> vector<5x1xf32>
    %111 = vector.broadcast %110 : vector<5x1xf32> to vector<5x16xf32>
    %112 = arith.mulf %107, %111 : vector<5x16xf32>
    %113 = arith.truncf %112 : vector<5x16xf32> to vector<5x16xbf16>
    %114 = vector.extract_strided_slice %11 {offsets = [0, 256], sizes = [16, 64], strides = [1, 1]} : vector<16x512xf32> to vector<16x64xf32>
    %115 = arith.truncf %114 : vector<16x64xf32> to vector<16x64xbf16>
    %cst_37 = arith.constant dense<0.000000e+00> : vector<5x64xf32>
    %116 = tpu.matmul %113, %115, %cst_37 {dimension_numbers = #tpu.dot_dimension_numbers<[1], [0], [0], [1], [0, 0, 1, 1], [], []>} : vector<5x16xbf16>, vector<16x64xbf16>, vector<5x64xf32> -> vector<5x64xf32>
    %117 = vector.extract_strided_slice %7 {offsets = [0, 320], sizes = [5, 64], strides = [1, 1]} : vector<5x512xf32> to vector<5x64xf32>
    %118 = arith.truncf %117 : vector<5x64xf32> to vector<5x64xbf16>
    %119 = vector.extract_strided_slice %9 {offsets = [0, 320], sizes = [16, 64], strides = [1, 1]} : vector<16x512xf32> to vector<16x64xf32>
    %120 = arith.truncf %119 : vector<16x64xf32> to vector<16x64xbf16>
    %cst_38 = arith.constant dense<0.000000e+00> : vector<5x16xf32>
    %121 = tpu.matmul %118, %120, %cst_38 {dimension_numbers = #tpu.dot_dimension_numbers<[1], [1], [0], [0], [0, 0, 1, 0], [], []>} : vector<5x64xbf16>, vector<16x64xbf16>, vector<5x16xf32> -> vector<5x16xf32>
    %cst_39 = arith.constant 1.250000e-01 : f32
    %122 = vector.broadcast %cst_39 : f32 to vector<5x16xf32>
    %123 = arith.mulf %121, %122 : vector<5x16xf32>
    %cst_40 = arith.constant dense<0xFF800000> : vector<5xf32>
    %124 = vector.multi_reduction <maximumf>, %123, %cst_40 [1] : vector<5x16xf32> to vector<5xf32>
    %125 = vector.shape_cast %124 : vector<5xf32> to vector<5x1xf32>
    %126 = vector.broadcast %125 : vector<5x1xf32> to vector<5x16xf32>
    %127 = arith.subf %123, %126 : vector<5x16xf32>
    %128 = math.exp %127 : vector<5x16xf32>
    %cst_41 = arith.constant dense<0.000000e+00> : vector<5xf32>
    %129 = vector.multi_reduction <add>, %128, %cst_41 [1] : vector<5x16xf32> to vector<5xf32>
    %130 = vector.shape_cast %129 : vector<5xf32> to vector<5x1xf32>
    %131 = tpu.reciprocal %130 {approx = true} : vector<5x1xf32> -> vector<5x1xf32>
    %132 = vector.broadcast %131 : vector<5x1xf32> to vector<5x16xf32>
    %133 = arith.mulf %128, %132 : vector<5x16xf32>
    %134 = arith.truncf %133 : vector<5x16xf32> to vector<5x16xbf16>
    %135 = vector.extract_strided_slice %11 {offsets = [0, 320], sizes = [16, 64], strides = [1, 1]} : vector<16x512xf32> to vector<16x64xf32>
    %136 = arith.truncf %135 : vector<16x64xf32> to vector<16x64xbf16>
    %cst_42 = arith.constant dense<0.000000e+00> : vector<5x64xf32>
    %137 = tpu.matmul %134, %136, %cst_42 {dimension_numbers = #tpu.dot_dimension_numbers<[1], [0], [0], [1], [0, 0, 1, 1], [], []>} : vector<5x16xbf16>, vector<16x64xbf16>, vector<5x64xf32> -> vector<5x64xf32>
    %138 = vector.extract_strided_slice %7 {offsets = [0, 384], sizes = [5, 64], strides = [1, 1]} : vector<5x512xf32> to vector<5x64xf32>
    %139 = arith.truncf %138 : vector<5x64xf32> to vector<5x64xbf16>
    %140 = vector.extract_strided_slice %9 {offsets = [0, 384], sizes = [16, 64], strides = [1, 1]} : vector<16x512xf32> to vector<16x64xf32>
    %141 = arith.truncf %140 : vector<16x64xf32> to vector<16x64xbf16>
    %cst_43 = arith.constant dense<0.000000e+00> : vector<5x16xf32>
    %142 = tpu.matmul %139, %141, %cst_43 {dimension_numbers = #tpu.dot_dimension_numbers<[1], [1], [0], [0], [0, 0, 1, 0], [], []>} : vector<5x64xbf16>, vector<16x64xbf16>, vector<5x16xf32> -> vector<5x16xf32>
    %cst_44 = arith.constant 1.250000e-01 : f32
    %143 = vector.broadcast %cst_44 : f32 to vector<5x16xf32>
    %144 = arith.mulf %142, %143 : vector<5x16xf32>
    %cst_45 = arith.constant dense<0xFF800000> : vector<5xf32>
    %145 = vector.multi_reduction <maximumf>, %144, %cst_45 [1] : vector<5x16xf32> to vector<5xf32>
    %146 = vector.shape_cast %145 : vector<5xf32> to vector<5x1xf32>
    %147 = vector.broadcast %146 : vector<5x1xf32> to vector<5x16xf32>
    %148 = arith.subf %144, %147 : vector<5x16xf32>
    %149 = math.exp %148 : vector<5x16xf32>
    %cst_46 = arith.constant dense<0.000000e+00> : vector<5xf32>
    %150 = vector.multi_reduction <add>, %149, %cst_46 [1] : vector<5x16xf32> to vector<5xf32>
    %151 = vector.shape_cast %150 : vector<5xf32> to vector<5x1xf32>
    %152 = tpu.reciprocal %151 {approx = true} : vector<5x1xf32> -> vector<5x1xf32>
    %153 = vector.broadcast %152 : vector<5x1xf32> to vector<5x16xf32>
    %154 = arith.mulf %149, %153 : vector<5x16xf32>
    %155 = arith.truncf %154 : vector<5x16xf32> to vector<5x16xbf16>
    %156 = vector.extract_strided_slice %11 {offsets = [0, 384], sizes = [16, 64], strides = [1, 1]} : vector<16x512xf32> to vector<16x64xf32>
    %157 = arith.truncf %156 : vector<16x64xf32> to vector<16x64xbf16>
    %cst_47 = arith.constant dense<0.000000e+00> : vector<5x64xf32>
    %158 = tpu.matmul %155, %157, %cst_47 {dimension_numbers = #tpu.dot_dimension_numbers<[1], [0], [0], [1], [0, 0, 1, 1], [], []>} : vector<5x16xbf16>, vector<16x64xbf16>, vector<5x64xf32> -> vector<5x64xf32>
    %159 = vector.extract_strided_slice %7 {offsets = [0, 448], sizes = [5, 64], strides = [1, 1]} : vector<5x512xf32> to vector<5x64xf32>
    %160 = arith.truncf %159 : vector<5x64xf32> to vector<5x64xbf16>
    %161 = vector.extract_strided_slice %9 {offsets = [0, 448], sizes = [16, 64], strides = [1, 1]} : vector<16x512xf32> to vector<16x64xf32>
    %162 = arith.truncf %161 : vector<16x64xf32> to vector<16x64xbf16>
    %cst_48 = arith.constant dense<0.000000e+00> : vector<5x16xf32>
    %163 = tpu.matmul %160, %162, %cst_48 {dimension_numbers = #tpu.dot_dimension_numbers<[1], [1], [0], [0], [0, 0, 1, 0], [], []>} : vector<5x64xbf16>, vector<16x64xbf16>, vector<5x16xf32> -> vector<5x16xf32>
    %cst_49 = arith.constant 1.250000e-01 : f32
    %164 = vector.broadcast %cst_49 : f32 to vector<5x16xf32>
    %165 = arith.mulf %163, %164 : vector<5x16xf32>
    %cst_50 = arith.constant dense<0xFF800000> : vector<5xf32>
    %166 = vector.multi_reduction <maximumf>, %165, %cst_50 [1] : vector<5x16xf32> to vector<5xf32>
    %167 = vector.shape_cast %166 : vector<5xf32> to vector<5x1xf32>
    %168 = vector.broadcast %167 : vector<5x1xf32> to vector<5x16xf32>
    %169 = arith.subf %165, %168 : vector<5x16xf32>
    %170 = math.exp %169 : vector<5x16xf32>
    %cst_51 = arith.constant dense<0.000000e+00> : vector<5xf32>
    %171 = vector.multi_reduction <add>, %170, %cst_51 [1] : vector<5x16xf32> to vector<5xf32>
    %172 = vector.shape_cast %171 : vector<5xf32> to vector<5x1xf32>
    %173 = tpu.reciprocal %172 {approx = true} : vector<5x1xf32> -> vector<5x1xf32>
    %174 = vector.broadcast %173 : vector<5x1xf32> to vector<5x16xf32>
    %175 = arith.mulf %170, %174 : vector<5x16xf32>
    %176 = arith.truncf %175 : vector<5x16xf32> to vector<5x16xbf16>
    %177 = vector.extract_strided_slice %11 {offsets = [0, 448], sizes = [16, 64], strides = [1, 1]} : vector<16x512xf32> to vector<16x64xf32>
    %178 = arith.truncf %177 : vector<16x64xf32> to vector<16x64xbf16>
    %cst_52 = arith.constant dense<0.000000e+00> : vector<5x64xf32>
    %179 = tpu.matmul %176, %178, %cst_52 {dimension_numbers = #tpu.dot_dimension_numbers<[1], [0], [0], [1], [0, 0, 1, 1], [], []>} : vector<5x16xbf16>, vector<16x64xbf16>, vector<5x64xf32> -> vector<5x64xf32>
    %180 = tpu.concatenate %32, %53, %74, %95, %116, %137, %158, %179 in 1 : vector<5x64xf32>, vector<5x64xf32>, vector<5x64xf32>, vector<5x64xf32>, vector<5x64xf32>, vector<5x64xf32>, vector<5x64xf32>, vector<5x64xf32> -> vector<5x512xf32>
    %181 = arith.truncf %180 : vector<5x512xf32> to vector<5x512xbf16>
    %c0_53 = arith.constant 0 : index
    %c0_54 = arith.constant 0 : index
    %182 = vector.load %arg6[%c0_53, %c0_54] : memref<512x4xbf16, #tpu.memory_space<vmem>>, vector<512x4xbf16>
    %cst_55 = arith.constant dense<0.000000e+00> : vector<5x4xf32>
    %183 = tpu.matmul %181, %182, %cst_55 {dimension_numbers = #tpu.dot_dimension_numbers<[1], [0], [0], [1], [0, 0, 1, 1], [], []>} : vector<5x512xbf16>, vector<512x4xbf16>, vector<5x4xf32> -> vector<5x4xf32>
    %c0_56 = arith.constant 0 : index
    %c0_57 = arith.constant 0 : index
    %184 = vector.load %arg7[%c0_56, %c0_57] : memref<1x4xf32, #tpu.memory_space<vmem>>, vector<1x4xf32>
    %185 = vector.broadcast %184 : vector<1x4xf32> to vector<5x4xf32>
    %186 = arith.addf %183, %185 : vector<5x4xf32>
    %c0_58 = arith.constant 0 : index
    %c0_59 = arith.constant 0 : index
    %c0_60 = arith.constant 0 : index
    %187 = vector.load %arg8[%c0_58, %c0_59, %c0_60] : memref<1x5x4xf32, #tpu.memory_space<vmem>>, vector<1x5x4xf32>
    %188 = vector.shape_cast %187 : vector<1x5x4xf32> to vector<5x4xf32>
    %189 = vector.shape_cast %186 : vector<5x4xf32> to vector<1x5x4xf32>
    tpu.vector_store %arg8[%c0_58, %c0_59, %c0_60], %189 {strides = array<i32>} : memref<1x5x4xf32, #tpu.memory_space<vmem>>, vector<1x5x4xf32>,
    return
  }
  func.func @transform_0(%arg0: i32) -> (i32, i32, i32) {
    %c0_i32 = arith.constant 0 : i32
    %c0_i32_0 = arith.constant 0 : i32
    %c0_i32_1 = arith.constant 0 : i32
    return %arg0, %c0_i32, %c0_i32_0 : i32, i32, i32
  }
  func.func @transform_1(%arg0: i32) -> (i32, i32, i32) {
    %c0_i32 = arith.constant 0 : i32
    %c0_i32_0 = arith.constant 0 : i32
    %c0_i32_1 = arith.constant 0 : i32
    return %arg0, %c0_i32, %c0_i32_0 : i32, i32, i32
  }
  func.func @transform_2(%arg0: i32) -> (i32, i32) {
    %c0_i32 = arith.constant 0 : i32
    %c0_i32_0 = arith.constant 0 : i32
    %c0_i32_1 = arith.constant 0 : i32
    return %c0_i32, %c0_i32_0 : i32, i32
  }
  func.func @transform_3(%arg0: i32) -> (i32, i32) {
    %c0_i32 = arith.constant 0 : i32
    %c0_i32_0 = arith.constant 0 : i32
    %c0_i32_1 = arith.constant 0 : i32
    return %c0_i32, %c0_i32_0 : i32, i32
  }
  func.func @transform_4(%arg0: i32) -> (i32, i32) {
    %c0_i32 = arith.constant 0 : i32
    %c0_i32_0 = arith.constant 0 : i32
    %c0_i32_1 = arith.constant 0 : i32
    return %c0_i32, %c0_i32_0 : i32, i32
  }
  func.func @transform_5(%arg0: i32) -> (i32, i32) {
    %c0_i32 = arith.constant 0 : i32
    %c0_i32_0 = arith.constant 0 : i32
    %c0_i32_1 = arith.constant 0 : i32
    return %c0_i32, %c0_i32_0 : i32, i32
  }
  func.func @transform_6(%arg0: i32) -> (i32, i32) {
    %c0_i32 = arith.constant 0 : i32
    %c0_i32_0 = arith.constant 0 : i32
    %c0_i32_1 = arith.constant 0 : i32
    return %c0_i32, %c0_i32_0 : i32, i32
  }
  func.func @transform_7(%arg0: i32) -> (i32, i32, i32) {
    %c0_i32 = arith.constant 0 : i32
    %c0_i32_0 = arith.constant 0 : i32
    %c0_i32_1 = arith.constant 0 : i32
    return %arg0, %c0_i32, %c0_i32_0 : i32, i32, i32
  }
}

module attributes {stable_mosaic.version = 11 : i64} {
  func.func @_ln_ffn_kernel(%arg0: i32, %arg1: memref<10x4xf32, #tpu.memory_space<vmem>>, %arg2: memref<1x4xf32, #tpu.memory_space<vmem>>, %arg3: memref<1x4xf32, #tpu.memory_space<vmem>>, %arg4: memref<4x4xbf16, #tpu.memory_space<vmem>>, %arg5: memref<1x4xf32, #tpu.memory_space<vmem>>, %arg6: memref<4x3xbf16, #tpu.memory_space<vmem>>, %arg7: memref<1x3xf32, #tpu.memory_space<vmem>>, %arg8: memref<10x3xf32, #tpu.memory_space<vmem>>) attributes {dimension_semantics = [#tpu.dimension_semantics<parallel>], iteration_bounds = array<i64: 1>, scalar_prefetch = 0 : i64, scratch_operands = 0 : i64, tpu.core_type = #tpu.core_type<tc>, window_params = [{transform_indices = @transform_0, window_bounds = array<i64: 10, 4>}, {pipeline_mode = #tpu.pipeline_mode<synchronous>, transform_indices = @transform_1, window_bounds = array<i64: 1, 4>}, {pipeline_mode = #tpu.pipeline_mode<synchronous>, transform_indices = @transform_2, window_bounds = array<i64: 1, 4>}, {pipeline_mode = #tpu.pipeline_mode<synchronous>, transform_indices = @transform_3, window_bounds = array<i64: 4, 4>}, {pipeline_mode = #tpu.pipeline_mode<synchronous>, transform_indices = @transform_4, window_bounds = array<i64: 1, 4>}, {pipeline_mode = #tpu.pipeline_mode<synchronous>, transform_indices = @transform_5, window_bounds = array<i64: 4, 3>}, {pipeline_mode = #tpu.pipeline_mode<synchronous>, transform_indices = @transform_6, window_bounds = array<i64: 1, 3>}, {transform_indices = @transform_7, window_bounds = array<i64: 10, 3>}]} {
    %c0 = arith.constant 0 : index
    %c0_0 = arith.constant 0 : index
    %0 = vector.load %arg1[%c0, %c0_0] : memref<10x4xf32, #tpu.memory_space<vmem>>, vector<10x4xf32>
    %cst = arith.constant dense<0.000000e+00> : vector<10xf32>
    %1 = vector.multi_reduction <add>, %0, %cst [1] : vector<10x4xf32> to vector<10xf32>
    %2 = vector.shape_cast %1 : vector<10xf32> to vector<10x1xf32>
    %cst_1 = arith.constant 4.000000e+00 : f32
    %3 = vector.broadcast %cst_1 : f32 to vector<10x1xf32>
    %4 = arith.divf %2, %3 : vector<10x1xf32>
    %5 = vector.broadcast %4 : vector<10x1xf32> to vector<10x4xf32>
    %6 = arith.subf %0, %5 : vector<10x4xf32>
    %7 = arith.mulf %6, %6 : vector<10x4xf32>
    %cst_2 = arith.constant dense<0.000000e+00> : vector<10xf32>
    %8 = vector.multi_reduction <add>, %7, %cst_2 [1] : vector<10x4xf32> to vector<10xf32>
    %9 = vector.shape_cast %8 : vector<10xf32> to vector<10x1xf32>
    %cst_3 = arith.constant 4.000000e+00 : f32
    %10 = vector.broadcast %cst_3 : f32 to vector<10x1xf32>
    %11 = arith.divf %9, %10 : vector<10x1xf32>
    %cst_4 = arith.constant 9.99999974E-6 : f32
    %12 = vector.broadcast %cst_4 : f32 to vector<10x1xf32>
    %13 = arith.addf %11, %12 : vector<10x1xf32>
    %14 = math.rsqrt %13 : vector<10x1xf32>
    %15 = vector.broadcast %14 : vector<10x1xf32> to vector<10x4xf32>
    %16 = arith.mulf %6, %15 : vector<10x4xf32>
    %c0_5 = arith.constant 0 : index
    %c0_6 = arith.constant 0 : index
    %17 = vector.load %arg2[%c0_5, %c0_6] : memref<1x4xf32, #tpu.memory_space<vmem>>, vector<1x4xf32>
    %18 = vector.broadcast %17 : vector<1x4xf32> to vector<10x4xf32>
    %19 = arith.mulf %16, %18 : vector<10x4xf32>
    %c0_7 = arith.constant 0 : index
    %c0_8 = arith.constant 0 : index
    %20 = vector.load %arg3[%c0_7, %c0_8] : memref<1x4xf32, #tpu.memory_space<vmem>>, vector<1x4xf32>
    %21 = vector.broadcast %20 : vector<1x4xf32> to vector<10x4xf32>
    %22 = arith.addf %19, %21 : vector<10x4xf32>
    %23 = arith.truncf %22 : vector<10x4xf32> to vector<10x4xbf16>
    %c0_9 = arith.constant 0 : index
    %c0_10 = arith.constant 0 : index
    %24 = vector.load %arg4[%c0_9, %c0_10] : memref<4x4xbf16, #tpu.memory_space<vmem>>, vector<4x4xbf16>
    %cst_11 = arith.constant dense<0.000000e+00> : vector<10x4xf32>
    %25 = tpu.matmul %23, %24, %cst_11 {dimension_numbers = #tpu.dot_dimension_numbers<[1], [0], [0], [1], [0, 0, 1, 1], [], []>} : vector<10x4xbf16>, vector<4x4xbf16>, vector<10x4xf32> -> vector<10x4xf32>
    %c0_12 = arith.constant 0 : index
    %c0_13 = arith.constant 0 : index
    %26 = vector.load %arg5[%c0_12, %c0_13] : memref<1x4xf32, #tpu.memory_space<vmem>>, vector<1x4xf32>
    %27 = vector.broadcast %26 : vector<1x4xf32> to vector<10x4xf32>
    %28 = arith.addf %25, %27 : vector<10x4xf32>
    %cst_14 = arith.constant 0.707106769 : f32
    %29 = vector.broadcast %cst_14 : f32 to vector<10x4xf32>
    %30 = arith.mulf %28, %29 : vector<10x4xf32>
    %31 = math.absf %30 : vector<10x4xf32>
    %cst_15 = arith.constant 0.327591091 : f32
    %32 = vector.broadcast %cst_15 : f32 to vector<10x4xf32>
    %33 = arith.mulf %32, %31 : vector<10x4xf32>
    %cst_16 = arith.constant 1.000000e+00 : f32
    %34 = vector.broadcast %cst_16 : f32 to vector<10x4xf32>
    %35 = arith.addf %34, %33 : vector<10x4xf32>
    %cst_17 = arith.constant 1.000000e+00 : f32
    %36 = vector.broadcast %cst_17 : f32 to vector<10x4xf32>
    %37 = arith.divf %36, %35 : vector<10x4xf32>
    %cst_18 = arith.constant 1.06140542 : f32
    %38 = vector.broadcast %cst_18 : f32 to vector<10x4xf32>
    %39 = arith.mulf %37, %38 : vector<10x4xf32>
    %cst_19 = arith.constant -1.45315206 : f32
    %40 = vector.broadcast %cst_19 : f32 to vector<10x4xf32>
    %41 = arith.addf %40, %39 : vector<10x4xf32>
    %42 = arith.mulf %37, %41 : vector<10x4xf32>
    %cst_20 = arith.constant 1.42141378 : f32
    %43 = vector.broadcast %cst_20 : f32 to vector<10x4xf32>
    %44 = arith.addf %43, %42 : vector<10x4xf32>
    %45 = arith.mulf %37, %44 : vector<10x4xf32>
    %cst_21 = arith.constant -0.284496725 : f32
    %46 = vector.broadcast %cst_21 : f32 to vector<10x4xf32>
    %47 = arith.addf %46, %45 : vector<10x4xf32>
    %48 = arith.mulf %37, %47 : vector<10x4xf32>
    %cst_22 = arith.constant 0.254829586 : f32
    %49 = vector.broadcast %cst_22 : f32 to vector<10x4xf32>
    %50 = arith.addf %49, %48 : vector<10x4xf32>
    %51 = arith.mulf %37, %50 : vector<10x4xf32>
    %52 = arith.mulf %31, %31 : vector<10x4xf32>
    %cst_23 = arith.constant 0.000000e+00 : f32
    %53 = vector.broadcast %cst_23 : f32 to vector<10x4xf32>
    %54 = arith.subf %53, %52 : vector<10x4xf32>
    %55 = math.exp %54 : vector<10x4xf32>
    %56 = arith.mulf %51, %55 : vector<10x4xf32>
    %cst_24 = arith.constant 1.000000e+00 : f32
    %57 = vector.broadcast %cst_24 : f32 to vector<10x4xf32>
    %58 = arith.subf %57, %56 : vector<10x4xf32>
    %cst_25 = arith.constant 0.000000e+00 : f32
    %59 = vector.broadcast %cst_25 : f32 to vector<10x4xf32>
    %60 = arith.cmpf olt, %30, %59 : vector<10x4xf32>
    %cst_26 = arith.constant 0.000000e+00 : f32
    %61 = vector.broadcast %cst_26 : f32 to vector<10x4xf32>
    %62 = arith.subf %61, %58 : vector<10x4xf32>
    %63 = arith.select %60, %62, %58 : vector<10x4xi1>, vector<10x4xf32>
    %cst_27 = arith.constant 5.000000e-01 : f32
    %64 = vector.broadcast %cst_27 : f32 to vector<10x4xf32>
    %65 = arith.mulf %64, %28 : vector<10x4xf32>
    %cst_28 = arith.constant 1.000000e+00 : f32
    %66 = vector.broadcast %cst_28 : f32 to vector<10x4xf32>
    %67 = arith.addf %66, %63 : vector<10x4xf32>
    %68 = arith.mulf %65, %67 : vector<10x4xf32>
    %69 = arith.truncf %68 : vector<10x4xf32> to vector<10x4xbf16>
    %c0_29 = arith.constant 0 : index
    %c0_30 = arith.constant 0 : index
    %70 = vector.load %arg6[%c0_29, %c0_30] : memref<4x3xbf16, #tpu.memory_space<vmem>>, vector<4x3xbf16>
    %cst_31 = arith.constant dense<0.000000e+00> : vector<10x3xf32>
    %71 = tpu.matmul %69, %70, %cst_31 {dimension_numbers = #tpu.dot_dimension_numbers<[1], [0], [0], [1], [0, 0, 1, 1], [], []>} : vector<10x4xbf16>, vector<4x3xbf16>, vector<10x3xf32> -> vector<10x3xf32>
    %c0_32 = arith.constant 0 : index
    %c0_33 = arith.constant 0 : index
    %72 = vector.load %arg7[%c0_32, %c0_33] : memref<1x3xf32, #tpu.memory_space<vmem>>, vector<1x3xf32>
    %73 = vector.broadcast %72 : vector<1x3xf32> to vector<10x3xf32>
    %74 = arith.addf %71, %73 : vector<10x3xf32>
    %c0_34 = arith.constant 0 : index
    %c0_35 = arith.constant 0 : index
    %75 = vector.load %arg8[%c0_34, %c0_35] : memref<10x3xf32, #tpu.memory_space<vmem>>, vector<10x3xf32>
    tpu.vector_store %arg8[%c0_34, %c0_35], %74 {strides = array<i32>} : memref<10x3xf32, #tpu.memory_space<vmem>>, vector<10x3xf32>,
    return
  }
  func.func @transform_0(%arg0: i32) -> (i32, i32) {
    %c0_i32 = arith.constant 0 : i32
    %c0_i32_0 = arith.constant 0 : i32
    return %arg0, %c0_i32 : i32, i32
  }
  func.func @transform_1(%arg0: i32) -> (i32, i32) {
    %c0_i32 = arith.constant 0 : i32
    %c0_i32_0 = arith.constant 0 : i32
    %c0_i32_1 = arith.constant 0 : i32
    return %c0_i32, %c0_i32_0 : i32, i32
  }
  func.func @transform_2(%arg0: i32) -> (i32, i32) {
    %c0_i32 = arith.constant 0 : i32
    %c0_i32_0 = arith.constant 0 : i32
    %c0_i32_1 = arith.constant 0 : i32
    return %c0_i32, %c0_i32_0 : i32, i32
  }
  func.func @transform_3(%arg0: i32) -> (i32, i32) {
    %c0_i32 = arith.constant 0 : i32
    %c0_i32_0 = arith.constant 0 : i32
    %c0_i32_1 = arith.constant 0 : i32
    return %c0_i32, %c0_i32_0 : i32, i32
  }
  func.func @transform_4(%arg0: i32) -> (i32, i32) {
    %c0_i32 = arith.constant 0 : i32
    %c0_i32_0 = arith.constant 0 : i32
    %c0_i32_1 = arith.constant 0 : i32
    return %c0_i32, %c0_i32_0 : i32, i32
  }
  func.func @transform_5(%arg0: i32) -> (i32, i32) {
    %c0_i32 = arith.constant 0 : i32
    %c0_i32_0 = arith.constant 0 : i32
    %c0_i32_1 = arith.constant 0 : i32
    return %c0_i32, %c0_i32_0 : i32, i32
  }
  func.func @transform_6(%arg0: i32) -> (i32, i32) {
    %c0_i32 = arith.constant 0 : i32
    %c0_i32_0 = arith.constant 0 : i32
    %c0_i32_1 = arith.constant 0 : i32
    return %c0_i32, %c0_i32_0 : i32, i32
  }
  func.func @transform_7(%arg0: i32) -> (i32, i32) {
    %c0_i32 = arith.constant 0 : i32
    %c0_i32_0 = arith.constant 0 : i32
    return %arg0, %c0_i32 : i32, i32
  }
}

module attributes {stable_mosaic.version = 11 : i64} {
  func.func @_linear_kernel(%arg0: i32, %arg1: memref<128x32xbf16, #tpu.memory_space<vmem>>, %arg2: memref<32x5xbf16, #tpu.memory_space<vmem>>, %arg3: memref<1x5xf32, #tpu.memory_space<vmem>>, %arg4: memref<128x5xf32, #tpu.memory_space<vmem>>) attributes {dimension_semantics = [#tpu.dimension_semantics<parallel>], iteration_bounds = array<i64: 1>, scalar_prefetch = 0 : i64, scratch_operands = 0 : i64, tpu.core_type = #tpu.core_type<tc>, window_params = [{transform_indices = @transform_0, window_bounds = array<i64: 128, 32>}, {pipeline_mode = #tpu.pipeline_mode<synchronous>, transform_indices = @transform_1, window_bounds = array<i64: 32, 5>}, {pipeline_mode = #tpu.pipeline_mode<synchronous>, transform_indices = @transform_2, window_bounds = array<i64: 1, 5>}, {transform_indices = @transform_3, window_bounds = array<i64: 128, 5>}]} {
    %c0 = arith.constant 0 : index
    %c0_0 = arith.constant 0 : index
    %0 = vector.load %arg1[%c0, %c0_0] : memref<128x32xbf16, #tpu.memory_space<vmem>>, vector<128x32xbf16>
    %c0_1 = arith.constant 0 : index
    %c0_2 = arith.constant 0 : index
    %1 = vector.load %arg2[%c0_1, %c0_2] : memref<32x5xbf16, #tpu.memory_space<vmem>>, vector<32x5xbf16>
    %cst = arith.constant dense<0.000000e+00> : vector<128x5xf32>
    %2 = tpu.matmul %0, %1, %cst {dimension_numbers = #tpu.dot_dimension_numbers<[1], [0], [0], [1], [0, 0, 1, 1], [], []>} : vector<128x32xbf16>, vector<32x5xbf16>, vector<128x5xf32> -> vector<128x5xf32>
    %c0_3 = arith.constant 0 : index
    %c0_4 = arith.constant 0 : index
    %3 = vector.load %arg3[%c0_3, %c0_4] : memref<1x5xf32, #tpu.memory_space<vmem>>, vector<1x5xf32>
    %4 = vector.broadcast %3 : vector<1x5xf32> to vector<128x5xf32>
    %5 = arith.addf %2, %4 : vector<128x5xf32>
    %c0_5 = arith.constant 0 : index
    %c0_6 = arith.constant 0 : index
    %6 = vector.load %arg4[%c0_5, %c0_6] : memref<128x5xf32, #tpu.memory_space<vmem>>, vector<128x5xf32>
    tpu.vector_store %arg4[%c0_5, %c0_6], %5 {strides = array<i32>} : memref<128x5xf32, #tpu.memory_space<vmem>>, vector<128x5xf32>,
    return
  }
  func.func @transform_0(%arg0: i32) -> (i32, i32) {
    %c0_i32 = arith.constant 0 : i32
    %c0_i32_0 = arith.constant 0 : i32
    return %arg0, %c0_i32 : i32, i32
  }
  func.func @transform_1(%arg0: i32) -> (i32, i32) {
    %c0_i32 = arith.constant 0 : i32
    %c0_i32_0 = arith.constant 0 : i32
    %c0_i32_1 = arith.constant 0 : i32
    return %c0_i32, %c0_i32_0 : i32, i32
  }
  func.func @transform_2(%arg0: i32) -> (i32, i32) {
    %c0_i32 = arith.constant 0 : i32
    %c0_i32_0 = arith.constant 0 : i32
    %c0_i32_1 = arith.constant 0 : i32
    return %c0_i32, %c0_i32_0 : i32, i32
  }
  func.func @transform_3(%arg0: i32) -> (i32, i32) {
    %c0_i32 = arith.constant 0 : i32
    %c0_i32_0 = arith.constant 0 : i32
    return %arg0, %c0_i32 : i32, i32
  }
}

</mosaic_0001>

<bundles_post_ra>
// kernel: custom-call.62
= control target key start
LH: loop header
LB: loop body
LE: loop exit
PB: predicated region body
PF: predicated region fallthrough
CT: control target
= control target key end

     0   :  { %s6_s0 = inlined_call_operand.vmem [shape: f32[2,16], index: 0, kind: output, shape index: {}]  }

// kernel: _lambda_.14
= control target key start
LH: loop header
LB: loop body
LE: loop exit
PB: predicated region body
PF: predicated region fallthrough
CT: control target
= control target key end

     0   :  { %s439_s9 = smov 0   ;;  %s441_s10 = smov 0   ;;  %s514_s0 = inlined_call_operand.vmem [shape: bf16[12,32,7], index: 0, kind: input, shape index: {}]   ;;  %s515_s1 = inlined_call_operand.vmem [shape: bf16[7,32], index: 1, kind: input, shape index: {}]   ;;  %s516_s2 = inlined_call_operand.vmem [shape: f32[32,32], index: 2, kind: output, shape index: {}]  }
   0x1   :  { %s443_s11 = smov 0  }
   0x2 LB: > { %s21_s12 = sadd.s32 1, %s417_s10  ;;  %p349_p0 = scmp.ge.s32.totalorder %s421_s11, 1  ;;  %s421_s11 = sphi %s443_s11, %s12_s11   ;;  %s417_s10 = sphi %s441_s10, %s518_s10   ;;  %s413_s9 = sphi %s439_s9, %s517_s9  }
   0x3   : > { %p22_p1 = scmp.ge.s32.totalorder %s21_s12, 12  ;;  %p131_p2 = scmp.lt.s32.totalorder %s421_s11, 13 }
   0x5   : > { %s520_s12 = smov (%p22_p1, %s21_s12), 0  ;;  %p132_p3 = pnand %p349_p0, %p131_p2 }
   0x6   : > { %p158_p4 = scmp.lt.s32.totalorder (!%p132_p3), %s413_s9, 11  ;;  %p356_p5 = scmp.ne.s32.totalorder (!%p132_p3), %s413_s9, 0 }
   0x7   : > { %135 = sbr.rel (%p132_p3) target bundleno = 235 (0xeb), region = 28 }
   0xc   : > { %v178_v0 = vld [vmem:[%s515_s1] sm:$0xf]  ;;  %vm196_vm0 = vcmask 1042432   ;;  %vm197_vm1 = vcmask 1043456   ;;  %v423_v1 = vmov 65535   ;;  %s159_s15 = scalar_select %p158_p4, %s413_s9, 11 }
   0xd   : > { %v198_v2 = vsel %vm196_vm0, 4294967295, %v423_v1  ;;  %vm189_vm2 = vcmask 56320  }
   0xe   : > { %v199_v3 = vsel %vm197_vm1, %v198_v2, 0  ;;  %s362_s16 = sshll.u32 %s159_s15, 4 }
   0xf   : > { %v201_v4 = vand.u32 %v199_v3, %v178_v0  ;;  %s165_s19 = scalar_lea.vmem %s514_s0, %s362_s16 }
  0x10   : > { %v397_v5 = vld [vmem:[%s165_s19] sm:$0xff]   ;;  %v398_v6 = vld [vmem:[%s165_s19 + $0x8] sm:$0xff]  }
  0x11   : > { %366 = vmatprep.subr.bf16.mxu0 %v201_v4  ;;  %368 = vmatprep.mubr.msk.bf16.mxu0 %vm189_vm2, %v397_v5 }
  0x12   : > { %367 = vmatpush3.bf16.msra.mxu0 %v201_v4 }
  0x15   : > { %369 = vmatmul.mubr.msk.bf16.vlgmr.msra.gmra.mxu0 %vm189_vm2, %v398_v6 }
  0xd5   : > { %v370_v7 = vpop.f32.mrf.mxu0 }
  0xd7   : > { %v237_v8 = vpop.f32.mrf.mxu0  ;;  %255 = sbr.rel (%p356_p5) target bundleno = 223 (0xdf), region = 32 }
  0xd9   : > { %v371_v9 = vpop.f32.mrf.mxu0 }
  0xdb   : > { %v240_v10 = vpop.f32.mrf.mxu0 }
  0xdc   : > { %vm256_vm3 = vcmask 261120  }
  0xdd   : > { %257 = vst.msk [vmem:[%s516_s2] sm:$0xff] %vm256_vm3, %v237_v8  ;;  %258 = vst.msk [vmem:[%s516_s2 + $0x8] sm:$0xff] %vm256_vm3, %v240_v10 }
  0xde   : > { %259 = vst.msk [vmem:[%s516_s2 + $0x10] sm:$0xff] %vm256_vm3, %v370_v7  ;;  %260 = vst.msk [vmem:[%s516_s2 + $0x18] sm:$0xff] %vm256_vm3, %v371_v9 }
  0xdf PF: > { %p357_p6 = scmp.le.s32.totalorder %s413_s9, 0 }
  0xe1   : > { %264 = sbr.rel (%p357_p6) target bundleno = 235 (0xeb), region = 36 }
  0xe6   : > { %v265_v11 = vld [vmem:[%s516_s2] sm:$0xff]  ;;  %vm273_vm4 = vcmask 261120   ;;  %v266_v12 = vld [vmem:[%s516_s2 + $0x8] sm:$0xff]  ;;  %v267_v13 = vld [vmem:[%s516_s2 + $0x10] sm:$0xff] }
  0xe7   : > { %v269_v14 = vmax.f32 %v265_v11, %v237_v8  ;;  %v270_v15 = vmax.f32 %v266_v12, %v240_v10  ;;  %v271_v16 = vmax.f32 %v267_v13, %v370_v7  ;;  %v268_v17 = vld [vmem:[%s516_s2 + $0x18] sm:$0xff] }
  0xe8   : > { %v272_v18 = vmax.f32 %v268_v17, %v371_v9 }
  0xe9   : > { %274 = vst.msk [vmem:[%s516_s2] sm:$0xff] %vm273_vm4, %v269_v14  ;;  %275 = vst.msk [vmem:[%s516_s2 + $0x8] sm:$0xff] %vm273_vm4, %v270_v15 }
  0xea   : > { %276 = vst.msk [vmem:[%s516_s2 + $0x10] sm:$0xff] %vm273_vm4, %v271_v16  ;;  %277 = vst.msk [vmem:[%s516_s2 + $0x18] sm:$0xff] %vm273_vm4, %v272_v18 }
  0xeb PF: > { %s12_s11 = sadd.s32 1, %s421_s11   ;;  %s517_s9 = smov %s417_s10 }
  0xec   : > { %p9_p7 = scmp.ge.s32.totalorder %s12_s11, 14   ;;  %s518_s10 = smov %s520_s12 }
  0xee   :  { %11 = sbr.rel (!%p9_p7) target bundleno = 2 (0x2), region = 66 }

// kernel: _lambda_.15
= control target key start
LH: loop header
LB: loop body
LE: loop exit
PB: predicated region body
PF: predicated region fallthrough
CT: control target
= control target key end

     0   :  { %vm47_vm0 = vcmask 1041408   ;;  %vm40_vm1 = vcmask 31744   ;;  %vm112_vm2 = vcmask 261120   ;;  %s203_s1 = inlined_call_operand.vmem [shape: bf16[4,32], index: 1, kind: input, shape index: {}]   ;;  %s204_s0 = inlined_call_operand.vmem [shape: bf16[32,4], index: 0, kind: input, shape index: {}]   ;;  %s205_s2 = inlined_call_operand.vmem [shape: f32[1,32], index: 2, kind: input, shape index: {}]   ;;  %s206_s3 = inlined_call_operand.vmem [shape: f32[32,32], index: 3, kind: input, shape index: {}]   ;;  %s207_s4 = inlined_call_operand.vmem [shape: f32[32,32], index: 4, kind: output, shape index: {}]  }
   0x1   :  { %v22_v0 = vld [vmem:[%s203_s1] sm:$0x3]  ;;  %v137_v3 = vld [vmem:[%s204_s0 + $0x8] sm:$0xff]   ;;  %v102_v6 = vld [vmem:[%s206_s3 + $0x10] sm:$0xff] }
   0x2   :  { %135 = vmatprep.subr.msk.bf16.mxu0 %vm47_vm0, %v22_v0  ;;  %v49_v1 = vsel %vm47_vm0, %v22_v0, 0  ;;  %v136_v2 = vld [vmem:[%s204_s0] sm:$0xff]   ;;  %v103_v13 = vld [vmem:[%s206_s3 + $0x18] sm:$0xff]  ;;  %v101_v18 = vld [vmem:[%s206_s3 + $0x8] sm:$0xff] }
   0x3   :  { %130 = vmatpush3.bf16.msra.mxu0 %v49_v1  ;;  %131 = vmatprep.mubr.msk.bf16.mxu0 %vm40_vm1, %v136_v2  ;;  %v121_v4 = vld [vmem:[%s205_s2] ss:$0 sm:$0xff] }
   0x4   :  { %v100_v9 = vld [vmem:[%s206_s3] sm:$0xff] }
   0x6   :  { %132 = vmatmul.mubr.msk.bf16.vlgmr.msra.gmra.mxu0 %vm40_vm1, %v137_v3 }
  0xc6   :  { %v133_v5 = vpop.f32.mrf.mxu0 }
  0xc7   :  { %v94_v7 = vadd.f32 %v133_v5, %v121_v4 }
  0xc8   :  { %v85_v8 = vpop.f32.mrf.mxu0 }
  0xc9   :  { %v106_v10 = vadd.f32 %v102_v6, %v94_v7  ;;  %v86_v11 = vadd.f32 %v121_v4, %v85_v8 }
  0xca   :  { %v134_v12 = vpop.f32.mrf.mxu0 }
  0xcb   :  { %v110_v14 = vmax.f32 %v106_v10, 0.0  ;;  %v104_v15 = vadd.f32 %v100_v9, %v86_v11  ;;  %v97_v16 = vadd.f32 %v134_v12, %v121_v4 }
  0xcc   :  { %v88_v17 = vpop.f32.mrf.mxu0 }
  0xcd   :  { %115 = vst.msk [vmem:[%s207_s4 + $0x10] sm:$0xff] %vm112_vm2, %v110_v14  ;;  %v108_v19 = vmax.f32 %v104_v15, 0.0  ;;  %v107_v20 = vadd.f32 %v103_v13, %v97_v16  ;;  %v89_v21 = vadd.f32 %v121_v4, %v88_v17 }
  0xcf   :  { %113 = vst.msk [vmem:[%s207_s4] sm:$0xff] %vm112_vm2, %v108_v19  ;;  %v111_v22 = vmax.f32 %v107_v20, 0.0  ;;  %v105_v23 = vadd.f32 %v101_v18, %v89_v21 }
  0xd1   :  { %116 = vst.msk [vmem:[%s207_s4 + $0x18] sm:$0xff] %vm112_vm2, %v111_v22  ;;  %v109_v24 = vmax.f32 %v105_v23, 0.0 }
  0xd3   :  { %114 = vst.msk [vmem:[%s207_s4 + $0x8] sm:$0xff] %vm112_vm2, %v109_v24 }

// kernel: _lambda_.16
= control target key start
LH: loop header
LB: loop body
LE: loop exit
PB: predicated region body
PF: predicated region fallthrough
CT: control target
= control target key end

     0   :  { %s910_s21 = smov 0   ;;  %s1013_s0 = inlined_call_operand.vmem [shape: f32[2,16,32], index: 0, kind: input, shape index: {}]   ;;  %s1014_s1 = inlined_call_operand.vmem [shape: f32[1,32], index: 1, kind: input, shape index: {}]   ;;  %s1015_s2 = inlined_call_operand.vmem [shape: f32[1,32], index: 2, kind: input, shape index: {}]   ;;  %s1016_s3 = inlined_call_operand.vmem [shape: bf16[32,48], index: 3, kind: input, shape index: {}]   ;;  %s1017_s4 = inlined_call_operand.vmem [shape: bf16[16,32], index: 4, kind: input, shape index: {}]   ;;  %s1018_s5 = inlined_call_operand.vmem [shape: f32[1,32], index: 5, kind: input, shape index: {}]   ;;  %s1019_s6 = inlined_call_operand.vmem [shape: f32[2,16,32], index: 6, kind: output, shape index: {}]  }
   0x1 LB: > { %s739_s22 = sadd.s32 4294967295, %s865_s21   ;;  %p743_p0 = scmp.ge.s32.totalorder %s865_s21, 1  ;;  %s865_s21 = sphi %s910_s21, %s16_s21  }
   0x2   : > { %p212_p1 = scmp.lt.s32.totalorder %s865_s21, 3 }
   0x4   : > { %p213_p2 = pnand %p743_p0, %p212_p1 }
   0x5   : > { %p242_p3 = scmp.lt.s32.totalorder (!%p213_p2), %s739_s22, 1  ;;  %s869_s11 = smov (!%p213_p2), 104  }
   0x6   : > { %216 = sbr.rel (%p213_p2) target bundleno = 1693 (0x69d), region = 44  ;;  %s870_s12 = smov (!%p213_p2), 112  }
   0x7   : > { %s871_s13 = smov (!%p213_p2), 120   ;;  %s872_s14 = smov (!%p213_p2), 96  }
   0x8   : > { %s873_s15 = smov (!%p213_p2), 88   ;;  %s874_s18 = smov (!%p213_p2), 8  }
   0xb   : > { %s1021_s22 = smov (!%p242_p3, %s739_s22), 1  ;;  %vm255_vm0 = vcmask 261120   ;;  %v836_v14 = vld [vmem:[%s1016_s3 + $0x8] sm:$0xff]   ;;  %v867_v15 = vmov 0.0   ;;  %vm868_vm1 = vmmov 0   ;;  %v837_v16 = vld [vmem:[%s1016_s3] sm:$0xff]  }
   0xc   : > { %s762_s23 = sshll.u32 %s1021_s22, 4  ;;  %777 = vmatprep.subr.bf16.mxu0 %v867_v15  ;;  %781 = vmatprep.mubr.msk.bf16.mxu0 %vm868_vm1, %v867_v15  ;;  %v748_v25 = vld [vmem:[%s1014_s1] ss:$0 sm:$0xff]  ;;  %vm366_vm2 = vcmask 64512   ;;  %vm416_vm3 = vcmask 130048  }
   0xd   : > { %s246_s26 = scalar_lea.vmem %s1013_s0, %s762_s23  ;;  %778 = vmatpush3.bf16.msra.mxu0 %v836_v14  ;;  %785 = vmatprep.subr.bf16.mxu1 %v867_v15  ;;  %v749_v29 = vld [vmem:[%s1015_s2] ss:$0 sm:$0xff] }
   0xe   : > { %v926_v0 = vld [vmem:[%s246_s26] sm:$0xff]  ;;  %v928_v1 = vld [vmem:[%s246_s26 + $0x8] sm:$0xff]  ;;  %779 = vmatprep.subr.bf16.mxu0 %v867_v15  ;;  %787 = vmatprep.mubr.msk.bf16.mxu1 %vm868_vm1, %v867_v15  ;;  %s251_s26 = scalar_lea.vmem %s1019_s6, %s762_s23 }
   0xf   : > { %v256_v2 = vsel %vm255_vm0, %v926_v0, 0.0  ;;  %v259_v3 = vsel %vm255_vm0, %v928_v1, 0.0 }
  0x10   : > { %257 = vadd.xlane.f32.xlu0 %v256_v2 }
  0x11   : > { %780 = vmatpush3.bf16.msra.mxu0 %v837_v16 }
  0x12   : > { %791 = vmatprep.subr.bf16.mxu0 %v867_v15 }
  0x14   : > { %260 = vadd.xlane.f32.xlu0 %v259_v3 }
  0x99   : > { %v258_v4 = vpop.xlane.xlu0 %257 }
  0x9a   : > { %v263_v5 = vmul.f32 0.03125, %v258_v4 }
  0x9c   : > { %v265_v6 = vsub.f32 %v926_v0, %v263_v5 }
  0x9d   : > { %v261_v7 = vpop.xlane.xlu0 %260 }
  0x9e   : > { %v264_v8 = vmul.f32 0.03125, %v261_v7  ;;  %v267_v9 = vmul.f32 %v265_v6, %v265_v6 }
  0xa0   : > { %v266_v10 = vsub.f32 %v928_v1, %v264_v8  ;;  %v269_v11 = vsel %vm255_vm0, %v267_v9, 0.0 }
  0xa1   : > { %270 = vadd.xlane.f32.xlu1 %v269_v11 }
  0xa2   : > { %v268_v12 = vmul.f32 %v266_v10, %v266_v10 }
  0xa4   : > { %v272_v13 = vsel %vm255_vm0, %v268_v12, 0.0 }
  0xa5   : > { %273 = vadd.xlane.f32.xlu1 %v272_v13 }
 0x12a   : > { %v271_v17 = vpop.xlane.xlu1 %270 }
 0x12b   : > { %v275_v18 = vmul.f32 0.03125, %v271_v17 }
 0x12d   : > { %v277_v19 = vadd.f32 1e-05, %v275_v18 }
 0x12e   : > { %v274_v20 = vpop.xlane.xlu1 %273 }
 0x12f   : > { %839 = vrsqrt.f32 %v277_v19  ;;  %v276_v21 = vmul.f32 0.03125, %v274_v20 }
 0x131   : > { %v278_v22 = vadd.f32 1e-05, %v276_v21 }
 0x133   : > { %841 = vrsqrt.f32 %v278_v22 }
 0x13c   : > { %v840_v23 = vpop.eup %839 }
 0x13d   : > { %v281_v24 = vmul.f32 %v840_v23, %v265_v6 }
 0x13f   : > { %v290_v28 = vmul.f32 %v748_v25, %v281_v24 }
 0x140   : > { %v842_v26 = vpop.eup %841 }
 0x141   : > { %v282_v27 = vmul.f32 %v842_v26, %v266_v10  ;;  %v299_v31 = vadd.f32 %v749_v29, %v290_v28 }
 0x143   : > { %v291_v30 = vmul.f32 %v748_v25, %v282_v27 }
 0x145   : > { %v300_v32 = vadd.f32 %v749_v29, %v291_v30 }
 0x147   : > { %v301_v33 = vpack.c.bf16 %v300_v32, %v299_v31 }
 0x149   : > { %782 = vmatmul.mubr.msk.bf16.vlgmr.msra.gmra.mxu0 %vm255_vm0, %v301_v33 }
 0x14a   : > { %793 = vmatprep.mubr.msk.bf16.mxu0 %vm868_vm1, %v867_v15 }
 0x209   : > { %v355_v34 = vpop.f32.mrf.mxu0 }
 0x20b   : > { %v783_v35 = vpop.f32.mrf.mxu0 }
 0x20c   : > { %v838_v35 = vld [vmem:[%s1017_s4] sm:$0xff]  }
 0x20d   : > { %v358_v36 = vpop.f32.mrf.mxu0 }
 0x20e   : > { %v961_v37 = vpack.c.bf16 %v358_v36, %v355_v34 }
 0x20f   : > { %v784_v38 = vpop.f32.mrf.mxu0 }
 0x210   : > { %489 = vrot.lane.b32.xlu1 %v961_v37, %s869_s11  ;;  %364 = vrot.lane.b32.xlu0 %v961_v37, %s870_s12 }
 0x214   : > { %487 = vrot.lane.b32.xlu1 %v961_v37, %s871_s13 }
 0x282   : > { %v365_v39 = vpop.permute.xlu0 %364  ;;  %v490_v41 = vpop.permute.xlu1 %489 }
 0x283   : > { %v371_v40 = vsel %vm366_vm2, %v365_v39, 0  ;;  %v495_v42 = vsel %vm366_vm2, %v490_v41, 0 }
 0x284   : > { %786 = vmatpush3.bf16.xpose.msra.mxu1 %v371_v40 }
 0x285   : > { %797 = vmatprep.subr.bf16.mxu1 %v867_v15 }
 0x286   : > { %v488_v43 = vpop.permute.xlu1 %487 }
 0x28b   : > { %788 = vmatmul.mubr.msk.bf16.vlgmr.msra.gmra.mxu1 %vm366_vm2, %v961_v37 }
 0x28c   : > { %798 = vmatpush3.bf16.xpose.msra.mxu1 %v495_v42  ;;  %799 = vmatprep.mubr.msk.bf16.mxu1 %vm868_vm1, %v867_v15 }
 0x28d   : > { %809 = vmatprep.subr.bf16.mxu1 %v867_v15 }
 0x293   : > { %800 = vmatmul.mubr.msk.bf16.vlgmr.msra.gmra.mxu1 %vm366_vm2, %v488_v43 }
 0x294   : > { %811 = vmatprep.mubr.msk.bf16.mxu1 %vm868_vm1, %v867_v15  ;;  %810 = vmatpush3.bf16.msra.mxu1 %v838_v35 }
 0x34b   : > { %v407_v44 = vpop.f32.mrf.mxu1 }
 0x34c   : > { %v414_v45 = vmul.f32 0.35355338, %v407_v44 }
 0x34d   : > { %v789_v46 = vpop.f32.mrf.mxu1 }
 0x34e   : > { %v417_v47 = vsel %vm416_vm3, %v414_v45, -inf }
 0x34f   : > { %418 = vmax.xlane.f32.xlu1 %v417_v47  ;;  %v410_v48 = vpop.f32.mrf.mxu1 }
 0x350   : > { %v415_v49 = vmul.f32 0.35355338, %v410_v48 }
 0x351   : > { %v790_v50 = vpop.f32.mrf.mxu1 }
 0x352   : > { %v420_v51 = vsel %vm416_vm3, %v415_v49, -inf  ;;  %v757_v50 = vld [vmem:[%s1018_s5] ss:$0 sm:$0xff] }
 0x353   : > { %421 = vmax.xlane.f32.xlu0 %v420_v51  ;;  %v531_v52 = vpop.f32.mrf.mxu1 }
 0x354   : > { %v538_v53 = vmul.f32 0.35355338, %v531_v52 }
 0x355   : > { %v801_v54 = vpop.f32.mrf.mxu1 }
 0x356   : > { %v540_v55 = vsel %vm416_vm3, %v538_v53, -inf }
 0x357   : > { %541 = vmax.xlane.f32.xlu0 %v540_v55  ;;  %v534_v56 = vpop.f32.mrf.mxu1 }
 0x358   : > { %v539_v57 = vmul.f32 0.35355338, %v534_v56 }
 0x359   : > { %v802_v58 = vpop.f32.mrf.mxu1 }
 0x35a   : > { %v543_v59 = vsel %vm416_vm3, %v539_v57, -inf }
 0x35b   : > { %544 = vmax.xlane.f32.xlu0 %v543_v59 }
 0x3d8   : > { %v419_v60 = vpop.xlane.xlu1 %418 }
 0x3d9   : > { %v423_v61 = vsub.f32 %v414_v45, %v419_v60 }
 0x3db   : > { %v425_v62 = vmul.f32 1.442695, %v423_v61 }
 0x3dc   : > { %v422_v63 = vpop.xlane.xlu0 %421 }
 0x3dd   : > { %843 = vpow2.f32 %v425_v62  ;;  %v424_v2 = vsub.f32 %v415_v49, %v422_v63 }
 0x3df   : > { %v427_v3 = vmul.f32 1.442695, %v424_v2 }
 0x3e0   : > { %v542_v4 = vpop.xlane.xlu0 %541 }
 0x3e1   : > { %845 = vpow2.f32 %v427_v3  ;;  %v546_v5 = vsub.f32 %v538_v53, %v542_v4 }
 0x3e3   : > { %v548_v6 = vmul.f32 1.442695, %v546_v5 }
 0x3e4   : > { %v545_v7 = vpop.xlane.xlu0 %544 }
 0x3e5   : > { %847 = vpow2.f32 %v548_v6  ;;  %v547_v8 = vsub.f32 %v539_v57, %v545_v7 }
 0x3e7   : > { %v550_v9 = vmul.f32 1.442695, %v547_v8 }
 0x3e9   : > { %849 = vpow2.f32 %v550_v9 }
 0x3ea   : > { %v844_v10 = vpop.eup %843 }
 0x3eb   : > { %v429_v11 = vsel %vm416_vm3, %v844_v10, 0.0 }
 0x3ec   : > { %430 = vadd.xlane.f32.xlu1 %v429_v11 }
 0x3ee   : > { %v846_v12 = vpop.eup %845 }
 0x3ef   : > { %v432_v13 = vsel %vm416_vm3, %v846_v12, 0.0 }
 0x3f0   : > { %433 = vadd.xlane.f32.xlu0 %v432_v13 }
 0x3f2   : > { %v848_v14 = vpop.eup %847 }
 0x3f3   : > { %v552_v16 = vsel %vm416_vm3, %v848_v14, 0.0 }
 0x3f4   : > { %553 = vadd.xlane.f32.xlu1 %v552_v16 }
 0x3f6   : > { %v850_v17 = vpop.eup %849 }
 0x3f7   : > { %v555_v18 = vsel %vm416_vm3, %v850_v17, 0.0 }
 0x3f8   : > { %556 = vadd.xlane.f32.xlu0 %v555_v18 }
 0x405   : > { %440 = vrot.lane.b32.xlu1 %v961_v37, %s872_s14 }
 0x40e   : > { %563 = vrot.lane.b32.xlu0 %v961_v37, %s873_s15 }
 0x475   : > { %v431_v19 = vpop.xlane.xlu1 %430 }
 0x476   : > { %851 = vrcp.f32 %v431_v19 }
 0x479   : > { %v434_v20 = vpop.xlane.xlu0 %433 }
 0x47a   : > { %853 = vrcp.f32 %v434_v20 }
 0x47d   : > { %v554_v21 = vpop.xlane.xlu1 %553 }
 0x47e   : > { %855 = vrcp.f32 %v554_v21 }
 0x481   : > { %v441_v22 = vpop.permute.xlu1 %440  ;;  %v557_v23 = vpop.xlane.xlu0 %556 }
 0x482   : > { %857 = vrcp.f32 %v557_v23  ;;  %792 = vmatpush3.bf16.msra.mxu0 %v441_v22 }
 0x483   : > { %803 = vmatprep.subr.bf16.mxu0 %v867_v15  ;;  %v852_v24 = vpop.eup %851 }
 0x484   : > { %v437_v26 = vmul.f32 %v852_v24, %v844_v10 }
 0x485   : > { %v564_v29 = vpop.permute.xlu0 %563 }
 0x487   : > { %v854_v25 = vpop.eup %853 }
 0x488   : > { %v438_v27 = vmul.f32 %v854_v25, %v846_v12 }
 0x48a   : > { %v439_v28 = vpack.c.bf16 %v438_v27, %v437_v26 }
 0x48b   : > { %v856_v30 = vpop.eup %855 }
 0x48c   : > { %794 = vmatmul.mubr.msk.bf16.vlgmr.msra.gmra.mxu0 %vm416_vm3, %v439_v28  ;;  %v560_v32 = vmul.f32 %v856_v30, %v848_v14 }
 0x48d   : > { %804 = vmatpush3.bf16.msra.mxu0 %v564_v29  ;;  %805 = vmatprep.mubr.msk.bf16.mxu0 %vm868_vm1, %v867_v15 }
 0x48f   : > { %v858_v31 = vpop.eup %857 }
 0x490   : > { %v561_v33 = vmul.f32 %v858_v31, %v850_v17 }
 0x492   : > { %v562_v34 = vpack.c.bf16 %v561_v33, %v560_v32 }
 0x494   : > { %806 = vmatmul.mubr.msk.bf16.vlgmr.msra.gmra.mxu0 %vm416_vm3, %v562_v34 }
 0x54c   : > { %v480_v36 = vpop.f32.mrf.mxu0 }
 0x54e   : > { %v795_v37 = vpop.f32.mrf.mxu0 }
 0x550   : > { %v483_v38 = vpop.f32.mrf.mxu0 }
 0x552   : > { %v796_v39 = vpop.f32.mrf.mxu0 }
 0x554   : > { %v603_v40 = vpop.f32.mrf.mxu0 }
 0x556   : > { %v807_v41 = vpop.f32.mrf.mxu0 }
 0x558   : > { %v606_v42 = vpop.f32.mrf.mxu0 }
 0x559   : > { %v831_v15 = vpack.i.bf16 %v606_v42, %v603_v40 }
 0x55a   : > { %v808_v43 = vpop.f32.mrf.mxu0 }
 0x55b   : > { %832 = vrot.lane.b32.xlu1 %v831_v15, %s874_s18 }
 0x5cd   : > { %v833_v44 = vpop.permute.xlu1 %832 }
 0x5ce   : > { %v835_v45 = vunpack.i.h.bf16 %v833_v44  ;;  %v834_v46 = vunpack.i.l.bf16 %v833_v44 }
 0x5d0   : > { %v619_v47 = vsel %vm366_vm2, %v483_v38, %v835_v45  ;;  %v618_v48 = vsel %vm366_vm2, %v480_v36, %v834_v46 }
 0x5d1   : > { %v620_v49 = vpack.c.bf16 %v619_v47, %v618_v48 }
 0x5d3   : > { %812 = vmatmul.mubr.msk.bf16.vlgmr.msra.gmra.mxu1 %vm416_vm3, %v620_v49 }
 0x693   : > { %v673_v51 = vpop.f32.mrf.mxu1 }
 0x694   : > { %v674_v52 = vadd.f32 %v757_v50, %v673_v51 }
 0x695   : > { %v813_v53 = vpop.f32.mrf.mxu1 }
 0x696   : > { %v680_v54 = vadd.f32 %v674_v52, %v926_v0 }
 0x697   : > { %v676_v55 = vpop.f32.mrf.mxu1 }
 0x698   : > { %682 = vst.msk [vmem:[%s251_s26] sm:$0xff] %vm255_vm0, %v680_v54  ;;  %v677_v56 = vadd.f32 %v757_v50, %v676_v55 }
 0x699   : > { %v814_v57 = vpop.f32.mrf.mxu1 }
 0x69a   : > { %v681_v58 = vadd.f32 %v677_v56, %v928_v1 }
 0x69c   : > { %683 = vst.msk [vmem:[%s251_s26 + $0x8] sm:$0xff] %vm255_vm0, %v681_v58 }
 0x69d PF: > { %s16_s21 = sadd.s32 1, %s865_s21  }
 0x69e   : > { %p13_p4 = scmp.ge.s32.totalorder %s16_s21, 4  }
 0x6a0   :  { %15 = sbr.rel (!%p13_p4) target bundleno = 1 (0x1), region = 74 }

// kernel: _lambda_.21
= control target key start
LH: loop header
LB: loop body
LE: loop exit
PB: predicated region body
PF: predicated region fallthrough
CT: control target
= control target key end

     0   :  { %vm47_vm0 = vcmask 261120   ;;  %s169_s0 = inlined_call_operand.vmem [shape: f32[32,32], index: 0, kind: input, shape index: {}]   ;;  %s170_s1 = inlined_call_operand.vmem [shape: f32[32,32], index: 1, kind: input, shape index: {}]   ;;  %s171_s2 = inlined_call_operand.hbm [shape: f32[1,1], index: 2, kind: output, shape index: {}]  }
   0x1   :  { %v12_v0 = vld [vmem:[%s169_s0] sm:$0xff]  ;;  %v14_v2 = vld [vmem:[%s169_s0 + $0x10] sm:$0xff]  ;;  %v13_v5 = vld [vmem:[%s169_s0 + $0x8] sm:$0xff] }
   0x2   :  { %v16_v1 = vld [vmem:[%s170_s1] sm:$0xff]  ;;  %v18_v4 = vld [vmem:[%s170_s1 + $0x10] sm:$0xff]  ;;  %v17_v6 = vld [vmem:[%s170_s1 + $0x8] sm:$0xff] }
   0x3   :  { %v20_v3 = vsub.f32 %v12_v0, %v16_v1  ;;  %v22_v7 = vsub.f32 %v14_v2, %v18_v4  ;;  %v21_v8 = vsub.f32 %v13_v5, %v17_v6  ;;  %v15_v9 = vld [vmem:[%s169_s0 + $0x18] sm:$0xff] }
   0x4   :  { %v19_v10 = vld [vmem:[%s170_s1 + $0x18] sm:$0xff] }
   0x5   :  { %7 = vsyncpa [#allocation3], 0  ;;  %v43_v11 = vmul.f32 %v20_v3, %v20_v3  ;;  %v23_v12 = vsub.f32 %v15_v9, %v19_v10  ;;  %v45_v13 = vmul.f32 %v22_v7, %v22_v7  ;;  %v44_v14 = vmul.f32 %v21_v8, %v21_v8  ;;  %s122_s0 = smov [#allocation2]  }
   0x6   :  { %s91_s1 = sshll.u32 %s122_s0, 4  ;;  %vm75_vm1 = vcmask 0   ;;  %s92_s1 = int_to_ptr.vmem [resolvable:$true] %s91_s1 }
   0x7   :  { %v48_v15 = vsel %vm47_vm0, %v43_v11, 0.0  ;;  %v46_v16 = vmul.f32 %v23_v12, %v23_v12  ;;  %v54_v17 = vsel %vm47_vm0, %v45_v13, 0.0  ;;  %v51_v18 = vsel %vm47_vm0, %v44_v14, 0.0  ;;  %s100_s25 = scalar_lea.vmem %s92_s1, 16  ;;  %s104_s26 = scalar_lea.vmem %s92_s1, 32 }
   0x8   :  { %49 = vadd.xlane.f32.xlu0 %v48_v15  ;;  %55 = vadd.xlane.f32.xlu1 %v54_v17  ;;  %p101_p0 = scmp.ne.s32.totalorder %s92_s1, %s100_s25  ;;  %p105_p1 = scmp.lt.s32.totalorder %s92_s1, %s92_s1 }
   0x9   :  { %v57_v19 = vsel %vm47_vm0, %v46_v16, 0.0  ;;  %p106_p2 = scmp.lt.s32.totalorder %s104_s26, %s100_s25 }
   0xb   :  { %p107_p3 = por %p106_p2, %p105_p1 }
   0xc   :  { %52 = vadd.xlane.f32.xlu0 %v51_v18  ;;  %58 = vadd.xlane.f32.xlu1 %v57_v19 }
   0xd   :  { %p108_p4 = pnand %p107_p3, %p101_p0 }
  0x91   :  { %v50_v20 = vpop.xlane.xlu0 %49  ;;  %v56_v21 = vpop.xlane.xlu1 %55 }
  0x95   :  { %v53_v22 = vpop.xlane.xlu0 %52  ;;  %v59_v24 = vpop.xlane.xlu1 %58 }
  0x96   :  { %v60_v23 = vadd.f32 %v53_v22, %v50_v20 }
  0x98   :  { %v61_v25 = vadd.f32 %v60_v23, %v56_v21 }
  0x9a   :  { %v62_v26 = vadd.f32 %v61_v25, %v59_v24 }
  0x9c   :  { %v63_v27 = vrot.slane %v62_v26, 4 }
  0x9e   :  { %v64_v28 = vadd.f32 %v63_v27, %v62_v26 }
  0xa0   :  { %v65_v29 = vrot.slane %v64_v28, 2 }
  0xa2   :  { %v66_v30 = vadd.f32 %v65_v29, %v64_v28 }
  0xa4   :  { %v67_v31 = vrot.slane %v66_v30, 1 }
  0xa6   :  { %v68_v32 = vadd.f32 %v67_v31, %v66_v30 }
  0xa8   :  { %v70_v33 = vmul.f32 0.0009765625, %v68_v32 }
  0xaa   :  { %76 = vst.msk [vmem:[#allocation2] sm:$0x1] %vm75_vm1, %v70_v33 }
  0xab   :  { %111 = shalt.err (!%p108_p4)
}
  0xac   :  { %94 = dma.vmem_to_hbm [thread:$0]  %s92_s1, 16, %s171_s2, [#allocation3]  }
  0xad   :  { %120 = dma.done.wait [#allocation3], 16  }
  0xae   :  { %121 = vsyncadd [#allocation3], 4294967280 }
  0xaf   :  { %98 = vsyncpa [#allocation3], 1 }

// kernel: _lambda_.17
= control target key start
LH: loop header
LB: loop body
LE: loop exit
PB: predicated region body
PF: predicated region fallthrough
CT: control target
= control target key end

     0   :  { %vm31_vm0 = vcmask 261120   ;;  %s607_s0 = inlined_call_operand.vmem [shape: f32[32,32], index: 0, kind: input, shape index: {}]   ;;  %s608_s3 = inlined_call_operand.vmem [shape: bf16[32,32], index: 3, kind: input, shape index: {}]   ;;  %s609_s1 = inlined_call_operand.vmem [shape: f32[1,32], index: 1, kind: input, shape index: {}]   ;;  %s610_s2 = inlined_call_operand.vmem [shape: f32[1,32], index: 2, kind: input, shape index: {}]   ;;  %s611_s5 = inlined_call_operand.vmem [shape: bf16[32,32], index: 5, kind: input, shape index: {}]   ;;  %s612_s4 = inlined_call_operand.vmem [shape: f32[1,32], index: 4, kind: input, shape index: {}]   ;;  %s613_s6 = inlined_call_operand.vmem [shape: f32[1,32], index: 6, kind: input, shape index: {}]   ;;  %s614_s7 = inlined_call_operand.vmem [shape: f32[32,32], index: 7, kind: output, shape index: {}]  }
   0x1   :  { %v494_v0 = vld [vmem:[%s607_s0] sm:$0xff]  ;;  %v499_v1 = vld [vmem:[%s607_s0 + $0x10] sm:$0xff]  ;;  %v504_v2 = vld [vmem:[%s607_s0 + $0x8] sm:$0xff] }
   0x2   :  { %v32_v3 = vsel %vm31_vm0, %v494_v0, 0.0  ;;  %v38_v4 = vsel %vm31_vm0, %v499_v1, 0.0  ;;  %v513_v5 = vld [vmem:[%s607_s0 + $0x18] sm:$0xff]  ;;  %v35_v6 = vsel %vm31_vm0, %v504_v2, 0.0  ;;  %v423_v28 = vld [vmem:[%s608_s3 + $0x8] sm:$0xff]   ;;  %v424_v29 = vld [vmem:[%s608_s3] sm:$0xff]  }
   0x3   :  { %33 = vadd.xlane.f32.xlu0 %v32_v3  ;;  %39 = vadd.xlane.f32.xlu1 %v38_v4  ;;  %v41_v7 = vsel %vm31_vm0, %v513_v5, 0.0  ;;  %v387_v44 = vld [vmem:[%s609_s1] ss:$0 sm:$0xff]  ;;  %v425_v62 = vld [vmem:[%s611_s5 + $0x8] sm:$0xff]  }
   0x4   :  { %407 = vmatprep.subr.bf16.mxu0 %v423_v28  ;;  %v388_v49 = vld [vmem:[%s610_s2] ss:$0 sm:$0xff]  ;;  %415 = vmatprep.subr.bf16.mxu1 %v425_v62 }
   0x5   :  { %408 = vmatpush3.bf16.msra.mxu0 %v423_v28  ;;  %416 = vmatpush3.bf16.msra.mxu1 %v425_v62  ;;  %v426_v63 = vld [vmem:[%s611_s5] sm:$0xff]  }
   0x6   :  { %409 = vmatprep.subr.bf16.mxu0 %v424_v29  ;;  %417 = vmatprep.subr.bf16.mxu1 %v426_v63  ;;  %v389_v3 = vld [vmem:[%s612_s4] ss:$0 sm:$0xff] }
   0x7   :  { %36 = vadd.xlane.f32.xlu0 %v35_v6  ;;  %42 = vadd.xlane.f32.xlu1 %v41_v7 }
   0x9   :  { %410 = vmatpush3.bf16.msra.mxu0 %v424_v29  ;;  %418 = vmatpush3.bf16.msra.mxu1 %v426_v63 }
  0x8c   :  { %v34_v8 = vpop.xlane.xlu0 %33  ;;  %v40_v9 = vpop.xlane.xlu1 %39 }
  0x8d   :  { %v45_v10 = vmul.f32 0.03125, %v34_v8  ;;  %v47_v11 = vmul.f32 0.03125, %v40_v9 }
  0x8f   :  { %v49_v12 = vsub.f32 %v494_v0, %v45_v10  ;;  %v51_v13 = vsub.f32 %v499_v1, %v47_v11 }
  0x90   :  { %v37_v14 = vpop.xlane.xlu0 %36  ;;  %v43_v15 = vpop.xlane.xlu1 %42 }
  0x91   :  { %v46_v16 = vmul.f32 0.03125, %v37_v14  ;;  %v48_v17 = vmul.f32 0.03125, %v43_v15  ;;  %v53_v18 = vmul.f32 %v49_v12, %v49_v12  ;;  %v55_v19 = vmul.f32 %v51_v13, %v51_v13 }
  0x93   :  { %v50_v20 = vsub.f32 %v504_v2, %v46_v16  ;;  %v52_v21 = vsub.f32 %v513_v5, %v48_v17  ;;  %v57_v22 = vsel %vm31_vm0, %v53_v18, 0.0  ;;  %v63_v23 = vsel %vm31_vm0, %v55_v19, 0.0 }
  0x94   :  { %58 = vadd.xlane.f32.xlu0 %v57_v22 }
  0x95   :  { %v54_v24 = vmul.f32 %v50_v20, %v50_v20  ;;  %v56_v25 = vmul.f32 %v52_v21, %v52_v21 }
  0x97   :  { %v60_v26 = vsel %vm31_vm0, %v54_v24, 0.0  ;;  %v66_v27 = vsel %vm31_vm0, %v56_v25, 0.0 }
  0x98   :  { %64 = vadd.xlane.f32.xlu0 %v63_v23  ;;  %61 = vadd.xlane.f32.xlu1 %v60_v26 }
  0x9c   :  { %67 = vadd.xlane.f32.xlu1 %v66_v27 }
 0x11d   :  { %v59_v30 = vpop.xlane.xlu0 %58 }
 0x11e   :  { %v69_v31 = vmul.f32 0.03125, %v59_v30 }
 0x120   :  { %v73_v32 = vadd.f32 1e-05, %v69_v31 }
 0x121   :  { %v62_v33 = vpop.xlane.xlu1 %61  ;;  %v65_v34 = vpop.xlane.xlu0 %64 }
 0x122   :  { %427 = vrsqrt.f32 %v73_v32  ;;  %v70_v35 = vmul.f32 0.03125, %v62_v33  ;;  %v71_v36 = vmul.f32 0.03125, %v65_v34 }
 0x124   :  { %v74_v37 = vadd.f32 1e-05, %v70_v35  ;;  %v75_v38 = vadd.f32 1e-05, %v71_v36 }
 0x125   :  { %v68_v39 = vpop.xlane.xlu1 %67 }
 0x126   :  { %429 = vrsqrt.f32 %v74_v37  ;;  %v72_v40 = vmul.f32 0.03125, %v68_v39 }
 0x127   :  { %431 = vrsqrt.f32 %v75_v38 }
 0x128   :  { %v76_v41 = vadd.f32 1e-05, %v72_v40 }
 0x12a   :  { %433 = vrsqrt.f32 %v76_v41 }
 0x12f   :  { %v428_v42 = vpop.eup %427 }
 0x130   :  { %v81_v43 = vmul.f32 %v428_v42, %v49_v12 }
 0x132   :  { %v92_v48 = vmul.f32 %v387_v44, %v81_v43 }
 0x133   :  { %v430_v45 = vpop.eup %429 }
 0x134   :  { %v432_v46 = vpop.eup %431  ;;  %v82_v47 = vmul.f32 %v430_v45, %v50_v20  ;;  %v103_v53 = vadd.f32 %v388_v49, %v92_v48 }
 0x135   :  { %v83_v50 = vmul.f32 %v432_v46, %v51_v13 }
 0x136   :  { %v93_v51 = vmul.f32 %v387_v44, %v82_v47 }
 0x137   :  { %v434_v52 = vpop.eup %433  ;;  %v94_v56 = vmul.f32 %v387_v44, %v83_v50 }
 0x138   :  { %v104_v54 = vadd.f32 %v388_v49, %v93_v51  ;;  %v84_v55 = vmul.f32 %v434_v52, %v52_v21 }
 0x139   :  { %v105_v59 = vadd.f32 %v388_v49, %v94_v56 }
 0x13a   :  { %v107_v57 = vpack.c.bf16 %v104_v54, %v103_v53  ;;  %v95_v58 = vmul.f32 %v387_v44, %v84_v55 }
 0x13c   :  { %411 = vmatprep.mubr.msk.bf16.mxu0 %vm31_vm0, %v107_v57  ;;  %v106_v60 = vadd.f32 %v388_v49, %v95_v58 }
 0x13e   :  { %v108_v61 = vpack.c.bf16 %v106_v60, %v105_v59 }
 0x140   :  { %412 = vmatmul.mubr.msk.bf16.vlgmr.msra.gmra.mxu0 %vm31_vm0, %v108_v61 }
 0x200   :  { %v413_v4 = vpop.f32.mrf.mxu0 }
 0x201   :  { %v550_v6 = vadd.f32 %v413_v4, %v389_v3 }
 0x202   :  { %v172_v7 = vpop.f32.mrf.mxu0 }
 0x203   :  { %v553_v8 = vmul.f32 0.70710677, %v550_v6  ;;  %v555_v9 = vadd.f32 %v389_v3, %v172_v7 }
 0x204   :  { %v414_v10 = vpop.f32.mrf.mxu0 }
 0x205   :  { %v193_v11 = vand.u32 2147483647, %v553_v8  ;;  %v559_v12 = vmul.f32 0.70710677, %v555_v9  ;;  %v561_v13 = vadd.f32 %v414_v10, %v389_v3  ;;  %vm273_vm2 = vcmp.lt.f32.partialorder %v553_v8, 0.0 }
 0x206   :  { %v175_v14 = vpop.f32.mrf.mxu0 }
 0x207   :  { %v197_v15 = vmul.f32 0.3275911, %v193_v11  ;;  %v191_v16 = vand.u32 2147483647, %v559_v12  ;;  %v565_v17 = vmul.f32 0.70710677, %v561_v13  ;;  %v567_v18 = vadd.f32 %v389_v3, %v175_v14 }
 0x208   :  { %v249_v29 = vmul.f32 %v193_v11, %v193_v11  ;;  %vm271_vm1 = vcmp.lt.f32.partialorder %v559_v12, 0.0  ;;  %v283_v12 = vmul.f32 0.5, %v555_v9 }
 0x209   :  { %v201_v19 = vadd.f32 1.0, %v197_v15  ;;  %v195_v20 = vmul.f32 0.3275911, %v191_v16  ;;  %v194_v21 = vand.u32 2147483647, %v565_v17  ;;  %v247_v30 = vmul.f32 %v191_v16, %v191_v16 }
 0x20a   :  { %v571_v22 = vmul.f32 0.70710677, %v567_v18  ;;  %v253_v31 = vsub.f32 0.0, %v249_v29  ;;  %vm274_vm3 = vcmp.lt.f32.partialorder %v565_v17, 0.0  ;;  %v285_v17 = vmul.f32 0.5, %v550_v6 }
 0x20b   :  { %435 = vrcp.f32 %v201_v19  ;;  %v199_v23 = vadd.f32 1.0, %v195_v20  ;;  %v198_v24 = vmul.f32 0.3275911, %v194_v21  ;;  %v250_v32 = vmul.f32 %v194_v21, %v194_v21 }
 0x20c   :  { %v192_v25 = vand.u32 2147483647, %v571_v22  ;;  %v251_v34 = vsub.f32 0.0, %v247_v30  ;;  %v259_v36 = vmul.f32 1.442695, %v253_v31  ;;  %vm272_vm4 = vcmp.lt.f32.partialorder %v571_v22, 0.0 }
 0x20d   :  { %437 = vrcp.f32 %v199_v23  ;;  %v202_v26 = vadd.f32 1.0, %v198_v24  ;;  %v254_v38 = vsub.f32 0.0, %v250_v32 }
 0x20e   :  { %v196_v27 = vmul.f32 0.3275911, %v192_v25  ;;  %v248_v37 = vmul.f32 %v192_v25, %v192_v25  ;;  %v255_v41 = vmul.f32 1.442695, %v251_v34 }
 0x20f   :  { %439 = vrcp.f32 %v202_v26  ;;  %v261_v47 = vmul.f32 1.442695, %v254_v38 }
 0x210   :  { %v200_v28 = vadd.f32 1.0, %v196_v27  ;;  %v252_v45 = vsub.f32 0.0, %v248_v37 }
 0x212   :  { %441 = vrcp.f32 %v200_v28  ;;  %v257_v54 = vmul.f32 1.442695, %v252_v45 }
 0x213   :  { %443 = vpow2.f32 %v259_v36 }
 0x214   :  { %445 = vpow2.f32 %v255_v41 }
 0x215   :  { %447 = vpow2.f32 %v261_v47 }
 0x216   :  { %449 = vpow2.f32 %v257_v54 }
 0x218   :  { %v436_v33 = vpop.eup %435 }
 0x219   :  { %v213_v35 = vmul.f32 1.0614054, %v436_v33 }
 0x21a   :  { %v438_v39 = vpop.eup %437 }
 0x21b   :  { %v217_v40 = vadd.f32 -1.4531521, %v213_v35  ;;  %v211_v42 = vmul.f32 1.0614054, %v438_v39 }
 0x21c   :  { %v440_v43 = vpop.eup %439 }
 0x21d   :  { %v221_v44 = vmul.f32 %v436_v33, %v217_v40  ;;  %v214_v46 = vmul.f32 1.0614054, %v440_v43  ;;  %v215_v48 = vadd.f32 -1.4531521, %v211_v42 }
 0x21f   :  { %v225_v49 = vadd.f32 1.4214138, %v221_v44  ;;  %v442_v50 = vpop.eup %441  ;;  %v218_v51 = vadd.f32 -1.4531521, %v214_v46  ;;  %v219_v52 = vmul.f32 %v438_v39, %v215_v48 }
 0x220   :  { %v212_v55 = vmul.f32 1.0614054, %v442_v50  ;;  %v444_v19 = vpop.eup %443 }
 0x221   :  { %v229_v53 = vmul.f32 %v436_v33, %v225_v49  ;;  %v222_v56 = vmul.f32 %v440_v43, %v218_v51  ;;  %v223_v57 = vadd.f32 1.4214138, %v219_v52  ;;  %v446_v27 = vpop.eup %445  ;;  %v286_v51 = vmul.f32 0.5, %v561_v13  ;;  %v394_v13 = vld [vmem:[%s613_s6] ss:$0 sm:$0xff] }
 0x222   :  { %v216_v59 = vadd.f32 -1.4531521, %v212_v55  ;;  %v448_v32 = vpop.eup %447 }
 0x223   :  { %v233_v58 = vadd.f32 -0.28449672, %v229_v53  ;;  %v226_v60 = vadd.f32 1.4214138, %v222_v56  ;;  %v227_v61 = vmul.f32 %v438_v39, %v223_v57  ;;  %v450_v38 = vpop.eup %449  ;;  %v284_v53 = vmul.f32 0.5, %v567_v18 }
 0x224   :  { %v220_v63 = vmul.f32 %v442_v50, %v216_v59 }
 0x225   :  { %v237_v62 = vmul.f32 %v436_v33, %v233_v58  ;;  %v230_v3 = vmul.f32 %v440_v43, %v226_v60  ;;  %v231_v4 = vadd.f32 -0.28449672, %v227_v61 }
 0x226   :  { %v224_v10 = vadd.f32 1.4214138, %v220_v63 }
 0x227   :  { %v241_v7 = vadd.f32 0.2548296, %v237_v62  ;;  %v234_v11 = vadd.f32 -0.28449672, %v230_v3  ;;  %v235_v14 = vmul.f32 %v438_v39, %v231_v4 }
 0x228   :  { %v228_v16 = vmul.f32 %v442_v50, %v224_v10 }
 0x229   :  { %v245_v15 = vmul.f32 %v436_v33, %v241_v7  ;;  %v238_v20 = vmul.f32 %v440_v43, %v234_v11  ;;  %v239_v21 = vadd.f32 0.2548296, %v235_v14 }
 0x22a   :  { %v232_v24 = vadd.f32 -0.28449672, %v228_v16 }
 0x22b   :  { %v265_v23 = vmul.f32 %v444_v19, %v245_v15  ;;  %v242_v25 = vadd.f32 0.2548296, %v238_v20  ;;  %v243_v26 = vmul.f32 %v438_v39, %v239_v21 }
 0x22c   :  { %v236_v28 = vmul.f32 %v442_v50, %v232_v24 }
 0x22d   :  { %v269_v29 = vsub.f32 1.0, %v265_v23  ;;  %v246_v30 = vmul.f32 %v440_v43, %v242_v25  ;;  %v263_v31 = vmul.f32 %v446_v27, %v243_v26 }
 0x22e   :  { %v240_v34 = vadd.f32 0.2548296, %v236_v28 }
 0x22f   :  { %v266_v35 = vmul.f32 %v448_v32, %v246_v30  ;;  %v267_v36 = vsub.f32 1.0, %v263_v31  ;;  %v277_v33 = vsub.f32 0.0, %v269_v29 }
 0x230   :  { %v244_v37 = vmul.f32 %v442_v50, %v240_v34 }
 0x231   :  { %v270_v40 = vsub.f32 1.0, %v266_v35  ;;  %v275_v41 = vsub.f32 0.0, %v267_v36  ;;  %v281_v45 = vsel %vm273_vm2, %v277_v33, %v269_v29 }
 0x232   :  { %v264_v42 = vmul.f32 %v450_v38, %v244_v37  ;;  %v289_v50 = vadd.f32 1.0, %v281_v45 }
 0x233   :  { %v278_v44 = vsub.f32 0.0, %v270_v40  ;;  %v279_v43 = vsel %vm271_vm1, %v275_v41, %v267_v36 }
 0x234   :  { %v268_v39 = vsub.f32 1.0, %v264_v42  ;;  %v287_v49 = vadd.f32 1.0, %v279_v43  ;;  %v293_v57 = vmul.f32 %v289_v50, %v285_v17 }
 0x235   :  { %v282_v46 = vsel %vm274_vm3, %v278_v44, %v270_v40 }
 0x236   :  { %v290_v47 = vadd.f32 1.0, %v282_v46  ;;  %v276_v48 = vsub.f32 0.0, %v268_v39  ;;  %v291_v55 = vmul.f32 %v287_v49, %v283_v12 }
 0x238   :  { %v280_v52 = vsel %vm272_vm4, %v276_v48, %v268_v39  ;;  %v294_v54 = vmul.f32 %v290_v47, %v286_v51 }
 0x239   :  { %v288_v8 = vadd.f32 1.0, %v280_v52 }
 0x23a   :  { %v296_v59 = vpack.c.bf16 %v294_v54, %v293_v57 }
 0x23b   :  { %v292_v56 = vmul.f32 %v288_v8, %v284_v53 }
 0x23d   :  { %v295_v58 = vpack.c.bf16 %v292_v56, %v291_v55 }
 0x23f   :  { %419 = vmatprep.mubr.msk.bf16.mxu1 %vm31_vm0, %v295_v58 }
 0x240   :  { %420 = vmatmul.mubr.msk.bf16.vlgmr.msra.gmra.mxu1 %vm31_vm0, %v296_v59 }
 0x300   :  { %v421_v9 = vpop.f32.mrf.mxu1 }
 0x301   :  { %v369_v22 = vadd.f32 %v421_v9, %v394_v13 }
 0x302   :  { %v360_v18 = vpop.f32.mrf.mxu1 }
 0x303   :  { %v377_v60 = vadd.f32 %v369_v22, %v499_v1  ;;  %v361_v6 = vadd.f32 %v394_v13, %v360_v18 }
 0x304   :  { %v422_v61 = vpop.f32.mrf.mxu1 }
 0x305   :  { %381 = vst.msk [vmem:[%s614_s7 + $0x10] sm:$0xff] %vm31_vm0, %v377_v60  ;;  %v375_v62 = vadd.f32 %v361_v6, %v494_v0  ;;  %v372_v63 = vadd.f32 %v422_v61, %v394_v13 }
 0x306   :  { %v363_v3 = vpop.f32.mrf.mxu1 }
 0x307   :  { %379 = vst.msk [vmem:[%s614_s7] sm:$0xff] %vm31_vm0, %v375_v62  ;;  %v378_v4 = vadd.f32 %v372_v63, %v513_v5  ;;  %v364_v7 = vadd.f32 %v394_v13, %v363_v3 }
 0x309   :  { %382 = vst.msk [vmem:[%s614_s7 + $0x18] sm:$0xff] %vm31_vm0, %v378_v4  ;;  %v376_v1 = vadd.f32 %v364_v7, %v504_v2 }
 0x30b   :  { %380 = vst.msk [vmem:[%s614_s7 + $0x8] sm:$0xff] %vm31_vm0, %v376_v1 }

// kernel: _lambda_.20
= control target key start
LH: loop header
LB: loop body
LE: loop exit
PB: predicated region body
PF: predicated region fallthrough
CT: control target
= control target key end

     0   :  { %s402_s9 = smov 0   ;;  %s438_s0 = inlined_call_operand.vmem [shape: f32[2,16,32], index: 0, kind: input, shape index: {}]   ;;  %s439_s1 = inlined_call_operand.vmem [shape: f32[8,32], index: 1, kind: input, shape index: {}]   ;;  %s440_s2 = inlined_call_operand.vmem [shape: f32[2,16,32], index: 2, kind: output, shape index: {}]  }
   0x1 LB: > { %s328_s10 = sadd.s32 4294967295, %s383_s9   ;;  %p332_p0 = scmp.ge.s32.totalorder %s383_s9, 1  ;;  %s383_s9 = sphi %s402_s9, %s12_s9  }
   0x2   : > { %p112_p1 = scmp.lt.s32.totalorder %s383_s9, 3 }
   0x4   : > { %p113_p2 = pnand %p332_p0, %p112_p1 }
   0x5   : > { %p134_p3 = scmp.lt.s32.totalorder (!%p113_p2), %s328_s10, 1 }
   0x6   : > { %116 = sbr.rel (%p113_p2) target bundleno = 734 (0x2de), region = 28 }
   0xb   : > { %v148_v0 = vld [vmem:[%s439_s1] sm:$0xff]  ;;  %vm150_vm0 = vcmask 261120   ;;  %v385_v1 = vmov 0.0   ;;  %vm386_vm1 = vmmov 0   ;;  %s442_s10 = smov (!%p134_p3, %s328_s10), 1  ;;  %vm200_vm2 = vcmask 64512  }
   0xc   : > { %347 = vmatprep.subr.bf16.mxu0 %v385_v1  ;;  %v149_v2 = vpack.c.bf16 %v148_v0, %v148_v0  ;;  %349 = vmatprep.mubr.msk.bf16.mxu0 %vm386_vm1, %v385_v1  ;;  %s341_s13 = sshll.u32 %s442_s10, 4  ;;  %vm227_vm3 = vcmask 1043456  }
   0xd   : > { %353 = vmatprep.subr.bf16.mxu1 %v385_v1  ;;  %355 = vmatprep.mubr.msk.bf16.mxu1 %vm386_vm1, %v385_v1  ;;  %s138_s16 = scalar_lea.vmem %s438_s0, %s341_s13  ;;  %s143_s19 = scalar_lea.vmem %s440_s2, %s341_s13 }
   0xe   : > { %v155_v3 = vsel %vm150_vm0, %v149_v2, 0  ;;  %v145_v4 = vld [vmem:[%s138_s16] sm:$0xff]  ;;  %v146_v5 = vld [vmem:[%s138_s16 + $0x8] sm:$0xff]  ;;  %v228_v25 = vsel %vm227_vm3, %v149_v2, 0 }
   0xf   : > { %348 = vmatpush3.bf16.xpose.msra.mxu0 %v155_v3  ;;  %v147_v6 = vpack.c.bf16 %v146_v5, %v145_v4  ;;  %354 = vmatpush3.bf16.msra.mxu1 %v228_v25 }
  0x16   : > { %350 = vmatmul.mubr.msk.bf16.vlgmr.msra.gmra.mxu0 %vm150_vm0, %v147_v6 }
  0xd6   : > { %v191_v7 = vpop.f32.mrf.mxu0 }
  0xd7   : > { %v198_v8 = vmul.f32 0.17677669, %v191_v7 }
  0xd8   : > { %v351_v9 = vpop.f32.mrf.mxu0 }
  0xd9   : > { %v201_v10 = vsel %vm200_vm2, %v198_v8, -inf }
  0xda   : > { %202 = vmax.xlane.f32.xlu0 %v201_v10  ;;  %v194_v11 = vpop.f32.mrf.mxu0 }
  0xdb   : > { %v199_v12 = vmul.f32 0.17677669, %v194_v11 }
  0xdc   : > { %v352_v13 = vpop.f32.mrf.mxu0 }
  0xdd   : > { %v204_v14 = vsel %vm200_vm2, %v199_v12, -inf }
  0xde   : > { %205 = vmax.xlane.f32.xlu0 %v204_v14 }
 0x163   : > { %v203_v15 = vpop.xlane.xlu0 %202 }
 0x164   : > { %v207_v16 = vsub.f32 %v198_v8, %v203_v15 }
 0x166   : > { %v209_v17 = vmul.f32 1.442695, %v207_v16 }
 0x167   : > { %v206_v18 = vpop.xlane.xlu0 %205 }
 0x168   : > { %369 = vpow2.f32 %v209_v17  ;;  %v208_v19 = vsub.f32 %v199_v12, %v206_v18 }
 0x16a   : > { %v211_v20 = vmul.f32 1.442695, %v208_v19 }
 0x16c   : > { %371 = vpow2.f32 %v211_v20 }
 0x175   : > { %v370_v21 = vpop.eup %369 }
 0x176   : > { %v213_v22 = vsel %vm200_vm2, %v370_v21, 0.0 }
 0x177   : > { %214 = vadd.xlane.f32.xlu1 %v213_v22 }
 0x179   : > { %v372_v23 = vpop.eup %371 }
 0x17a   : > { %v216_v24 = vsel %vm200_vm2, %v372_v23, 0.0 }
 0x17b   : > { %217 = vadd.xlane.f32.xlu1 %v216_v24 }
 0x200   : > { %v215_v26 = vpop.xlane.xlu1 %214 }
 0x201   : > { %373 = vrcp.f32 %v215_v26 }
 0x204   : > { %v218_v27 = vpop.xlane.xlu1 %217 }
 0x205   : > { %375 = vrcp.f32 %v218_v27 }
 0x20e   : > { %v374_v28 = vpop.eup %373 }
 0x20f   : > { %v221_v30 = vmul.f32 %v374_v28, %v370_v21 }
 0x212   : > { %v376_v29 = vpop.eup %375 }
 0x213   : > { %v222_v31 = vmul.f32 %v376_v29, %v372_v23 }
 0x215   : > { %v223_v32 = vpack.c.bf16 %v222_v31, %v221_v30 }
 0x217   : > { %356 = vmatmul.mubr.msk.bf16.vlgmr.msra.gmra.mxu1 %vm200_vm2, %v223_v32 }
 0x2d7   : > { %v264_v33 = vpop.f32.mrf.mxu1 }
 0x2d8   : > { %271 = vst.msk [vmem:[%s143_s19] sm:$0xff] %vm150_vm0, %v264_v33 }
 0x2d9   : > { %v357_v34 = vpop.f32.mrf.mxu1 }
 0x2db   : > { %v267_v35 = vpop.f32.mrf.mxu1 }
 0x2dc   : > { %272 = vst.msk [vmem:[%s143_s19 + $0x8] sm:$0xff] %vm150_vm0, %v267_v35 }
 0x2dd   : > { %v358_v36 = vpop.f32.mrf.mxu1 }
 0x2de PF: > { %s12_s9 = sadd.s32 1, %s383_s9  }
 0x2df   : > { %p9_p4 = scmp.ge.s32.totalorder %s12_s9, 4  }
 0x2e1   :  { %11 = sbr.rel (!%p9_p4) target bundleno = 1 (0x1), region = 58 }

// kernel: _lambda_.24
= control target key start
LH: loop header
LB: loop body
LE: loop exit
PB: predicated region body
PF: predicated region fallthrough
CT: control target
= control target key end

     0   :  { %vm52_vm0 = vcmask 261120   ;;  %vm108_vm1 = vcmask 31744   ;;  %s187_s1 = inlined_call_operand.vmem [shape: bf16[32,4], index: 1, kind: input, shape index: {}]   ;;  %s188_s0 = inlined_call_operand.vmem [shape: bf16[32,32], index: 0, kind: input, shape index: {}]   ;;  %s189_s2 = inlined_call_operand.vmem [shape: f32[1,4], index: 2, kind: input, shape index: {}]   ;;  %s190_s3 = inlined_call_operand.vmem [shape: f32[32,4], index: 3, kind: output, shape index: {}]  }
   0x1   :  { %v136_v0 = vld [vmem:[%s187_s1 + $0x8] sm:$0xff]   ;;  %v137_v1 = vld [vmem:[%s187_s1] sm:$0xff]  }
   0x2   :  { %128 = vmatprep.subr.bf16.mxu0 %v136_v0  ;;  %v138_v2 = vld [vmem:[%s188_s0] sm:$0xff]   ;;  %v139_v3 = vld [vmem:[%s188_s0 + $0x8] sm:$0xff]  }
   0x3   :  { %129 = vmatpush3.bf16.msra.mxu0 %v136_v0  ;;  %132 = vmatprep.mubr.msk.bf16.mxu0 %vm52_vm0, %v138_v2  ;;  %v117_v4 = vld [vmem:[%s189_s2] ss:$0 sm:$0xff] }
   0x4   :  { %130 = vmatprep.subr.bf16.mxu0 %v137_v1 }
   0x7   :  { %131 = vmatpush3.bf16.msra.mxu0 %v137_v1 }
   0xa   :  { %133 = vmatmul.mubr.msk.bf16.vlgmr.msra.gmra.mxu0 %vm52_vm0, %v139_v3 }
  0xca   :  { %v134_v5 = vpop.f32.mrf.mxu0 }
  0xcb   :  { %v102_v6 = vadd.f32 %v134_v5, %v117_v4 }
  0xcc   :  { %v93_v7 = vpop.f32.mrf.mxu0 }
  0xcd   :  { %111 = vst.msk [vmem:[%s190_s3 + $0x10] sm:$0xff] %vm108_vm1, %v102_v6  ;;  %v94_v8 = vadd.f32 %v117_v4, %v93_v7 }
  0xce   :  { %v135_v9 = vpop.f32.mrf.mxu0 }
  0xcf   :  { %109 = vst.msk [vmem:[%s190_s3] sm:$0xff] %vm108_vm1, %v94_v8  ;;  %v105_v10 = vadd.f32 %v135_v9, %v117_v4 }
  0xd0   :  { %v96_v11 = vpop.f32.mrf.mxu0 }
  0xd1   :  { %112 = vst.msk [vmem:[%s190_s3 + $0x18] sm:$0xff] %vm108_vm1, %v105_v10  ;;  %v97_v12 = vadd.f32 %v117_v4, %v96_v11 }
  0xd3   :  { %110 = vst.msk [vmem:[%s190_s3 + $0x8] sm:$0xff] %vm108_vm1, %v97_v12 }

// kernel: _lambda_.22
= control target key start
LH: loop header
LB: loop body
LE: loop exit
PB: predicated region body
PF: predicated region fallthrough
CT: control target
= control target key end

     0   :  { %v949_v0 = vmov 1   ;;  %v950_v6 = vmov 2   ;;  %v951_v17 = vmov 0   ;;  %s952_s30 = smov 96   ;;  %vm563_vm0 = vcmask 1040384   ;;  %s954_s14 = smov 64   ;;  %s1354_s1 = inlined_call_operand.vmem [shape: f32[128,3], index: 1, kind: input, shape index: {}]   ;;  %s1355_s0 = inlined_call_operand.vmem [shape: f32[128,96], index: 0, kind: input, shape index: {}]   ;;  %s1356_s3 = inlined_call_operand.vmem [shape: bf16[32,32], index: 3, kind: input, shape index: {}]   ;;  %s1357_s4 = inlined_call_operand.vmem [shape: bf16[3,32], index: 4, kind: input, shape index: {}]   ;;  %s1358_s2 = inlined_call_operand.vmem [shape: bf16[128,3], index: 2, kind: input, shape index: {}]   ;;  %s1359_s5 = inlined_call_operand.vmem [shape: f32[128,32], index: 5, kind: output, shape index: {}]  }
   0x1   :  { %927 = vset.pattern.permute.xlu1 %v949_v0  ;;  %926 = vset.pattern.permute.xlu0 %v949_v0  ;;  %v988_v1 = vld [vmem:[%s1354_s1 + $0x10] sm:$0xff]  ;;  %v993_v2 = vld [vmem:[%s1354_s1] sm:$0xff]  ;;  %v40_v3 = vld [vmem:[%s1354_s1 + $0x18] sm:$0xff]  ;;  %vm564_vm1 = vcmask 1041408   ;;  %v953_v35 = vmov 65535   ;;  %vm538_vm2 = vcmask 23552  }
   0x2   :  { %158 = vperm.xlu1 %927, %v988_v1   ;;  %150 = vperm.xlu0 %926, %v993_v2   ;;  %v38_v4 = vld [vmem:[%s1354_s1 + $0x8] sm:$0xff]  ;;  %v41_v9 = vld [vmem:[%s1354_s1 + $0x20] sm:$0xff]  ;;  %v43_v10 = vld [vmem:[%s1354_s1 + $0x30] sm:$0xff]  ;;  %v565_v36 = vsel %vm563_vm0, 4294967295, %v953_v35  ;;  %vm679_vm3 = vcmask 261120  }
   0x3   :  { %v42_v5 = vld [vmem:[%s1354_s1 + $0x28] sm:$0xff]  ;;  %v44_v11 = vld [vmem:[%s1354_s1 + $0x38] sm:$0xff]  ;;  %v45_v12 = vld [vmem:[%s1354_s1 + $0x40] sm:$0xff]  ;;  %v566_v39 = vsel %vm564_vm1, %v565_v36, 0 }
   0x4   :  { %v46_v7 = vld [vmem:[%s1354_s1 + $0x48] sm:$0xff]  ;;  %v48_v13 = vld [vmem:[%s1354_s1 + $0x58] sm:$0xff]  ;;  %v47_v14 = vld [vmem:[%s1354_s1 + $0x50] sm:$0xff] }
   0x5   :  { %v1014_v8 = vld [vmem:[%s1354_s1 + $0x68] sm:$0xff]  ;;  %v1041_v15 = vld [vmem:[%s1354_s1 + $0x60] sm:$0xff]  ;;  %v1047_v16 = vld [vmem:[%s1354_s1 + $0x78] sm:$0xff] }
   0x6   :  { %162 = vperm.xlu1 %927, %v40_v3   ;;  %154 = vperm.xlu0 %926, %v38_v4   ;;  %v1055_v18 = vld [vmem:[%s1354_s1 + $0x70] sm:$0xff]  ;;  %v1067_v19 = vld [vmem:[%s1355_s0] sm:$0xff]  ;;  %v1078_v24 = vld [vmem:[%s1355_s0 + $0x8] sm:$0xff] }
   0x7   :  { %v1072_v22 = vld [vmem:[%s1355_s0 + $0x10] sm:$0xff]  ;;  %v1086_v29 = vld [vmem:[%s1355_s0 + $0x18] sm:$0xff]  ;;  %v939_v33 = vld [vmem:[%s1356_s3 + $0x8] sm:$0xff]  }
   0x8   :  { %900 = vmatprep.subr.bf16.mxu1 %v939_v33  ;;  %v497_v38 = vld [vmem:[%s1357_s4] sm:$0x3]  ;;  %v942_v45 = vld [vmem:[%s1358_s2 + $0x8] sm:$0xff]   ;;  %v1136_v58 = vld [vmem:[%s1355_s0 + $0x30] sm:$0xff] }
   0x9   :  { %901 = vmatpush3.bf16.msra.mxu1 %v939_v33  ;;  %v568_v41 = vand.u32 %v566_v39, %v497_v38  ;;  %v940_v42 = vld [vmem:[%s1356_s3] sm:$0xff]   ;;  %v1122_v53 = vld [vmem:[%s1355_s0 + $0x28] sm:$0xff]  ;;  %v1141_v59 = vld [vmem:[%s1355_s0 + $0x38] sm:$0xff] }
   0xa   :  { %928 = vset.pattern.permute.xlu1 %v950_v6  ;;  %170 = vperm.xlu0 %926, %v42_v5   ;;  %v941_v44 = vld [vmem:[%s1358_s2] sm:$0xff]   ;;  %v943_v61 = vld [vmem:[%s1358_s2 + $0x10] sm:$0xff]   ;;  %v944_v63 = vld [vmem:[%s1358_s2 + $0x18] sm:$0xff]  }
   0xb   :  { %314 = vperm.xlu1 %928, %v38_v4   ;;  %882 = vmatprep.subr.bf16.mxu0 %v568_v41  ;;  %v1127_v54 = vld [vmem:[%s1355_s0 + $0x20] sm:$0xff]  ;;  %v1214_v36 = vld [vmem:[%s1355_s0 + $0x68] sm:$0xff]  ;;  %v1228_v38 = vld [vmem:[%s1355_s0 + $0x70] sm:$0xff] }
   0xc   :  { %902 = vmatprep.subr.bf16.mxu1 %v940_v42  ;;  %883 = vmatpush3.bf16.msra.mxu0 %v568_v41  ;;  %v1236_v41 = vld [vmem:[%s1355_s0 + $0x78] sm:$0xff] }
   0xd   :  { %903 = vmatpush3.bf16.msra.mxu1 %v940_v42  ;;  %884 = vmatprep.mubr.msk.bf16.mxu0 %vm538_vm2, %v941_v44 }
   0xe   :  { %186 = vperm.xlu0 %926, %v46_v7  }
   0xf   :  { %318 = vperm.xlu1 %928, %v988_v1   ;;  %885 = vmatmul.mubr.msk.bf16.vlgmr.msra.gmra.mxu0 %vm538_vm2, %v942_v45 }
  0x10   :  { %888 = vmatprep.mubr.msk.bf16.mxu0 %vm538_vm2, %v943_v61 }
  0x12   :  { %202 = vperm.xlu0 %926, %v1014_v8  }
  0x13   :  { %929 = vset.pattern.permute.xlu1 %v949_v0 }
  0x14   :  { %166 = vperm.xlu1 %929, %v41_v9  }
  0x16   :  { %934 = vset.pattern.permute.xlu0 %v950_v6 }
  0x17   :  { %310 = vperm.xlu0 %934, %v993_v2   ;;  %889 = vmatmul.mubr.msk.bf16.gmra.mxu0 %vm538_vm2, %v944_v63 }
  0x18   :  { %174 = vperm.xlu1 %929, %v43_v10  }
  0x1b   :  { %322 = vperm.xlu0 %934, %v40_v3  }
  0x1c   :  { %178 = vperm.xlu1 %929, %v44_v11  }
  0x1f   :  { %326 = vperm.xlu0 %934, %v41_v9  }
  0x20   :  { %930 = vset.pattern.permute.xlu1 %v950_v6 }
  0x21   :  { %330 = vperm.xlu1 %930, %v42_v5  }
  0x23   :  { %338 = vperm.xlu0 %934, %v44_v11  }
  0x25   :  { %334 = vperm.xlu1 %930, %v43_v10  }
  0x27   :  { %342 = vperm.xlu0 %934, %v45_v12  }
  0x29   :  { %931 = vset.pattern.permute.xlu1 %v949_v0 }
  0x2a   :  { %182 = vperm.xlu1 %931, %v45_v12  }
  0x2b   :  { %354 = vperm.xlu0 %934, %v48_v13  }
  0x2e   :  { %190 = vperm.xlu1 %931, %v47_v14  }
  0x2f   :  { %358 = vperm.xlu0 %934, %v1041_v15  }
  0x32   :  { %194 = vperm.xlu1 %931, %v48_v13  }
  0x33   :  { %370 = vperm.xlu0 %934, %v1047_v16  }
  0x36   :  { %932 = vset.pattern.permute.xlu1 %v950_v6 }
  0x37   :  { %346 = vperm.xlu1 %932, %v46_v7   ;;  %937 = vset.pattern.permute.xlu0 %v951_v17 }
  0x38   :  { %60 = vperm.xlu0 %937, %v38_v4  }
  0x3b   :  { %350 = vperm.xlu1 %932, %v47_v14  }
  0x3c   :  { %75 = vperm.xlu0 %937, %v41_v9  }
  0x3f   :  { %933 = vset.pattern.permute.xlu1 %v949_v0 }
  0x40   :  { %198 = vperm.xlu1 %933, %v1041_v15   ;;  %85 = vperm.xlu0 %937, %v43_v10  }
  0x44   :  { %206 = vperm.xlu1 %933, %v1055_v18   ;;  %95 = vperm.xlu0 %937, %v45_v12   ;;  %v1171_v12 = vld [vmem:[%s1355_s0 + $0x40] sm:$0xff] }
  0x48   :  { %210 = vperm.xlu1 %933, %v1047_v16   ;;  %105 = vperm.xlu0 %937, %v47_v14  }
  0x4c   :  { %935 = vset.pattern.permute.xlu1 %v950_v6 }
  0x4d   :  { %362 = vperm.xlu1 %935, %v1014_v8  }
  0x51   :  { %366 = vperm.xlu1 %935, %v1055_v18  }
  0x55   :  { %936 = vset.pattern.permute.xlu1 %v951_v17 }
  0x56   :  { %55 = vperm.xlu1 %936, %v993_v2  }
  0x5a   :  { %65 = vperm.xlu1 %936, %v988_v1  }
  0x5e   :  { %70 = vperm.xlu1 %936, %v40_v3  }
  0x62   :  { %80 = vperm.xlu1 %936, %v42_v5  }
  0x66   :  { %90 = vperm.xlu1 %936, %v44_v11   ;;  %v1166_v11 = vld [vmem:[%s1355_s0 + $0x48] sm:$0xff] }
  0x6a   :  { %100 = vperm.xlu1 %936, %v46_v7  }
  0x6e   :  { %110 = vperm.xlu1 %936, %v48_v13  }
  0x7d   :  { %v151_v20 = vpop.permute.xlu0 %150  ;;  %v159_v21 = vpop.permute.xlu1 %158 }
  0x7e   :  { %v213_v23 = vmul.f32 %v151_v20, %v1067_v19  ;;  %v215_v25 = vmul.f32 %v159_v21, %v1072_v22  ;;  %v1183_v21 = vld [vmem:[%s1355_s0 + $0x50] sm:$0xff] }
  0x80   :  { %245 = vrot.lane.b32.xlu0 %v213_v23, %s952_s30  ;;  %v1190_v23 = vld [vmem:[%s1355_s0 + $0x58] sm:$0xff] }
  0x81   :  { %v155_v26 = vpop.permute.xlu0 %154  ;;  %v163_v27 = vpop.permute.xlu1 %162 }
  0x82   :  { %v214_v28 = vmul.f32 %v155_v26, %v1078_v24  ;;  %v216_v31 = vmul.f32 %v163_v27, %v1086_v29 }
  0x84   :  { %247 = vrot.lane.b32.xlu1 %v214_v28, %s952_s30  ;;  %249 = vrot.lane.b32.xlu0 %v215_v25, %s952_s30 }
  0x85   :  { %v171_v30 = vpop.permute.xlu0 %170 }
  0x86   :  { %v315_v32 = vpop.permute.xlu1 %314  ;;  %v218_v56 = vmul.f32 %v171_v30, %v1122_v53 }
  0x87   :  { %v374_v34 = vmul.f32 %v315_v32, %v1078_v24 }
  0x88   :  { %251 = vrot.lane.b32.xlu1 %v216_v31, %s952_s30 }
  0x89   :  { %v1096_v37 = vpop.permute.xlu0 %186 }
  0x8a   :  { %v319_v40 = vpop.permute.xlu1 %318  ;;  %v222_v17 = vmul.f32 %v1096_v37, %v1166_v11  ;;  %v1219_v37 = vld [vmem:[%s1355_s0 + $0x60] sm:$0xff] }
  0x8b   :  { %v375_v51 = vmul.f32 %v319_v40, %v1072_v22 }
  0x8c   :  { %407 = vrot.lane.b32.xlu1 %v374_v34, %s954_s14  ;;  %v945_v34 = vld [vmem:[%s1358_s2 + $0x20] sm:$0xff]  }
  0x8d   :  { %v1105_v43 = vpop.permute.xlu0 %202  ;;  %892 = vmatprep.mubr.msk.bf16.mxu0 %vm538_vm2, %v945_v34 }
  0x8e   :  { %v226_v39 = vmul.f32 %v1105_v43, %v1214_v36  ;;  %v947_v43 = vld [vmem:[%s1358_s2 + $0x30] sm:$0xff]  }
  0x8f   :  { %v167_v46 = vpop.permute.xlu1 %166 }
  0x90   :  { %v217_v57 = vmul.f32 %v167_v46, %v1127_v54 }
  0x92   :  { %v311_v47 = vpop.permute.xlu0 %310 }
  0x93   :  { %v373_v48 = vmul.f32 %v311_v47, %v1067_v19  ;;  %v175_v49 = vpop.permute.xlu1 %174 }
  0x94   :  { %v219_v0 = vmul.f32 %v175_v49, %v1136_v58 }
  0x95   :  { %405 = vrot.lane.b32.xlu0 %v373_v48, %s954_s14  ;;  %v948_v48 = vld [vmem:[%s1358_s2 + $0x38] sm:$0xff]  }
  0x96   :  { %v323_v50 = vpop.permute.xlu0 %322 }
  0x97   :  { %v376_v52 = vmul.f32 %v323_v50, %v1086_v29  ;;  %v179_v55 = vpop.permute.xlu1 %178 }
  0x98   :  { %v220_v1 = vmul.f32 %v179_v55, %v1141_v59 }
  0x99   :  { %411 = vrot.lane.b32.xlu1 %v376_v52, %s954_s14  ;;  %409 = vrot.lane.b32.xlu0 %v375_v51, %s954_s14 }
  0x9a   :  { %v327_v62 = vpop.permute.xlu0 %326 }
  0x9b   :  { %v377_v4 = vmul.f32 %v327_v62, %v1127_v54 }
  0x9c   :  { %v331_v60 = vpop.permute.xlu1 %330 }
  0x9d   :  { %255 = vrot.lane.b32.xlu1 %v218_v56, %s952_s30  ;;  %253 = vrot.lane.b32.xlu0 %v217_v57, %s952_s30  ;;  %v378_v3 = vmul.f32 %v331_v60, %v1122_v53 }
  0x9e   :  { %v339_v5 = vpop.permute.xlu0 %338 }
  0x9f   :  { %v380_v9 = vmul.f32 %v339_v5, %v1141_v59 }
  0xa0   :  { %v335_v2 = vpop.permute.xlu1 %334 }
  0xa1   :  { %259 = vrot.lane.b32.xlu1 %v220_v1, %s952_s30  ;;  %257 = vrot.lane.b32.xlu0 %v219_v0, %s952_s30  ;;  %v379_v10 = vmul.f32 %v335_v2, %v1136_v58 }
  0xa2   :  { %v343_v28 = vpop.permute.xlu0 %342 }
  0xa5   :  { %v183_v7 = vpop.permute.xlu1 %182  ;;  %415 = vrot.lane.b32.xlu1 %v378_v3, %s954_s14  ;;  %413 = vrot.lane.b32.xlu0 %v377_v4, %s954_s14 }
  0xa6   :  { %v221_v13 = vmul.f32 %v183_v7, %v1171_v12  ;;  %v355_v32 = vpop.permute.xlu0 %354 }
  0xa9   :  { %v191_v14 = vpop.permute.xlu1 %190  ;;  %419 = vrot.lane.b32.xlu1 %v380_v9, %s954_s14  ;;  %417 = vrot.lane.b32.xlu0 %v379_v10, %s954_s14 }
  0xaa   :  { %v223_v26 = vmul.f32 %v191_v14, %v1183_v21  ;;  %v359_v45 = vpop.permute.xlu0 %358 }
  0xab   :  { %v385_v49 = vmul.f32 %v359_v45, %v1219_v37 }
  0xad   :  { %263 = vrot.lane.b32.xlu1 %v222_v17, %s952_s30  ;;  %261 = vrot.lane.b32.xlu0 %v221_v13, %s952_s30  ;;  %v195_v20 = vpop.permute.xlu1 %194 }
  0xae   :  { %v224_v27 = vmul.f32 %v195_v20, %v1190_v23  ;;  %v371_v50 = vpop.permute.xlu0 %370 }
  0xaf   :  { %v388_v55 = vmul.f32 %v371_v50, %v1236_v41 }
  0xb1   :  { %120 = vperm.xlu1 %936, %v1014_v8   ;;  %115 = vperm.xlu0 %937, %v1041_v15   ;;  %v381_v15 = vmul.f32 %v343_v28, %v1171_v12 }
  0xb2   :  { %v347_v25 = vpop.permute.xlu1 %346 }
  0xb3   :  { %v382_v8 = vmul.f32 %v347_v25, %v1166_v11  ;;  %v61_v61 = vpop.permute.xlu0 %60 }
  0xb4   :  { %v134_v13 = vmul.f32 %v61_v61, %v1078_v24 }
  0xb5   :  { %267 = vrot.lane.b32.xlu1 %v224_v27, %s952_s30  ;;  %265 = vrot.lane.b32.xlu0 %v223_v26, %s952_s30 }
  0xb6   :  { %v351_v30 = vpop.permute.xlu1 %350 }
  0xb7   :  { %v383_v33 = vmul.f32 %v351_v30, %v1183_v21  ;;  %v76_v63 = vpop.permute.xlu0 %75 }
  0xb9   :  { %130 = vperm.xlu1 %936, %v1047_v16   ;;  %125 = vperm.xlu0 %937, %v1055_v18   ;;  %v384_v16 = vmul.f32 %v355_v32, %v1190_v23  ;;  %v946_v18 = vld [vmem:[%s1358_s2 + $0x28] sm:$0xff]  }
  0xba   :  { %893 = vmatmul.mubr.msk.bf16.gmra.mxu0 %vm538_vm2, %v946_v18 }
  0xbb   :  { %v199_v31 = vpop.permute.xlu1 %198  ;;  %896 = vmatprep.mubr.msk.bf16.mxu0 %vm538_vm2, %v947_v43  ;;  %v86_v1 = vpop.permute.xlu0 %85 }
  0xbd   :  { %423 = vrot.lane.b32.xlu1 %v382_v8, %s954_s14  ;;  %421 = vrot.lane.b32.xlu0 %v381_v15, %s954_s14 }
  0xbe   :  { %938 = vset.pattern.permute.xlu0 %v950_v6  ;;  %v225_v6 = vmul.f32 %v199_v31, %v1219_v37 }
  0xbf   :  { %v207_v35 = vpop.permute.xlu1 %206  ;;  %v96_v3 = vpop.permute.xlu0 %95 }
  0xc0   :  { %v227_v42 = vmul.f32 %v207_v35, %v1228_v38 }
  0xc1   :  { %427 = vrot.lane.b32.xlu1 %v384_v16, %s954_s14  ;;  %425 = vrot.lane.b32.xlu0 %v383_v33, %s954_s14 }
  0xc2   :  { %897 = vmatmul.mubr.msk.bf16.gmra.mxu0 %vm538_vm2, %v948_v48 }
  0xc3   :  { %v211_v40 = vpop.permute.xlu1 %210  ;;  %v1262_v5 = vpop.permute.xlu0 %105 }
  0xc4   :  { %v228_v44 = vmul.f32 %v211_v40, %v1236_v41  ;;  %v137_v40 = vmul.f32 %v76_v63, %v1127_v54 }
  0xc5   :  { %271 = vrot.lane.b32.xlu1 %v226_v39, %s952_s30  ;;  %269 = vrot.lane.b32.xlu0 %v225_v6, %s952_s30 }
  0xc8   :  { %v363_v46 = vpop.permute.xlu1 %362 }
  0xc9   :  { %275 = vrot.lane.b32.xlu1 %v228_v44, %s952_s30  ;;  %273 = vrot.lane.b32.xlu0 %v227_v42, %s952_s30  ;;  %v386_v47 = vmul.f32 %v363_v46, %v1214_v36 }
  0xcc   :  { %v367_v51 = vpop.permute.xlu1 %366 }
  0xcd   :  { %431 = vrot.lane.b32.xlu1 %v386_v47, %s954_s14  ;;  %429 = vrot.lane.b32.xlu0 %v385_v49, %s954_s14  ;;  %v387_v52 = vmul.f32 %v367_v51, %v1228_v38  ;;  %v139_v47 = vmul.f32 %v86_v1, %v1136_v58 }
  0xd1   :  { %435 = vrot.lane.b32.xlu1 %v388_v55, %s954_s14  ;;  %v56_v56 = vpop.permute.xlu1 %55  ;;  %433 = vrot.lane.b32.xlu0 %v387_v52, %s954_s14 }
  0xd2   :  { %v133_v17 = vmul.f32 %v56_v56, %v1067_v19 }
  0xd5   :  { %v66_v57 = vpop.permute.xlu1 %65 }
  0xd6   :  { %v135_v28 = vmul.f32 %v66_v57, %v1072_v22 }
  0xd9   :  { %v71_v60 = vpop.permute.xlu1 %70 }
  0xda   :  { %v136_v30 = vmul.f32 %v71_v60, %v1086_v29 }
  0xdd   :  { %v81_v62 = vpop.permute.xlu1 %80 }
  0xde   :  { %v138_v29 = vmul.f32 %v81_v62, %v1122_v53 }
  0xe1   :  { %v91_v0 = vpop.permute.xlu1 %90 }
  0xe2   :  { %v140_v43 = vmul.f32 %v91_v0, %v1141_v59 }
  0xe5   :  { %v101_v2 = vpop.permute.xlu1 %100 }
  0xe9   :  { %v1260_v4 = vpop.permute.xlu1 %110 }
  0xf2   :  { %v246_v9 = vpop.permute.xlu0 %245 }
  0xf3   :  { %v293_v25 = vadd.f32 %v246_v9, %v133_v17  ;;  %v141_v9 = vmul.f32 %v96_v3, %v1171_v12 }
  0xf6   :  { %v248_v7 = vpop.permute.xlu1 %247  ;;  %v250_v14 = vpop.permute.xlu0 %249 }
  0xf7   :  { %v294_v26 = vadd.f32 %v248_v7, %v134_v13  ;;  %v295_v31 = vadd.f32 %v250_v14, %v135_v28  ;;  %v142_v7 = vmul.f32 %v101_v2, %v1166_v11 }
  0xfa   :  { %v252_v10 = vpop.permute.xlu1 %251 }
  0xfb   :  { %v296_v32 = vadd.f32 %v252_v10, %v136_v30 }
  0xfe   :  { %v408_v20 = vpop.permute.xlu1 %407 }
  0xff   :  { %v454_v8 = vadd.f32 %v408_v20, %v294_v26  ;;  %v144_v20 = vmul.f32 %v1260_v4, %v1190_v23 }
 0x107   :  { %v406_v27 = vpop.permute.xlu0 %405 }
 0x108   :  { %v453_v15 = vadd.f32 %v406_v27, %v293_v25  ;;  %v143_v25 = vmul.f32 %v1262_v5, %v1183_v21 }
 0x10a   :  { %v469_v33 = vpack.c.bf16 %v454_v8, %v453_v15 }
 0x10b   :  { %v412_v34 = vpop.permute.xlu1 %411  ;;  %v410_v16 = vpop.permute.xlu0 %409 }
 0x10c   :  { %v456_v24 = vadd.f32 %v412_v34, %v296_v32  ;;  %v455_v35 = vadd.f32 %v410_v16, %v295_v31  ;;  %904 = vmatprep.mubr.msk.bf16.mxu1 %vm679_vm3, %v469_v33 }
 0x10e   :  { %v470_v19 = vpack.c.bf16 %v456_v24, %v455_v35 }
 0x10f   :  { %v256_v18 = vpop.permute.xlu1 %255  ;;  %v254_v6 = vpop.permute.xlu0 %253 }
 0x110   :  { %905 = vmatmul.mubr.msk.bf16.vlgmr.msra.gmra.mxu1 %vm679_vm3, %v470_v19  ;;  %v298_v42 = vadd.f32 %v256_v18, %v138_v29  ;;  %v297_v44 = vadd.f32 %v254_v6, %v137_v40 }
 0x113   :  { %v260_v22 = vpop.permute.xlu1 %259  ;;  %v258_v39 = vpop.permute.xlu0 %257 }
 0x114   :  { %v300_v50 = vadd.f32 %v260_v22, %v140_v43  ;;  %v299_v51 = vadd.f32 %v258_v39, %v139_v47 }
 0x117   :  { %v416_v45 = vpop.permute.xlu1 %415  ;;  %v414_v46 = vpop.permute.xlu0 %413 }
 0x118   :  { %v458_v48 = vadd.f32 %v416_v45, %v298_v42  ;;  %v457_v49 = vadd.f32 %v414_v46, %v297_v44 }
 0x11a   :  { %v471_v52 = vpack.c.bf16 %v458_v48, %v457_v49 }
 0x11b   :  { %v420_v55 = vpop.permute.xlu1 %419  ;;  %v418_v56 = vpop.permute.xlu0 %417 }
 0x11c   :  { %v460_v57 = vadd.f32 %v420_v55, %v300_v50  ;;  %v459_v60 = vadd.f32 %v418_v56, %v299_v51  ;;  %908 = vmatprep.mubr.msk.bf16.mxu1 %vm679_vm3, %v471_v52 }
 0x11e   :  { %v472_v53 = vpack.c.bf16 %v460_v57, %v459_v60 }
 0x11f   :  { %v264_v54 = vpop.permute.xlu1 %263  ;;  %v262_v61 = vpop.permute.xlu0 %261 }
 0x120   :  { %909 = vmatmul.mubr.msk.bf16.gmra.mxu1 %vm679_vm3, %v472_v53  ;;  %v302_v10 = vadd.f32 %v264_v54, %v142_v7  ;;  %v301_v13 = vadd.f32 %v262_v61, %v141_v9 }
 0x12c   :  { %v121_v62 = vpop.permute.xlu1 %120  ;;  %v116_v59 = vpop.permute.xlu0 %115 }
 0x12d   :  { %v146_v21 = vmul.f32 %v121_v62, %v1214_v36  ;;  %v145_v5 = vmul.f32 %v116_v59, %v1219_v37  ;;  %v886_v37 = vpop.f32.mrf.mxu0 }
 0x12f   :  { %v604_v46 = vpop.f32.mrf.mxu0 }
 0x130   :  { %v268_v63 = vpop.permute.xlu1 %267  ;;  %v266_v58 = vpop.permute.xlu0 %265 }
 0x131   :  { %v304_v28 = vadd.f32 %v268_v63, %v144_v20  ;;  %v303_v30 = vadd.f32 %v266_v58, %v143_v25 }
 0x134   :  { %v131_v0 = vpop.permute.xlu1 %130  ;;  %v126_v1 = vpop.permute.xlu0 %125 }
 0x135   :  { %v148_v35 = vmul.f32 %v131_v0, %v1236_v41  ;;  %v147_v19 = vmul.f32 %v126_v1, %v1228_v38  ;;  %v887_v41 = vpop.f32.mrf.mxu0 }
 0x137   :  { %v607_v51 = vpop.f32.mrf.mxu0 }
 0x138   :  { %v424_v14 = vpop.permute.xlu1 %423  ;;  %v422_v17 = vpop.permute.xlu0 %421 }
 0x139   :  { %v462_v26 = vadd.f32 %v424_v14, %v302_v10  ;;  %v461_v27 = vadd.f32 %v422_v17, %v301_v13  ;;  %v890_v53 = vpop.f32.mrf.mxu0 }
 0x13b   :  { %v473_v8 = vpack.c.bf16 %v462_v26, %v461_v27  ;;  %v620_v61 = vpop.f32.mrf.mxu0 }
 0x13c   :  { %v428_v15 = vpop.permute.xlu1 %427  ;;  %v426_v31 = vpop.permute.xlu0 %425 }
 0x13d   :  { %v464_v11 = vadd.f32 %v428_v15, %v304_v28  ;;  %v463_v2 = vadd.f32 %v426_v31, %v303_v30  ;;  %912 = vmatprep.mubr.msk.bf16.mxu1 %vm679_vm3, %v473_v8  ;;  %v891_v59 = vpop.f32.mrf.mxu0 }
 0x13f   :  { %v474_v12 = vpack.c.bf16 %v464_v11, %v463_v2  ;;  %v623_v9 = vpop.f32.mrf.mxu0 }
 0x140   :  { %v272_v3 = vpop.permute.xlu1 %271  ;;  %v270_v32 = vpop.permute.xlu0 %269 }
 0x141   :  { %913 = vmatmul.mubr.msk.bf16.gmra.mxu1 %vm679_vm3, %v474_v12  ;;  %v306_v33 = vadd.f32 %v272_v3, %v146_v21  ;;  %v305_v34 = vadd.f32 %v270_v32, %v145_v5 }
 0x144   :  { %v276_v23 = vpop.permute.xlu1 %275  ;;  %v274_v4 = vpop.permute.xlu0 %273 }
 0x145   :  { %v308_v22 = vadd.f32 %v276_v23, %v148_v35  ;;  %v307_v39 = vadd.f32 %v274_v4, %v147_v19 }
 0x148   :  { %v432_v16 = vpop.permute.xlu1 %431  ;;  %v430_v24 = vpop.permute.xlu0 %429 }
 0x149   :  { %v466_v18 = vadd.f32 %v432_v16, %v306_v33  ;;  %v465_v6 = vadd.f32 %v430_v24, %v305_v34 }
 0x14b   :  { %v475_v29 = vpack.c.bf16 %v466_v18, %v465_v6 }
 0x14c   :  { %v436_v40 = vpop.permute.xlu1 %435  ;;  %v434_v42 = vpop.permute.xlu0 %433 }
 0x14d   :  { %v468_v44 = vadd.f32 %v436_v40, %v308_v22  ;;  %v467_v45 = vadd.f32 %v434_v42, %v307_v39  ;;  %916 = vmatprep.mubr.msk.bf16.mxu1 %vm679_vm3, %v475_v29 }
 0x14f   :  { %v476_v36 = vpack.c.bf16 %v468_v44, %v467_v45 }
 0x151   :  { %917 = vmatmul.mubr.msk.bf16.gmra.mxu1 %vm679_vm3, %v476_v36 }
 0x17a   :  { %v894_v26 = vpop.f32.mrf.mxu0 }
 0x17c   :  { %v636_v27 = vpop.f32.mrf.mxu0 }
 0x17e   :  { %v895_v30 = vpop.f32.mrf.mxu0 }
 0x180   :  { %v639_v12 = vpop.f32.mrf.mxu0 }
 0x182   :  { %v898_v33 = vpop.f32.mrf.mxu0 }
 0x184   :  { %v652_v34 = vpop.f32.mrf.mxu0 }
 0x186   :  { %v899_v35 = vpop.f32.mrf.mxu0 }
 0x188   :  { %v655_v40 = vpop.f32.mrf.mxu0 }
 0x1d0   :  { %v906_v43 = vpop.f32.mrf.mxu1 }
 0x1d1   :  { %v747_v47 = vadd.f32 %v906_v43, %v886_v37 }
 0x1d2   :  { %v738_v38 = vpop.f32.mrf.mxu1 }
 0x1d3   :  { %v803_v48 = vmax.f32 %v747_v47, 0.0  ;;  %v739_v49 = vadd.f32 %v738_v38, %v604_v46 }
 0x1d4   :  { %v907_v50 = vpop.f32.mrf.mxu1 }
 0x1d5   :  { %819 = vst.msk [vmem:[%s1359_s5 + $0x10] sm:$0xff] %vm679_vm3, %v803_v48  ;;  %v801_v52 = vmax.f32 %v739_v49, 0.0  ;;  %v750_v55 = vadd.f32 %v907_v50, %v887_v41 }
 0x1d6   :  { %v741_v56 = vpop.f32.mrf.mxu1 }
 0x1d7   :  { %817 = vst.msk [vmem:[%s1359_s5] sm:$0xff] %vm679_vm3, %v801_v52  ;;  %v804_v57 = vmax.f32 %v750_v55, 0.0  ;;  %v742_v60 = vadd.f32 %v741_v56, %v607_v51 }
 0x1d9   :  { %820 = vst.msk [vmem:[%s1359_s5 + $0x18] sm:$0xff] %vm679_vm3, %v804_v57  ;;  %v802_v54 = vmax.f32 %v742_v60, 0.0 }
 0x1db   :  { %818 = vst.msk [vmem:[%s1359_s5 + $0x8] sm:$0xff] %vm679_vm3, %v802_v54 }
 0x1e0   :  { %v910_v62 = vpop.f32.mrf.mxu1 }
 0x1e1   :  { %v763_v63 = vadd.f32 %v910_v62, %v890_v53 }
 0x1e2   :  { %v754_v58 = vpop.f32.mrf.mxu1 }
 0x1e3   :  { %v807_v0 = vmax.f32 %v763_v63, 0.0  ;;  %v755_v1 = vadd.f32 %v754_v58, %v620_v61 }
 0x1e4   :  { %v911_v7 = vpop.f32.mrf.mxu1 }
 0x1e5   :  { %823 = vst.msk [vmem:[%s1359_s5 + $0x30] sm:$0xff] %vm679_vm3, %v807_v0  ;;  %v805_v10 = vmax.f32 %v755_v1, 0.0  ;;  %v766_v13 = vadd.f32 %v911_v7, %v891_v59 }
 0x1e6   :  { %v757_v14 = vpop.f32.mrf.mxu1 }
 0x1e7   :  { %821 = vst.msk [vmem:[%s1359_s5 + $0x20] sm:$0xff] %vm679_vm3, %v805_v10  ;;  %v808_v17 = vmax.f32 %v766_v13, 0.0  ;;  %v758_v20 = vadd.f32 %v757_v14, %v623_v9 }
 0x1e9   :  { %824 = vst.msk [vmem:[%s1359_s5 + $0x38] sm:$0xff] %vm679_vm3, %v808_v17  ;;  %v806_v25 = vmax.f32 %v758_v20, 0.0 }
 0x1eb   :  { %822 = vst.msk [vmem:[%s1359_s5 + $0x28] sm:$0xff] %vm679_vm3, %v806_v25 }
 0x201   :  { %v914_v28 = vpop.f32.mrf.mxu1 }
 0x202   :  { %v779_v8 = vadd.f32 %v914_v28, %v894_v26 }
 0x203   :  { %v770_v15 = vpop.f32.mrf.mxu1 }
 0x204   :  { %v811_v31 = vmax.f32 %v779_v8, 0.0  ;;  %v771_v11 = vadd.f32 %v770_v15, %v636_v27 }
 0x205   :  { %v915_v2 = vpop.f32.mrf.mxu1 }
 0x206   :  { %827 = vst.msk [vmem:[%s1359_s5 + $0x50] sm:$0xff] %vm679_vm3, %v811_v31  ;;  %v809_v3 = vmax.f32 %v771_v11, 0.0  ;;  %v782_v32 = vadd.f32 %v915_v2, %v895_v30 }
 0x207   :  { %v773_v23 = vpop.f32.mrf.mxu1 }
 0x208   :  { %825 = vst.msk [vmem:[%s1359_s5 + $0x40] sm:$0xff] %vm679_vm3, %v809_v3  ;;  %v812_v4 = vmax.f32 %v782_v32, 0.0  ;;  %v774_v21 = vadd.f32 %v773_v23, %v639_v12 }
 0x20a   :  { %828 = vst.msk [vmem:[%s1359_s5 + $0x58] sm:$0xff] %vm679_vm3, %v812_v4  ;;  %v810_v5 = vmax.f32 %v774_v21, 0.0 }
 0x20c   :  { %826 = vst.msk [vmem:[%s1359_s5 + $0x48] sm:$0xff] %vm679_vm3, %v810_v5 }
 0x211   :  { %v918_v16 = vpop.f32.mrf.mxu1 }
 0x212   :  { %v795_v24 = vadd.f32 %v918_v16, %v898_v33 }
 0x213   :  { %v786_v19 = vpop.f32.mrf.mxu1 }
 0x214   :  { %v815_v18 = vmax.f32 %v795_v24, 0.0  ;;  %v787_v6 = vadd.f32 %v786_v19, %v652_v34 }
 0x215   :  { %v919_v22 = vpop.f32.mrf.mxu1 }
 0x216   :  { %831 = vst.msk [vmem:[%s1359_s5 + $0x70] sm:$0xff] %vm679_vm3, %v815_v18  ;;  %v813_v39 = vmax.f32 %v787_v6, 0.0  ;;  %v798_v29 = vadd.f32 %v919_v22, %v899_v35 }
 0x217   :  { %v789_v42 = vpop.f32.mrf.mxu1 }
 0x218   :  { %829 = vst.msk [vmem:[%s1359_s5 + $0x60] sm:$0xff] %vm679_vm3, %v813_v39  ;;  %v816_v44 = vmax.f32 %v798_v29, 0.0  ;;  %v790_v45 = vadd.f32 %v789_v42, %v655_v40 }
 0x21a   :  { %832 = vst.msk [vmem:[%s1359_s5 + $0x78] sm:$0xff] %vm679_vm3, %v816_v44  ;;  %v814_v36 = vmax.f32 %v790_v45, 0.0 }
 0x21c   :  { %830 = vst.msk [vmem:[%s1359_s5 + $0x68] sm:$0xff] %vm679_vm3, %v814_v36 }

// kernel: _lambda_.25
= control target key start
LH: loop header
LB: loop body
LE: loop exit
PB: predicated region body
PF: predicated region fallthrough
CT: control target
= control target key end

     0   :  { %vm22_vm0 = vcmask 254976   ;;  %v150_v7 = vmov 0.0   ;;  %vm151_vm1 = vmmov 0   ;;  %vm77_vm2 = vcmask 261120   ;;  %s203_s0 = inlined_call_operand.vmem [shape: f32[2,32], index: 0, kind: input, shape index: {}]   ;;  %s204_s3 = inlined_call_operand.vmem [shape: bf16[32,20], index: 3, kind: input, shape index: {}]   ;;  %s205_s1 = inlined_call_operand.vmem [shape: f32[1,32], index: 1, kind: input, shape index: {}]   ;;  %s206_s2 = inlined_call_operand.vmem [shape: f32[1,32], index: 2, kind: input, shape index: {}]   ;;  %s207_s4 = inlined_call_operand.vmem [shape: f32[1,20], index: 4, kind: input, shape index: {}]   ;;  %s208_s5 = inlined_call_operand.vmem [shape: f32[2,20], index: 5, kind: output, shape index: {}]  }
   0x1   :  { %v21_v0 = vld [vmem:[%s203_s0] sm:$0x3]  ;;  %136 = vmatprep.subr.bf16.mxu0 %v150_v7  ;;  %v146_v8 = vld [vmem:[%s204_s3 + $0x8] sm:$0xff]   ;;  %140 = vmatprep.mubr.msk.bf16.mxu0 %vm151_vm1, %v150_v7  ;;  %vm121_vm3 = vcmask 156672  }
   0x2   :  { %v23_v1 = vsel %vm22_vm0, %v21_v0, 0.0  ;;  %137 = vmatpush3.bf16.msra.mxu0 %v146_v8  ;;  %v147_v9 = vld [vmem:[%s204_s3] sm:$0xff]  }
   0x3   :  { %24 = vadd.xlane.f32.xlu0 %v23_v1  ;;  %138 = vmatprep.subr.bf16.mxu0 %v150_v7  ;;  %v127_v14 = vld [vmem:[%s205_s1] ss:$0 sm:$0xff] }
   0x4   :  { %v128_v16 = vld [vmem:[%s206_s2] ss:$0 sm:$0xff] }
   0x5   :  { %v129_v20 = vld [vmem:[%s207_s4] ss:$0 sm:$0xff] }
   0x6   :  { %139 = vmatpush3.bf16.msra.mxu0 %v147_v9 }
  0x8c   :  { %v25_v2 = vpop.xlane.xlu0 %24 }
  0x8d   :  { %v27_v3 = vmul.f32 0.03125, %v25_v2 }
  0x8f   :  { %v28_v4 = vsub.f32 %v21_v0, %v27_v3 }
  0x91   :  { %v29_v5 = vmul.f32 %v28_v4, %v28_v4 }
  0x93   :  { %v30_v6 = vsel %vm22_vm0, %v29_v5, 0.0 }
  0x94   :  { %31 = vadd.xlane.f32.xlu0 %v30_v6 }
 0x11d   :  { %v32_v10 = vpop.xlane.xlu0 %31 }
 0x11e   :  { %v33_v11 = vmul.f32 0.03125, %v32_v10 }
 0x120   :  { %v34_v12 = vadd.f32 1e-05, %v33_v11 }
 0x122   :  { %148 = vrsqrt.f32 %v34_v12 }
 0x12f   :  { %v149_v13 = vpop.eup %148 }
 0x130   :  { %v36_v15 = vmul.f32 %v149_v13, %v28_v4 }
 0x132   :  { %v44_v17 = vmul.f32 %v127_v14, %v36_v15 }
 0x134   :  { %v52_v18 = vadd.f32 %v128_v16, %v44_v17 }
 0x136   :  { %v53_v19 = vpack.c.bf16 %v52_v18, %v52_v18 }
 0x138   :  { %141 = vmatmul.mubr.msk.bf16.vlgmr.msra.gmra.mxu0 %vm77_vm2, %v53_v19 }
 0x1f8   :  { %v115_v21 = vpop.f32.mrf.mxu0 }
 0x1f9   :  { %v116_v22 = vadd.f32 %v129_v20, %v115_v21 }
 0x1fa   :  { %v142_v23 = vpop.f32.mrf.mxu0 }
 0x1fb   :  { %122 = vst.msk [vmem:[%s208_s5] sm:$0x3] %vm121_vm3, %v116_v22 }
 0x1fc   :  { %v118_v24 = vpop.f32.mrf.mxu0 }
 0x1fe   :  { %v143_v25 = vpop.f32.mrf.mxu0 }

// kernel: _lambda_.27
= control target key start
LH: loop header
LB: loop body
LE: loop exit
PB: predicated region body
PF: predicated region fallthrough
CT: control target
= control target key end

     0   :  { %vm29_vm0 = vcmask 31744   ;;  %vm33_vm1 = vcmask 25600   ;;  %vm88_vm2 = vcmask 1041408   ;;  %v287_v14 = vmov 0.0   ;;  %s365_s0 = inlined_call_operand.vmem [shape: f32[10,4], index: 0, kind: input, shape index: {}]   ;;  %s366_s3 = inlined_call_operand.vmem [shape: bf16[4,4], index: 3, kind: input, shape index: {}]   ;;  %s367_s1 = inlined_call_operand.vmem [shape: f32[1,4], index: 1, kind: input, shape index: {}]   ;;  %s368_s2 = inlined_call_operand.vmem [shape: f32[1,4], index: 2, kind: input, shape index: {}]   ;;  %s369_s5 = inlined_call_operand.vmem [shape: bf16[4,3], index: 5, kind: input, shape index: {}]   ;;  %s370_s4 = inlined_call_operand.vmem [shape: f32[1,4], index: 4, kind: input, shape index: {}]   ;;  %s371_s6 = inlined_call_operand.vmem [shape: f32[1,3], index: 6, kind: input, shape index: {}]   ;;  %s372_s7 = inlined_call_operand.vmem [shape: f32[10,3], index: 7, kind: output, shape index: {}]  }
   0x1   :  { %v27_v0 = vld [vmem:[%s365_s0] sm:$0xff]  ;;  %v28_v1 = vld [vmem:[%s365_s0 + $0x8] sm:$0x3]  ;;  %261 = vmatprep.subr.bf16.mxu0 %v287_v14  ;;  %vm288_vm3 = vmmov 0   ;;  %267 = vmatprep.subr.bf16.mxu1 %v287_v14  ;;  %vm243_vm6 = vcmask 23552   ;;  %vm245_vm7 = vcmask 17408  }
   0x2   :  { %v30_v2 = vsel %vm29_vm0, %v27_v0, 0.0  ;;  %v34_v3 = vsel %vm33_vm1, %v28_v1, 0.0  ;;  %v77_v15 = vld [vmem:[%s366_s3] sm:$0x3]  ;;  %263 = vmatprep.mubr.msk.bf16.mxu0 %vm288_vm3, %v287_v14  ;;  %269 = vmatprep.mubr.msk.bf16.mxu1 %vm288_vm3, %v287_v14 }
   0x3   :  { %31 = vadd.xlane.f32.xlu0 %v30_v2  ;;  %v90_v16 = vsel %vm88_vm2, %v77_v15, 0  ;;  %v251_v25 = vld [vmem:[%s367_s1] ss:$0 sm:$0xff] }
   0x4   :  { %262 = vmatpush3.bf16.msra.mxu0 %v90_v16  ;;  %v252_v29 = vld [vmem:[%s368_s2] ss:$0 sm:$0xff] }
   0x5   :  { %v188_v34 = vld [vmem:[%s369_s5] sm:$0x3] }
   0x6   :  { %v200_v35 = vsel %vm88_vm2, %v188_v34, 0  ;;  %v253_v36 = vld [vmem:[%s370_s4] ss:$0 sm:$0xff] }
   0x7   :  { %35 = vadd.xlane.f32.xlu0 %v34_v3  ;;  %268 = vmatpush3.bf16.msra.mxu1 %v200_v35 }
  0x8c   :  { %v32_v4 = vpop.xlane.xlu0 %31 }
  0x8d   :  { %v38_v5 = vmul.f32 0.25, %v32_v4 }
  0x8f   :  { %v40_v6 = vsub.f32 %v27_v0, %v38_v5 }
  0x90   :  { %v36_v7 = vpop.xlane.xlu0 %35 }
  0x91   :  { %v39_v8 = vmul.f32 0.25, %v36_v7  ;;  %v42_v9 = vmul.f32 %v40_v6, %v40_v6 }
  0x93   :  { %v41_v10 = vsub.f32 %v28_v1, %v39_v8  ;;  %v44_v11 = vsel %vm29_vm0, %v42_v9, 0.0 }
  0x94   :  { %45 = vadd.xlane.f32.xlu1 %v44_v11 }
  0x95   :  { %v43_v12 = vmul.f32 %v41_v10, %v41_v10 }
  0x97   :  { %v47_v13 = vsel %vm33_vm1, %v43_v12, 0.0 }
  0x98   :  { %48 = vadd.xlane.f32.xlu1 %v47_v13 }
 0x11d   :  { %v46_v17 = vpop.xlane.xlu1 %45 }
 0x11e   :  { %v50_v18 = vmul.f32 0.25, %v46_v17 }
 0x120   :  { %v52_v19 = vadd.f32 1e-05, %v50_v18 }
 0x121   :  { %v49_v20 = vpop.xlane.xlu1 %48 }
 0x122   :  { %275 = vrsqrt.f32 %v52_v19  ;;  %v51_v21 = vmul.f32 0.25, %v49_v20 }
 0x124   :  { %v53_v22 = vadd.f32 1e-05, %v51_v21 }
 0x126   :  { %277 = vrsqrt.f32 %v53_v22 }
 0x12f   :  { %v276_v23 = vpop.eup %275 }
 0x130   :  { %v56_v24 = vmul.f32 %v276_v23, %v40_v6 }
 0x132   :  { %v65_v28 = vmul.f32 %v251_v25, %v56_v24 }
 0x133   :  { %v278_v26 = vpop.eup %277 }
 0x134   :  { %v57_v27 = vmul.f32 %v278_v26, %v41_v10  ;;  %v74_v31 = vadd.f32 %v252_v29, %v65_v28 }
 0x136   :  { %v66_v30 = vmul.f32 %v251_v25, %v57_v27 }
 0x138   :  { %v75_v32 = vadd.f32 %v252_v29, %v66_v30  ;;  %v255_v30 = vld [vmem:[%s371_s6] ss:$0 sm:$0xff] }
 0x13a   :  { %v76_v33 = vpack.c.bf16 %v75_v32, %v74_v31 }
 0x13c   :  { %264 = vmatmul.mubr.msk.bf16.vlgmr.msra.gmra.mxu0 %vm29_vm0, %v76_v33 }
 0x1fc   :  { %v126_v37 = vpop.f32.mrf.mxu0 }
 0x1fd   :  { %v127_v38 = vadd.f32 %v253_v36, %v126_v37 }
 0x1fe   :  { %v265_v39 = vpop.f32.mrf.mxu0 }
 0x1ff   :  { %v133_v40 = vmul.f32 0.70710677, %v127_v38  ;;  %v181_v24 = vmul.f32 0.5, %v127_v38 }
 0x200   :  { %v129_v41 = vpop.f32.mrf.mxu0 }
 0x201   :  { %v135_v42 = vand.u32 2147483647, %v133_v40  ;;  %v130_v43 = vadd.f32 %v253_v36, %v129_v41  ;;  %vm175_vm4 = vcmp.lt.f32.partialorder %v133_v40, 0.0 }
 0x202   :  { %v266_v44 = vpop.f32.mrf.mxu0 }
 0x203   :  { %v137_v45 = vmul.f32 0.3275911, %v135_v42  ;;  %v134_v46 = vmul.f32 0.70710677, %v130_v43  ;;  %v163_v51 = vmul.f32 %v135_v42, %v135_v42  ;;  %v182_v25 = vmul.f32 0.5, %v130_v43 }
 0x205   :  { %v139_v47 = vadd.f32 1.0, %v137_v45  ;;  %v136_v48 = vand.u32 2147483647, %v134_v46  ;;  %v165_v52 = vsub.f32 0.0, %v163_v51  ;;  %vm176_vm5 = vcmp.lt.f32.partialorder %v134_v46, 0.0 }
 0x207   :  { %279 = vrcp.f32 %v139_v47  ;;  %v138_v49 = vmul.f32 0.3275911, %v136_v48  ;;  %v164_v53 = vmul.f32 %v136_v48, %v136_v48  ;;  %v167_v56 = vmul.f32 1.442695, %v165_v52 }
 0x209   :  { %v140_v50 = vadd.f32 1.0, %v138_v49  ;;  %v166_v57 = vsub.f32 0.0, %v164_v53 }
 0x20b   :  { %281 = vrcp.f32 %v140_v50  ;;  %v169_v62 = vmul.f32 1.442695, %v166_v57 }
 0x20c   :  { %283 = vpow2.f32 %v167_v56 }
 0x20d   :  { %285 = vpow2.f32 %v169_v62 }
 0x214   :  { %v280_v54 = vpop.eup %279 }
 0x215   :  { %v145_v55 = vmul.f32 1.0614054, %v280_v54 }
 0x217   :  { %v147_v58 = vadd.f32 -1.4531521, %v145_v55 }
 0x218   :  { %v282_v59 = vpop.eup %281 }
 0x219   :  { %v149_v60 = vmul.f32 %v280_v54, %v147_v58  ;;  %v146_v61 = vmul.f32 1.0614054, %v282_v59  ;;  %v284_v11 = vpop.eup %283 }
 0x21a   :  { %v286_v16 = vpop.eup %285 }
 0x21b   :  { %v151_v63 = vadd.f32 1.4214138, %v149_v60  ;;  %v148_v0 = vadd.f32 -1.4531521, %v146_v61 }
 0x21d   :  { %v153_v1 = vmul.f32 %v280_v54, %v151_v63  ;;  %v150_v2 = vmul.f32 %v282_v59, %v148_v0 }
 0x21f   :  { %v155_v3 = vadd.f32 -0.28449672, %v153_v1  ;;  %v152_v4 = vadd.f32 1.4214138, %v150_v2 }
 0x221   :  { %v157_v5 = vmul.f32 %v280_v54, %v155_v3  ;;  %v154_v6 = vmul.f32 %v282_v59, %v152_v4 }
 0x223   :  { %v159_v7 = vadd.f32 0.2548296, %v157_v5  ;;  %v156_v8 = vadd.f32 -0.28449672, %v154_v6 }
 0x225   :  { %v161_v9 = vmul.f32 %v280_v54, %v159_v7  ;;  %v158_v10 = vmul.f32 %v282_v59, %v156_v8 }
 0x227   :  { %v171_v12 = vmul.f32 %v284_v11, %v161_v9  ;;  %v160_v13 = vadd.f32 0.2548296, %v158_v10 }
 0x229   :  { %v173_v14 = vsub.f32 1.0, %v171_v12  ;;  %v162_v15 = vmul.f32 %v282_v59, %v160_v13 }
 0x22b   :  { %v177_v17 = vsub.f32 0.0, %v173_v14  ;;  %v172_v18 = vmul.f32 %v286_v16, %v162_v15 }
 0x22d   :  { %v179_v19 = vsel %vm175_vm4, %v177_v17, %v173_v14  ;;  %v174_v20 = vsub.f32 1.0, %v172_v18 }
 0x22e   :  { %v183_v22 = vadd.f32 1.0, %v179_v19 }
 0x22f   :  { %v178_v21 = vsub.f32 0.0, %v174_v20 }
 0x230   :  { %v185_v27 = vmul.f32 %v183_v22, %v181_v24 }
 0x231   :  { %v180_v23 = vsel %vm176_vm5, %v178_v21, %v174_v20 }
 0x232   :  { %v184_v26 = vadd.f32 1.0, %v180_v23 }
 0x234   :  { %v186_v28 = vmul.f32 %v184_v26, %v182_v25 }
 0x236   :  { %v187_v29 = vpack.c.bf16 %v186_v28, %v185_v27 }
 0x238   :  { %270 = vmatmul.mubr.msk.bf16.vlgmr.msra.gmra.mxu1 %vm29_vm0, %v187_v29 }
 0x2f8   :  { %v236_v31 = vpop.f32.mrf.mxu1 }
 0x2f9   :  { %v237_v32 = vadd.f32 %v255_v30, %v236_v31 }
 0x2fa   :  { %v271_v33 = vpop.f32.mrf.mxu1 }
 0x2fb   :  { %244 = vst.msk [vmem:[%s372_s7] sm:$0xff] %vm243_vm6, %v237_v32 }
 0x2fc   :  { %v239_v34 = vpop.f32.mrf.mxu1 }
 0x2fd   :  { %v240_v35 = vadd.f32 %v255_v30, %v239_v34 }
 0x2fe   :  { %v272_v36 = vpop.f32.mrf.mxu1 }
 0x2ff   :  { %246 = vst.msk [vmem:[%s372_s7 + $0x8] sm:$0x3] %vm245_vm7, %v240_v35 }

// kernel: _lambda_.23
= control target key start
LH: loop header
LB: loop body
LE: loop exit
PB: predicated region body
PF: predicated region fallthrough
CT: control target
= control target key end

     0   :  { %vm94_vm0 = vcmask 261120   ;;  %vm216_vm1 = vcmask 39936   ;;  %s425_s1 = inlined_call_operand.vmem [shape: bf16[32,5], index: 1, kind: input, shape index: {}]   ;;  %s426_s0 = inlined_call_operand.vmem [shape: bf16[128,32], index: 0, kind: input, shape index: {}]   ;;  %s427_s2 = inlined_call_operand.vmem [shape: f32[1,5], index: 2, kind: input, shape index: {}]   ;;  %s428_s3 = inlined_call_operand.vmem [shape: f32[128,5], index: 3, kind: output, shape index: {}]  }
   0x1   :  { %v290_v0 = vld [vmem:[%s425_s1 + $0x8] sm:$0xff]   ;;  %v291_v1 = vld [vmem:[%s425_s1] sm:$0xff]   ;;  %v296_v6 = vld [vmem:[%s426_s0 + $0x10] sm:$0xff]  }
   0x2   :  { %266 = vmatprep.subr.bf16.mxu0 %v290_v0  ;;  %286 = vmatprep.subr.bf16.mxu1 %v290_v0  ;;  %v292_v2 = vld [vmem:[%s426_s0] sm:$0xff]   ;;  %v294_v4 = vld [vmem:[%s426_s0 + $0x8] sm:$0xff]   ;;  %v297_v7 = vld [vmem:[%s426_s0 + $0x30] sm:$0xff]  }
   0x3   :  { %267 = vmatpush3.bf16.msra.mxu0 %v290_v0  ;;  %288 = vmatpush3.bf16.msra.mxu1 %v290_v0  ;;  %v293_v3 = vld [vmem:[%s426_s0 + $0x20] sm:$0xff]   ;;  %v295_v5 = vld [vmem:[%s426_s0 + $0x28] sm:$0xff]   ;;  %v298_v8 = vld [vmem:[%s426_s0 + $0x18] sm:$0xff]  }
   0x4   :  { %268 = vmatprep.subr.bf16.mxu0 %v291_v1  ;;  %287 = vmatprep.subr.bf16.mxu1 %v291_v1  ;;  %v299_v9 = vld [vmem:[%s426_s0 + $0x38] sm:$0xff]   ;;  %v237_v10 = vld [vmem:[%s427_s2] ss:$0 sm:$0xff] }
   0x5   :  { %270 = vmatprep.mubr.msk.bf16.mxu0 %vm94_vm0, %v292_v2  ;;  %278 = vmatprep.mubr.msk.bf16.mxu1 %vm94_vm0, %v293_v3 }
   0x7   :  { %269 = vmatpush3.bf16.msra.mxu0 %v291_v1  ;;  %289 = vmatpush3.bf16.msra.mxu1 %v291_v1 }
   0xa   :  { %271 = vmatmul.mubr.msk.bf16.vlgmr.msra.gmra.mxu0 %vm94_vm0, %v294_v4  ;;  %279 = vmatmul.mubr.msk.bf16.vlgmr.msra.gmra.mxu1 %vm94_vm0, %v295_v5 }
   0xb   :  { %274 = vmatprep.mubr.msk.bf16.mxu0 %vm94_vm0, %v296_v6  ;;  %282 = vmatprep.mubr.msk.bf16.mxu1 %vm94_vm0, %v297_v7 }
  0x12   :  { %275 = vmatmul.mubr.msk.bf16.gmra.mxu0 %vm94_vm0, %v298_v8  ;;  %283 = vmatmul.mubr.msk.bf16.gmra.mxu1 %vm94_vm0, %v299_v9 }
  0xca   :  { %v272_v11 = vpop.f32.mrf.mxu0  ;;  %v280_v12 = vpop.f32.mrf.mxu1 }
  0xcb   :  { %v162_v13 = vadd.f32 %v272_v11, %v237_v10  ;;  %v194_v14 = vadd.f32 %v280_v12, %v237_v10 }
  0xcc   :  { %v153_v15 = vpop.f32.mrf.mxu0  ;;  %v185_v16 = vpop.f32.mrf.mxu1 }
  0xcd   :  { %219 = vst.msk [vmem:[%s428_s3 + $0x10] sm:$0xff] %vm216_vm1, %v162_v13  ;;  %227 = vst.msk [vmem:[%s428_s3 + $0x50] sm:$0xff] %vm216_vm1, %v194_v14  ;;  %v154_v17 = vadd.f32 %v237_v10, %v153_v15  ;;  %v186_v18 = vadd.f32 %v237_v10, %v185_v16 }
  0xce   :  { %v273_v19 = vpop.f32.mrf.mxu0  ;;  %v281_v20 = vpop.f32.mrf.mxu1 }
  0xcf   :  { %217 = vst.msk [vmem:[%s428_s3] sm:$0xff] %vm216_vm1, %v154_v17  ;;  %225 = vst.msk [vmem:[%s428_s3 + $0x40] sm:$0xff] %vm216_vm1, %v186_v18  ;;  %v165_v21 = vadd.f32 %v273_v19, %v237_v10  ;;  %v197_v22 = vadd.f32 %v281_v20, %v237_v10 }
  0xd0   :  { %v156_v23 = vpop.f32.mrf.mxu0  ;;  %v188_v24 = vpop.f32.mrf.mxu1 }
  0xd1   :  { %220 = vst.msk [vmem:[%s428_s3 + $0x18] sm:$0xff] %vm216_vm1, %v165_v21  ;;  %228 = vst.msk [vmem:[%s428_s3 + $0x58] sm:$0xff] %vm216_vm1, %v197_v22  ;;  %v157_v25 = vadd.f32 %v237_v10, %v156_v23  ;;  %v189_v26 = vadd.f32 %v237_v10, %v188_v24 }
  0xd2   :  { %v276_v27 = vpop.f32.mrf.mxu0  ;;  %v284_v28 = vpop.f32.mrf.mxu1 }
  0xd3   :  { %218 = vst.msk [vmem:[%s428_s3 + $0x8] sm:$0xff] %vm216_vm1, %v157_v25  ;;  %226 = vst.msk [vmem:[%s428_s3 + $0x48] sm:$0xff] %vm216_vm1, %v189_v26  ;;  %v178_v29 = vadd.f32 %v276_v27, %v237_v10  ;;  %v210_v30 = vadd.f32 %v284_v28, %v237_v10 }
  0xd4   :  { %v169_v31 = vpop.f32.mrf.mxu0  ;;  %v201_v32 = vpop.f32.mrf.mxu1 }
  0xd5   :  { %223 = vst.msk [vmem:[%s428_s3 + $0x30] sm:$0xff] %vm216_vm1, %v178_v29  ;;  %231 = vst.msk [vmem:[%s428_s3 + $0x70] sm:$0xff] %vm216_vm1, %v210_v30  ;;  %v170_v33 = vadd.f32 %v237_v10, %v169_v31  ;;  %v202_v34 = vadd.f32 %v237_v10, %v201_v32 }
  0xd6   :  { %v277_v35 = vpop.f32.mrf.mxu0  ;;  %v285_v36 = vpop.f32.mrf.mxu1 }
  0xd7   :  { %221 = vst.msk [vmem:[%s428_s3 + $0x20] sm:$0xff] %vm216_vm1, %v170_v33  ;;  %229 = vst.msk [vmem:[%s428_s3 + $0x60] sm:$0xff] %vm216_vm1, %v202_v34  ;;  %v181_v37 = vadd.f32 %v277_v35, %v237_v10  ;;  %v213_v38 = vadd.f32 %v285_v36, %v237_v10 }
  0xd8   :  { %v172_v39 = vpop.f32.mrf.mxu0  ;;  %v204_v40 = vpop.f32.mrf.mxu1 }
  0xd9   :  { %224 = vst.msk [vmem:[%s428_s3 + $0x38] sm:$0xff] %vm216_vm1, %v181_v37  ;;  %232 = vst.msk [vmem:[%s428_s3 + $0x78] sm:$0xff] %vm216_vm1, %v213_v38  ;;  %v173_v41 = vadd.f32 %v237_v10, %v172_v39  ;;  %v205_v42 = vadd.f32 %v237_v10, %v204_v40 }
  0xdb   :  { %222 = vst.msk [vmem:[%s428_s3 + $0x28] sm:$0xff] %vm216_vm1, %v173_v41  ;;  %230 = vst.msk [vmem:[%s428_s3 + $0x68] sm:$0xff] %vm216_vm1, %v205_v42 }

// kernel: _lambda_.26
= control target key start
LH: loop header
LB: loop body
LE: loop exit
PB: predicated region body
PF: predicated region fallthrough
CT: control target
= control target key end

     0   :  { %s2348_s24 = smov 0   ;;  %s2666_s0 = inlined_call_operand.vmem [shape: f32[2,5,4], index: 0, kind: input, shape index: {}]   ;;  %s2667_s1 = inlined_call_operand.vmem [shape: f32[2,16,4], index: 1, kind: input, shape index: {}]   ;;  %s2668_s2 = inlined_call_operand.vmem [shape: bf16[4,512], index: 2, kind: input, shape index: {}]   ;;  %s2669_s3 = inlined_call_operand.vmem [shape: bf16[4,512], index: 3, kind: input, shape index: {}]   ;;  %s2670_s4 = inlined_call_operand.vmem [shape: bf16[4,512], index: 4, kind: input, shape index: {}]   ;;  %s2671_s5 = inlined_call_operand.vmem [shape: bf16[512,4], index: 5, kind: input, shape index: {}]   ;;  %s2672_s6 = inlined_call_operand.vmem [shape: f32[1,4], index: 6, kind: input, shape index: {}]   ;;  %s2673_s7 = inlined_call_operand.vmem [shape: f32[2,5,4], index: 7, kind: output, shape index: {}]  }
   0x1 LB: > { %s1960_s25 = sadd.s32 4294967295, %s2301_s24   ;;  %p1964_p0 = scmp.ge.s32.totalorder %s2301_s24, 1  ;;  %s2301_s24 = sphi %s2348_s24, %s17_s24  }
   0x2   : > { %p246_p1 = scmp.lt.s32.totalorder %s2301_s24, 3 }
   0x4   : > { %p247_p2 = pnand %p1964_p0, %p246_p1 }
   0x5   : > { %p281_p3 = scmp.lt.s32.totalorder (!%p247_p2), %s1960_s25, 1  ;;  %s2307_s17 = smov (!%p247_p2), 64  }
   0x6   : > { %250 = sbr.rel (%p247_p2) target bundleno = 1466 (0x5ba), region = 48 }
   0xb   : > { %v306_v0 = vlaneseq  ;;  %v300_v1 = vld [vmem:[%s2668_s2] sm:$0xff]  ;;  %v2303_v2 = vmov 1983009808   ;;  %v2304_v4 = vmov 0   ;;  %s2675_s25 = smov (!%p281_p3, %s1960_s25), 1  ;;  %vm323_vm0 = vcmask 1041408  }
   0xc   : > { %v304_v3 = vunpack.c.l.s4 %v2303_v2  ;;  %368 = vmatprep.mubr.bf16.mxu0 %v2304_v4  ;;  %v418_v5 = vld [vmem:[%s2669_s3] sm:$0xff]  ;;  %409 = vmatprep.mubr.bf16.mxu1 %v2304_v4  ;;  %s1965_s30 = sshll.u32 %s2675_s25, 3  ;;  %v302_v8 = vcombine.high %v300_v1, %v300_v1  ;;  %s2032_s11 = sshll.u32 %s2675_s25, 4  ;;  %vm319_vm1 = vcmask 31744   ;;  %v2305_v32 = vmov 0.0  }
   0xd   : > { %v307_v6 = vshrl.u32 %v306_v0, 7  ;;  %v420_v9 = vcombine.high %v418_v5, %v418_v5  ;;  %s284_s10 = scalar_lea.vmem %s2666_s0, %s1965_s30  ;;  %s289_s14 = scalar_lea.vmem %s2667_s1, %s2032_s11  ;;  %v538_v28 = vld [vmem:[%s2670_s4] sm:$0xff]  ;;  %vm2306_vm2 = vmmov 0   ;;  %vm657_vm3 = vcmask 523264  }
   0xe   : > { %v305_v7 = vunpack.c.0.s8 %v304_v3  ;;  %v295_v11 = vld [vmem:[%s284_s10] sm:$0x1f]  ;;  %v298_v26 = vld [vmem:[%s289_s14 + $0x8] sm:$0xff]  ;;  %v540_v59 = vcombine.high %v538_v28, %v538_v28  ;;  %vm705_vm4 = vcmask 126976   ;;  %vm719_vm5 = vcmask 130048   ;;  %s293_s8 = scalar_lea.vmem %s2673_s7, %s1965_s30 }
   0xf   : > { %v296_v24 = vpack.c.bf16 %v295_v11, %v295_v11  ;;  %v297_v25 = vld [vmem:[%s289_s14] sm:$0xff]  ;;  %vm1893_vm6 = vcmask 28672  }
  0x10   : > { %v2365_v10 = vsub.s32 %v305_v7, %v307_v6  ;;  %v2390_v27 = vpack.c.bf16 %v298_v26, %v297_v25 }
  0x12   : > { %v309_v12 = vrot.slane %v300_v1, %v2365_v10  ;;  %v427_v13 = vrot.slane %v418_v5, %v2365_v10  ;;  %v316_v14 = vrot.slane %v302_v8, %v2365_v10  ;;  %v434_v15 = vrot.slane %v420_v9, %v2365_v10 }
  0x13   : > { %v547_v29 = vrot.slane %v538_v28, %v2365_v10  ;;  %v554_v61 = vrot.slane %v540_v59, %v2365_v10 }
  0x14   : > { %v317_v16 = vcombine.high %v309_v12, %v309_v12  ;;  %v325_v17 = vsel %vm323_vm0, %v309_v12, 0  ;;  %v435_v18 = vcombine.high %v427_v13, %v427_v13  ;;  %v441_v19 = vsel %vm323_vm0, %v427_v13, 0 }
  0x15   : > { %v318_v20 = vcombine.high %v316_v14, %v316_v14  ;;  %v331_v21 = vsel %vm323_vm0, %v316_v14, 0  ;;  %v436_v22 = vcombine.high %v434_v15, %v434_v15  ;;  %v447_v23 = vsel %vm323_vm0, %v434_v15, 0 }
  0x16   : > { %1969 = vmatprep.subr.msk.bf16.mxu0 %vm323_vm0, %v317_v16  ;;  %v555_v30 = vcombine.high %v547_v29, %v547_v29  ;;  %v558_v31 = vsel %vm323_vm0, %v547_v29, 0  ;;  %v556_v62 = vcombine.high %v554_v61, %v554_v61  ;;  %v564_v63 = vsel %vm323_vm0, %v554_v61, 0 }
  0x17   : > { %351 = vmatpush1.bf16.msra.mxu0 %v325_v17  ;;  %1971 = vmatprep.subr.msk.bf16.mxu1 %vm323_vm0, %v318_v20 }
  0x18   : > { %1973 = vmatprep.subr.msk.bf16.mxu0 %vm323_vm0, %v435_v18  ;;  %392 = vmatpush1.bf16.msra.mxu1 %v331_v21 }
  0x19   : > { %1975 = vmatprep.subr.msk.bf16.mxu1 %vm323_vm0, %v436_v22 }
  0x1a   : > { %1970 = vmatmul.mubr.msk.bf16.vlgmr.msra.gmra.mxu0 %vm319_vm1, %v296_v24 }
  0x1b   : > { %467 = vmatpush1.bf16.msra.mxu0 %v441_v19  ;;  %484 = vmatprep.mubr.bf16.mxu0 %v2304_v4 }
  0x1c   : > { %1972 = vmatmul.mubr.msk.bf16.vlgmr.msra.gmra.mxu1 %vm319_vm1, %v296_v24  ;;  %1977 = vmatprep.subr.msk.bf16.mxu0 %vm323_vm0, %v555_v30 }
  0x1d   : > { %510 = vmatpush1.bf16.msra.mxu1 %v447_v23  ;;  %527 = vmatprep.mubr.bf16.mxu1 %v2304_v4 }
  0x1e   : > { %1979 = vmatprep.subr.msk.bf16.mxu1 %vm323_vm0, %v556_v62 }
  0x22   : > { %1974 = vmatmul.mubr.msk.bf16.vlgmr.msra.gmra.mxu0 %vm319_vm1, %v2390_v27 }
  0x23   : > { %601 = vmatprep.mubr.bf16.mxu0 %v2304_v4  ;;  %584 = vmatpush1.bf16.msra.mxu0 %v558_v31 }
  0x24   : > { %1976 = vmatmul.mubr.msk.bf16.vlgmr.msra.gmra.mxu1 %vm319_vm1, %v2390_v27  ;;  %2109 = vmatprep.subr.bf16.mxu0 %v2305_v32 }
  0x25   : > { %644 = vmatprep.mubr.bf16.mxu1 %v2304_v4  ;;  %627 = vmatpush1.bf16.msra.mxu1 %v564_v63 }
  0x26   : > { %2115 = vmatprep.subr.bf16.mxu1 %v2305_v32 }
  0x2a   : > { %1978 = vmatmul.mubr.msk.bf16.vlgmr.msra.gmra.mxu0 %vm319_vm1, %v2390_v27 }
  0x2b   : > { %2111 = vmatprep.mubr.msk.bf16.mxu0 %vm2306_vm2, %v2305_v32 }
  0x2c   : > { %1980 = vmatmul.mubr.msk.bf16.vlgmr.msra.gmra.mxu1 %vm319_vm1, %v2390_v27 }
  0x2d   : > { %2117 = vmatprep.mubr.msk.bf16.mxu1 %vm2306_vm2, %v2305_v32 }
  0xda   : > { %v370_v33 = vpop.f32.mrf.mxu0 }
  0xdb   : > { %v655_v51 = vpack.c.bf16 %v370_v33, %v370_v33 }
  0xdc   : > { %v372_v34 = vpop.f32.mrf.mxu0  ;;  %v411_v35 = vpop.f32.mrf.mxu1 }
  0xdd   : > { %v875_v52 = vpack.c.bf16 %v372_v34, %v372_v34  ;;  %v1092_v55 = vpack.c.bf16 %v411_v35, %v411_v35 }
  0xde   : > { %v374_v36 = vpop.f32.mrf.mxu0  ;;  %v413_v37 = vpop.f32.mrf.mxu1 }
  0xdf   : > { %v1309_v57 = vpack.c.bf16 %v413_v37, %v413_v37 }
  0xe0   : > { %v375_v38 = vpop.f32.mrf.mxu0  ;;  %v415_v39 = vpop.f32.mrf.mxu1 }
  0xe2   : > { %v486_v40 = vpop.f32.mrf.mxu0  ;;  %v416_v41 = vpop.f32.mrf.mxu1 }
  0xe4   : > { %v488_v42 = vpop.f32.mrf.mxu0  ;;  %v529_v43 = vpop.f32.mrf.mxu1 }
  0xe6   : > { %v490_v44 = vpop.f32.mrf.mxu0  ;;  %v531_v45 = vpop.f32.mrf.mxu1 }
  0xe7   : > { %v656_v46 = vpack.c.bf16 %v490_v44, %v486_v40 }
  0xe8   : > { %v492_v47 = vpop.f32.mrf.mxu0  ;;  %v533_v50 = vpop.f32.mrf.mxu1 }
  0xe9   : > { %v662_v48 = vsel %vm657_vm3, %v656_v46, 0  ;;  %v876_v49 = vpack.c.bf16 %v492_v47, %v488_v42  ;;  %767 = vrot.lane.b32.xlu0 %v656_v46, %s2307_s17  ;;  %v1093_v53 = vpack.c.bf16 %v533_v50, %v529_v43 }
  0xea   : > { %2110 = vmatpush3.bf16.xpose.msra.mxu0 %v662_v48  ;;  %v535_v54 = vpop.f32.mrf.mxu1  ;;  %v603_v58 = vpop.f32.mrf.mxu0 }
  0xeb   : > { %984 = vrot.lane.b32.xlu1 %v876_v49, %s2307_s17  ;;  %2121 = vmatprep.subr.bf16.mxu0 %v2305_v32  ;;  %v1310_v56 = vpack.c.bf16 %v535_v54, %v531_v45  ;;  %v881_v5 = vsel %vm657_vm3, %v876_v49, 0  ;;  %v1098_v9 = vsel %vm657_vm3, %v1093_v53, 0 }
  0xec   : > { %v2420_v60 = vpop.f32.mrf.mxu0 }
  0xed   : > { %764 = vrot.lane.b32.xlu0 %v655_v51, %s2307_s17  ;;  %v1315_v13 = vsel %vm657_vm3, %v1310_v56, 0 }
  0xee   : > { %v607_v0 = vpop.f32.mrf.mxu0 }
  0xef   : > { %981 = vrot.lane.b32.xlu1 %v875_v52, %s2307_s17  ;;  %v2425_v1 = vpack.c.bf16 %v607_v0, %v603_v58 }
  0xf0   : > { %v2466_v17 = vpop.f32.mrf.mxu0 }
  0xf1   : > { %2112 = vmatmul.mubr.msk.bf16.vlgmr.msra.gmra.mxu0 %vm657_vm3, %v655_v51  ;;  %1201 = vrot.lane.b32.xlu0 %v1093_v53, %s2307_s17 }
  0xf2   : > { %2123 = vmatprep.mubr.msk.bf16.mxu0 %vm2306_vm2, %v2305_v32  ;;  %2116 = vmatpush3.bf16.msra.mxu1 %v2425_v1 }
  0xf3   : > { %1198 = vrot.lane.b32.xlu1 %v1092_v55, %s2307_s17  ;;  %2127 = vmatprep.subr.bf16.mxu1 %v2305_v32 }
  0xf5   : > { %1418 = vrot.lane.b32.xlu0 %v1310_v56, %s2307_s17 }
  0xf7   : > { %1415 = vrot.lane.b32.xlu1 %v1309_v57, %s2307_s17 }
 0x15b   : > { %v768_v2 = vpop.permute.xlu0 %767 }
 0x15c   : > { %v773_v3 = vsel %vm657_vm3, %v768_v2, 0 }
 0x15d   : > { %2122 = vmatpush3.bf16.xpose.msra.mxu0 %v773_v3  ;;  %v985_v6 = vpop.permute.xlu1 %984 }
 0x15e   : > { %2133 = vmatprep.subr.bf16.mxu0 %v2305_v32  ;;  %v990_v7 = vsel %vm657_vm3, %v985_v6, 0 }
 0x15f   : > { %v765_v4 = vpop.permute.xlu0 %764 }
 0x161   : > { %v982_v8 = vpop.permute.xlu1 %981 }
 0x163   : > { %v1202_v10 = vpop.permute.xlu0 %1201 }
 0x164   : > { %2124 = vmatmul.mubr.msk.bf16.vlgmr.msra.gmra.mxu0 %vm657_vm3, %v765_v4  ;;  %v1207_v11 = vsel %vm657_vm3, %v1202_v10, 0 }
 0x165   : > { %2134 = vmatpush3.bf16.xpose.msra.mxu0 %v881_v5  ;;  %2135 = vmatprep.mubr.msk.bf16.mxu0 %vm2306_vm2, %v2305_v32  ;;  %v1199_v12 = vpop.permute.xlu1 %1198 }
 0x166   : > { %2145 = vmatprep.subr.bf16.mxu0 %v2305_v32 }
 0x167   : > { %v1419_v14 = vpop.permute.xlu0 %1418 }
 0x168   : > { %v1424_v15 = vsel %vm657_vm3, %v1419_v14, 0 }
 0x169   : > { %v1416_v16 = vpop.permute.xlu1 %1415 }
 0x16c   : > { %2136 = vmatmul.mubr.msk.bf16.vlgmr.msra.gmra.mxu0 %vm657_vm3, %v875_v52 }
 0x16d   : > { %2146 = vmatpush3.bf16.xpose.msra.mxu0 %v990_v7  ;;  %2147 = vmatprep.mubr.msk.bf16.mxu0 %vm2306_vm2, %v2305_v32 }
 0x16e   : > { %2157 = vmatprep.subr.bf16.mxu0 %v2305_v32 }
 0x174   : > { %2148 = vmatmul.mubr.msk.bf16.vlgmr.msra.gmra.mxu0 %vm657_vm3, %v982_v8 }
 0x175   : > { %2158 = vmatpush3.bf16.xpose.msra.mxu0 %v1098_v9  ;;  %2159 = vmatprep.mubr.msk.bf16.mxu0 %vm2306_vm2, %v2305_v32 }
 0x176   : > { %2169 = vmatprep.subr.bf16.mxu0 %v2305_v32 }
 0x17c   : > { %2160 = vmatmul.mubr.msk.bf16.vlgmr.msra.gmra.mxu0 %vm657_vm3, %v1092_v55 }
 0x17d   : > { %2170 = vmatpush3.bf16.xpose.msra.mxu0 %v1207_v11  ;;  %2171 = vmatprep.mubr.msk.bf16.mxu0 %vm2306_vm2, %v2305_v32 }
 0x17e   : > { %2181 = vmatprep.subr.bf16.mxu0 %v2305_v32 }
 0x184   : > { %2172 = vmatmul.mubr.msk.bf16.vlgmr.msra.gmra.mxu0 %vm657_vm3, %v1199_v12 }
 0x185   : > { %2182 = vmatpush3.bf16.xpose.msra.mxu0 %v1315_v13  ;;  %2183 = vmatprep.mubr.msk.bf16.mxu0 %vm2306_vm2, %v2305_v32 }
 0x186   : > { %2193 = vmatprep.subr.bf16.mxu0 %v2305_v32 }
 0x18c   : > { %2184 = vmatmul.mubr.msk.bf16.vlgmr.msra.gmra.mxu0 %vm657_vm3, %v1309_v57 }
 0x18d   : > { %2194 = vmatpush3.bf16.xpose.msra.mxu0 %v1424_v15  ;;  %2195 = vmatprep.mubr.msk.bf16.mxu0 %vm2306_vm2, %v2305_v32 }
 0x194   : > { %2196 = vmatmul.mubr.msk.bf16.vlgmr.msra.gmra.mxu0 %vm657_vm3, %v1416_v16 }
 0x1b1   : > { %v698_v18 = vpop.f32.mrf.mxu0 }
 0x1b2   : > { %v704_v19 = vmul.f32 0.125, %v698_v18 }
 0x1b3   : > { %v2113_v20 = vpop.f32.mrf.mxu0 }
 0x1b4   : > { %v706_v21 = vsel %vm705_vm4, %v704_v19, -inf }
 0x1b5   : > { %707 = vmax.xlane.f32.xlu0 %v706_v21  ;;  %v701_v22 = vpop.f32.mrf.mxu0 }
 0x1b7   : > { %v2114_v23 = vpop.f32.mrf.mxu0 }
 0x224   : > { %v809_v24 = vpop.f32.mrf.mxu0 }
 0x225   : > { %v815_v25 = vmul.f32 0.125, %v809_v24 }
 0x226   : > { %v2125_v26 = vpop.f32.mrf.mxu0 }
 0x227   : > { %v816_v27 = vsel %vm705_vm4, %v815_v25, -inf }
 0x228   : > { %817 = vmax.xlane.f32.xlu1 %v816_v27  ;;  %v812_v28 = vpop.f32.mrf.mxu0 }
 0x229   : > { %v936_v28 = vpack.c.bf16 %v2466_v17, %v2420_v60 }
 0x22a   : > { %v2126_v29 = vpop.f32.mrf.mxu0 }
 0x22c   : > { %v917_v30 = vpop.f32.mrf.mxu0 }
 0x22d   : > { %v923_v31 = vmul.f32 0.125, %v917_v30 }
 0x22e   : > { %v2137_v33 = vpop.f32.mrf.mxu0 }
 0x22f   : > { %v924_v34 = vsel %vm705_vm4, %v923_v31, -inf }
 0x230   : > { %925 = vmax.xlane.f32.xlu0 %v924_v34  ;;  %v920_v35 = vpop.f32.mrf.mxu0 }
 0x232   : > { %v2138_v36 = vpop.f32.mrf.mxu0 }
 0x234   : > { %v1026_v37 = vpop.f32.mrf.mxu0 }
 0x235   : > { %v1032_v38 = vmul.f32 0.125, %v1026_v37 }
 0x236   : > { %v2149_v39 = vpop.f32.mrf.mxu0 }
 0x237   : > { %v1033_v40 = vsel %vm705_vm4, %v1032_v38, -inf }
 0x238   : > { %1034 = vmax.xlane.f32.xlu0 %v1033_v40  ;;  %v1029_v41 = vpop.f32.mrf.mxu0 }
 0x23a   : > { %v2150_v42 = vpop.f32.mrf.mxu0 }
 0x23c   : > { %v1134_v43 = vpop.f32.mrf.mxu0 }
 0x23d   : > { %v2472_v44 = vmul.f32 0.125, %v1134_v43 }
 0x23e   : > { %v708_v45 = vpop.xlane.xlu0 %707  ;;  %v2161_v46 = vpop.f32.mrf.mxu0 }
 0x23f   : > { %v709_v47 = vsub.f32 %v704_v19, %v708_v45  ;;  %v1141_v48 = vsel %vm705_vm4, %v2472_v44, -inf }
 0x240   : > { %1142 = vmax.xlane.f32.xlu1 %v1141_v48  ;;  %v1137_v49 = vpop.f32.mrf.mxu0 }
 0x241   : > { %v710_v50 = vmul.f32 1.442695, %v709_v47  ;;  %v646_v49 = vpop.f32.mrf.mxu1 }
 0x242   : > { %v2162_v51 = vpop.f32.mrf.mxu0 }
 0x243   : > { %2263 = vpow2.f32 %v710_v50  ;;  %v648_v50 = vpop.f32.mrf.mxu1 }
 0x244   : > { %v1243_v52 = vpop.f32.mrf.mxu0 }
 0x245   : > { %v1249_v53 = vmul.f32 0.125, %v1243_v52  ;;  %v650_v51 = vpop.f32.mrf.mxu1 }
 0x246   : > { %v2173_v54 = vpop.f32.mrf.mxu0  ;;  %v1153_v52 = vpack.c.bf16 %v650_v51, %v646_v49  ;;  %v2248_v51 = vld [vmem:[%s2671_s5 + $0xb8] sm:$0xff]  }
 0x247   : > { %v1250_v55 = vsel %vm705_vm4, %v1249_v53, -inf }
 0x248   : > { %1251 = vmax.xlane.f32.xlu0 %v1250_v55  ;;  %v1246_v56 = vpop.f32.mrf.mxu0 }
 0x24a   : > { %v2174_v57 = vpop.f32.mrf.mxu0 }
 0x24c   : > { %v1351_v58 = vpop.f32.mrf.mxu0 }
 0x24d   : > { %v1357_v59 = vmul.f32 0.125, %v1351_v58 }
 0x24e   : > { %v2185_v61 = vpop.f32.mrf.mxu0 }
 0x24f   : > { %v1358_v62 = vsel %vm705_vm4, %v1357_v59, -inf }
 0x250   : > { %v2264_v63 = vpop.eup %2263  ;;  %1359 = vmax.xlane.f32.xlu1 %v1358_v62  ;;  %v1354_v0 = vpop.f32.mrf.mxu0 }
 0x251   : > { %v712_v3 = vsel %vm705_vm4, %v2264_v63, 0.0 }
 0x252   : > { %v2186_v2 = vpop.f32.mrf.mxu0 }
 0x254   : > { %713 = vadd.xlane.f32.xlu1 %v712_v3  ;;  %v1460_v4 = vpop.f32.mrf.mxu0 }
 0x255   : > { %v1466_v5 = vmul.f32 0.125, %v1460_v4 }
 0x256   : > { %v2197_v6 = vpop.f32.mrf.mxu0 }
 0x257   : > { %v1467_v7 = vsel %vm705_vm4, %v1466_v5, -inf }
 0x258   : > { %1468 = vmax.xlane.f32.xlu0 %v1467_v7  ;;  %v1463_v8 = vpop.f32.mrf.mxu0 }
 0x25a   : > { %v2198_v9 = vpop.f32.mrf.mxu0 }
 0x2b1   : > { %v818_v10 = vpop.xlane.xlu1 %817 }
 0x2b2   : > { %v819_v11 = vsub.f32 %v815_v25, %v818_v10 }
 0x2b4   : > { %v820_v12 = vmul.f32 1.442695, %v819_v11 }
 0x2b6   : > { %2265 = vpow2.f32 %v820_v12 }
 0x2b9   : > { %v926_v13 = vpop.xlane.xlu0 %925 }
 0x2ba   : > { %v927_v14 = vsub.f32 %v923_v31, %v926_v13 }
 0x2bc   : > { %v928_v15 = vmul.f32 1.442695, %v927_v14 }
 0x2be   : > { %2267 = vpow2.f32 %v928_v15 }
 0x2c1   : > { %v1035_v16 = vpop.xlane.xlu0 %1034 }
 0x2c2   : > { %v1036_v18 = vsub.f32 %v1032_v38, %v1035_v16 }
 0x2c3   : > { %v2480_v19 = vpop.eup %2265 }
 0x2c4   : > { %v1037_v20 = vmul.f32 1.442695, %v1036_v18  ;;  %v822_v21 = vsel %vm705_vm4, %v2480_v19, 0.0 }
 0x2c5   : > { %823 = vadd.xlane.f32.xlu0 %v822_v21 }
 0x2c6   : > { %2269 = vpow2.f32 %v1037_v20 }
 0x2c9   : > { %v1143_v26 = vpop.xlane.xlu1 %1142 }
 0x2ca   : > { %v1144_v30 = vsub.f32 %v2472_v44, %v1143_v26 }
 0x2cb   : > { %v2484_v22 = vpop.eup %2267 }
 0x2cc   : > { %v930_v23 = vsel %vm705_vm4, %v2484_v22, 0.0  ;;  %v1145_v34 = vmul.f32 1.442695, %v1144_v30  ;;  %v2231_v30 = vld [vmem:[%s2671_s5 + $0x78] sm:$0xff]  }
 0x2cd   : > { %931 = vadd.xlane.f32.xlu1 %v930_v23  ;;  %2065 = vmatprep.subr.bf16.mxu0 %v2231_v30 }
 0x2d1   : > { %v1252_v31 = vpop.xlane.xlu0 %1251 }
 0x2d2   : > { %v1253_v35 = vsub.f32 %v1249_v53, %v1252_v31  ;;  %v652_v53 = vpop.f32.mrf.mxu1  ;;  %v2232_v31 = vld [vmem:[%s2671_s5 + $0x38] sm:$0xff]  }
 0x2d3   : > { %v2488_v24 = vpop.eup %2269  ;;  %v1370_v54 = vpack.c.bf16 %v652_v53, %v648_v50  ;;  %2066 = vmatpush3.bf16.msra.mxu0 %v2232_v31  ;;  %v2247_v50 = vld [vmem:[%s2671_s5 + $0xf8] sm:$0xff]  }
 0x2d4   : > { %v1039_v25 = vsel %vm705_vm4, %v2488_v24, 0.0  ;;  %v1254_v60 = vmul.f32 1.442695, %v1253_v35  ;;  %v2236_v35 = vld [vmem:[%s2671_s5 + $0x28] sm:$0xff]  }
 0x2d5   : > { %1040 = vadd.xlane.f32.xlu0 %v1039_v25 }
 0x2d9   : > { %v1360_v27 = vpop.xlane.xlu1 %1359 }
 0x2da   : > { %v1361_v39 = vsub.f32 %v1357_v59, %v1360_v27 }
 0x2dc   : > { %v1362_v40 = vmul.f32 1.442695, %v1361_v39  ;;  %v2240_v39 = vld [vmem:[%s2671_s5 + $0x18] sm:$0xff]  }
 0x2dd   : > { %v714_v29 = vpop.xlane.xlu1 %713 }
 0x2de   : > { %1046 = vrot.lane.b32.xlu1 %v936_v28, %s2307_s17  ;;  %2271 = vrcp.f32 %v714_v29 }
 0x2df   : > { %2273 = vpow2.f32 %v1145_v34  ;;  %v2235_v34 = vld [vmem:[%s2671_s5 + $0x68] sm:$0xff]  }
 0x2e0   : > { %2275 = vpow2.f32 %v1254_v60  ;;  %v2241_v60 = vld [vmem:[%s2671_s5 + $0x50] sm:$0xff]  }
 0x2e1   : > { %v1469_v37 = vpop.xlane.xlu0 %1468  ;;  %2277 = vpow2.f32 %v1362_v40  ;;  %v2243_v40 = vld [vmem:[%s2671_s5 + $0x48] sm:$0xff]  }
 0x2e2   : > { %v1470_v17 = vsub.f32 %v1466_v5, %v1469_v37  ;;  %v2238_v37 = vld [vmem:[%s2671_s5 + $0x20] sm:$0xff]  }
 0x2e4   : > { %v1471_v41 = vmul.f32 1.442695, %v1470_v17  ;;  %v2242_v17 = vld [vmem:[%s2671_s5 + $0x10] sm:$0xff]  }
 0x2e6   : > { %2279 = vpow2.f32 %v1471_v41  ;;  %v2244_v41 = vld [vmem:[%s2671_s5 + $0x8] sm:$0xff]  }
 0x2eb   : > { %829 = vrot.lane.b32.xlu0 %v2425_v1, %s2307_s17  ;;  %v2272_v33 = vpop.eup %2271 }
 0x2ec   : > { %v716_v36 = vmul.f32 %v2272_v33, %v2264_v63  ;;  %v2274_v1 = vpop.eup %2273  ;;  %v2234_v33 = vld [vmem:[%s2671_s5 + $0x30] sm:$0xff]  }
 0x2ed   : > { %v1147_v42 = vsel %vm705_vm4, %v2274_v1, 0.0  ;;  %v2502_v43 = vpop.eup %2275 }
 0x2ee   : > { %v717_v38 = vpack.c.bf16 %v716_v36, %v716_v36  ;;  %v2504_v44 = vpop.eup %2277  ;;  %v1256_v45 = vsel %vm705_vm4, %v2502_v43, 0.0  ;;  %v2237_v36 = vld [vmem:[%s2671_s5 + $0x60] sm:$0xff]  }
 0x2ef   : > { %v1364_v47 = vsel %vm705_vm4, %v2504_v44, 0.0 }
 0x2f0   : > { %2118 = vmatmul.mubr.msk.bf16.vlgmr.msra.gmra.mxu1 %vm719_vm5, %v717_v38  ;;  %v2239_v38 = vld [vmem:[%s2671_s5 + $0x58] sm:$0xff]  }
 0x2f1   : > { %2129 = vmatprep.mubr.msk.bf16.mxu1 %vm2306_vm2, %v2305_v32 }
 0x2f3   : > { %v2508_v46 = vpop.eup %2279 }
 0x2f4   : > { %v1473_v48 = vsel %vm705_vm4, %v2508_v46, 0.0 }
 0x302   : > { %1148 = vadd.xlane.f32.xlu1 %v1147_v42 }
 0x306   : > { %1257 = vadd.xlane.f32.xlu1 %v1256_v45  ;;  %v2245_v45 = vld [vmem:[%s2671_s5 + $0x40] sm:$0xff]  }
 0x30a   : > { %1365 = vadd.xlane.f32.xlu1 %v1364_v47  ;;  %1474 = vadd.xlane.f32.xlu0 %v1473_v48  ;;  %v2246_v47 = vld [vmem:[%s2671_s5] sm:$0xff]  }
 0x31b   : > { %1263 = vrot.lane.b32.xlu1 %v1153_v52, %s2307_s17 }
 0x31f   : > { %1480 = vrot.lane.b32.xlu1 %v1370_v54, %s2307_s17 }
 0x34e   : > { %v824_v55 = vpop.xlane.xlu0 %823 }
 0x34f   : > { %2281 = vrcp.f32 %v824_v55 }
 0x356   : > { %v932_v56 = vpop.xlane.xlu1 %931 }
 0x357   : > { %2283 = vrcp.f32 %v932_v56  ;;  %v2251_v56 = vld [vmem:[%s2671_s5 + $0xe8] sm:$0xff]  }
 0x35a   : > { %v1047_v4 = vpop.permute.xlu1 %1046 }
 0x35c   : > { %v2282_v57 = vpop.eup %2281 }
 0x35d   : > { %v826_v59 = vmul.f32 %v2282_v57, %v2480_v19 }
 0x35e   : > { %v1041_v58 = vpop.xlane.xlu0 %1040 }
 0x35f   : > { %2285 = vrcp.f32 %v1041_v58  ;;  %v827_v62 = vpack.c.bf16 %v826_v59, %v826_v59  ;;  %v2252_v59 = vld [vmem:[%s2671_s5 + $0xa8] sm:$0xff]  }
 0x362   : > { %v830_v61 = vpop.permute.xlu0 %829 }
 0x363   : > { %2128 = vmatpush3.bf16.msra.mxu1 %v830_v61 }
 0x364   : > { %2139 = vmatprep.subr.bf16.mxu1 %v2305_v32  ;;  %v2284_v63 = vpop.eup %2283 }
 0x365   : > { %v934_v0 = vmul.f32 %v2284_v63, %v2484_v22 }
 0x366   : > { %2130 = vmatmul.mubr.msk.bf16.vlgmr.msra.gmra.mxu1 %vm719_vm5, %v827_v62  ;;  %v2253_v62 = vld [vmem:[%s2671_s5 + $0xe0] sm:$0xff]  }
 0x367   : > { %2140 = vmatpush3.bf16.msra.mxu1 %v936_v28  ;;  %2141 = vmatprep.mubr.msk.bf16.mxu1 %vm2306_vm2, %v2305_v32  ;;  %v935_v2 = vpack.c.bf16 %v934_v0, %v934_v0  ;;  %v2254_v0 = vld [vmem:[%s2671_s5 + $0xa0] sm:$0xff]  }
 0x368   : > { %2151 = vmatprep.subr.bf16.mxu1 %v2305_v32 }
 0x36c   : > { %v2286_v3 = vpop.eup %2285 }
 0x36d   : > { %v1043_v5 = vmul.f32 %v2286_v3, %v2488_v24  ;;  %v2256_v3 = vld [vmem:[%s2671_s5 + $0x98] sm:$0xff]  }
 0x36e   : > { %2142 = vmatmul.mubr.msk.bf16.vlgmr.msra.gmra.mxu1 %vm719_vm5, %v935_v2  ;;  %v2255_v2 = vld [vmem:[%s2671_s5 + $0xd8] sm:$0xff]  }
 0x36f   : > { %2152 = vmatpush3.bf16.msra.mxu1 %v1047_v4  ;;  %2153 = vmatprep.mubr.msk.bf16.mxu1 %vm2306_vm2, %v2305_v32  ;;  %v1044_v6 = vpack.c.bf16 %v1043_v5, %v1043_v5  ;;  %v2257_v4 = vld [vmem:[%s2671_s5 + $0xd0] sm:$0xff]  }
 0x370   : > { %2163 = vmatprep.subr.bf16.mxu1 %v2305_v32  ;;  %v2258_v5 = vld [vmem:[%s2671_s5 + $0x90] sm:$0xff]  }
 0x376   : > { %2154 = vmatmul.mubr.msk.bf16.vlgmr.msra.gmra.mxu1 %vm719_vm5, %v1044_v6  ;;  %v2259_v6 = vld [vmem:[%s2671_s5 + $0xc8] sm:$0xff]  }
 0x377   : > { %2164 = vmatpush3.bf16.msra.mxu1 %v1153_v52  ;;  %2165 = vmatprep.mubr.msk.bf16.mxu1 %vm2306_vm2, %v2305_v32  ;;  %v2249_v52 = vld [vmem:[%s2671_s5 + $0xf0] sm:$0xff]  }
 0x378   : > { %2175 = vmatprep.subr.bf16.mxu1 %v2305_v32 }
 0x38b   : > { %v1149_v7 = vpop.xlane.xlu1 %1148 }
 0x38c   : > { %2287 = vrcp.f32 %v1149_v7  ;;  %v2260_v7 = vld [vmem:[%s2671_s5 + $0x88] sm:$0xff]  }
 0x38f   : > { %v1258_v8 = vpop.xlane.xlu1 %1257 }
 0x390   : > { %2289 = vrcp.f32 %v1258_v8 }
 0x393   : > { %v1366_v9 = vpop.xlane.xlu1 %1365  ;;  %v1475_v14 = vpop.xlane.xlu0 %1474 }
 0x394   : > { %2291 = vrcp.f32 %v1366_v9 }
 0x395   : > { %2293 = vrcp.f32 %v1475_v14 }
 0x397   : > { %v1264_v15 = vpop.permute.xlu1 %1263 }
 0x399   : > { %v2288_v10 = vpop.eup %2287 }
 0x39a   : > { %v1151_v11 = vmul.f32 %v2288_v10, %v2274_v1 }
 0x39b   : > { %v1481_v23 = vpop.permute.xlu1 %1480 }
 0x39c   : > { %v1152_v12 = vpack.c.bf16 %v1151_v11, %v1151_v11 }
 0x39d   : > { %v2290_v13 = vpop.eup %2289 }
 0x39e   : > { %2166 = vmatmul.mubr.msk.bf16.vlgmr.msra.gmra.mxu1 %vm719_vm5, %v1152_v12  ;;  %v1260_v16 = vmul.f32 %v2290_v13, %v2502_v43 }
 0x39f   : > { %2176 = vmatpush3.bf16.msra.mxu1 %v1264_v15  ;;  %2177 = vmatprep.mubr.msk.bf16.mxu1 %vm2306_vm2, %v2305_v32 }
 0x3a0   : > { %2187 = vmatprep.subr.bf16.mxu1 %v2305_v32  ;;  %v1261_v18 = vpack.c.bf16 %v1260_v16, %v1260_v16  ;;  %v2261_v16 = vld [vmem:[%s2671_s5 + $0xc0] sm:$0xff]  }
 0x3a1   : > { %v2292_v19 = vpop.eup %2291 }
 0x3a2   : > { %v1368_v20 = vmul.f32 %v2292_v19, %v2504_v44  ;;  %v2294_v22 = vpop.eup %2293  ;;  %v2262_v19 = vld [vmem:[%s2671_s5 + $0x80] sm:$0xff]  }
 0x3a3   : > { %v1477_v24 = vmul.f32 %v2294_v22, %v2508_v46 }
 0x3a4   : > { %v1369_v21 = vpack.c.bf16 %v1368_v20, %v1368_v20 }
 0x3a5   : > { %v1478_v27 = vpack.c.bf16 %v1477_v24, %v1477_v24 }
 0x3a6   : > { %2178 = vmatmul.mubr.msk.bf16.vlgmr.msra.gmra.mxu1 %vm719_vm5, %v1261_v18 }
 0x3a7   : > { %2188 = vmatpush3.bf16.msra.mxu1 %v1370_v54  ;;  %2189 = vmatprep.mubr.msk.bf16.mxu1 %vm2306_vm2, %v2305_v32  ;;  %v2250_v54 = vld [vmem:[%s2671_s5 + $0xb0] sm:$0xff]  }
 0x3a8   : > { %2199 = vmatprep.subr.bf16.mxu1 %v2305_v32 }
 0x3ae   : > { %2190 = vmatmul.mubr.msk.bf16.vlgmr.msra.gmra.mxu1 %vm719_vm5, %v1369_v21 }
 0x3af   : > { %2200 = vmatpush3.bf16.msra.mxu1 %v1481_v23  ;;  %2201 = vmatprep.mubr.msk.bf16.mxu1 %vm2306_vm2, %v2305_v32  ;;  %v2233_v32 = vld [vmem:[%s2671_s5 + $0x70] sm:$0xff]  }
 0x3b0   : > { %v2546_v25 = vpop.f32.mrf.mxu1  ;;  %2067 = vmatprep.subr.bf16.mxu0 %v2233_v32  ;;  %2087 = vmatprep.subr.bf16.mxu1 %v2247_v50 }
 0x3b1   : > { %2068 = vmatpush3.bf16.msra.mxu0 %v2234_v33 }
 0x3b2   : > { %v2119_v26 = vpop.f32.mrf.mxu1  ;;  %2069 = vmatprep.subr.bf16.mxu0 %v2235_v34 }
 0x3b4   : > { %v760_v28 = vpop.f32.mrf.mxu1 }
 0x3b5   : > { %2070 = vmatpush3.bf16.msra.mxu0 %v2236_v35 }
 0x3b6   : > { %2202 = vmatmul.mubr.msk.bf16.vlgmr.msra.gmra.mxu1 %vm719_vm5, %v1478_v27  ;;  %v2120_v29 = vpop.f32.mrf.mxu1  ;;  %2071 = vmatprep.subr.bf16.mxu0 %v2237_v36 }
 0x3b7   : > { %2088 = vmatpush3.bf16.msra.mxu1 %v2248_v51 }
 0x3b8   : > { %2089 = vmatprep.subr.bf16.mxu1 %v2249_v52 }
 0x3b9   : > { %2072 = vmatpush3.bf16.msra.mxu0 %v2238_v37 }
 0x3ba   : > { %2073 = vmatprep.subr.bf16.mxu0 %v2239_v38 }
 0x3bb   : > { %2090 = vmatpush3.bf16.msra.mxu1 %v2250_v54 }
 0x3bc   : > { %2091 = vmatprep.subr.bf16.mxu1 %v2251_v56 }
 0x3bd   : > { %2074 = vmatpush3.bf16.msra.mxu0 %v2240_v39 }
 0x3be   : > { %2075 = vmatprep.subr.bf16.mxu0 %v2241_v60 }
 0x3bf   : > { %2092 = vmatpush3.bf16.msra.mxu1 %v2252_v59 }
 0x3c0   : > { %2093 = vmatprep.subr.bf16.mxu1 %v2253_v62 }
 0x3c1   : > { %2076 = vmatpush3.bf16.msra.mxu0 %v2242_v17 }
 0x3c2   : > { %2077 = vmatprep.subr.bf16.mxu0 %v2243_v40 }
 0x3c3   : > { %2094 = vmatpush3.bf16.msra.mxu1 %v2254_v0 }
 0x3c4   : > { %2095 = vmatprep.subr.bf16.mxu1 %v2255_v2 }
 0x3c5   : > { %2078 = vmatpush3.bf16.msra.mxu0 %v2244_v41 }
 0x3c6   : > { %2079 = vmatprep.subr.bf16.mxu0 %v2245_v45 }
 0x3c7   : > { %2096 = vmatpush3.bf16.msra.mxu1 %v2256_v3 }
 0x3c8   : > { %2097 = vmatprep.subr.bf16.mxu1 %v2257_v4 }
 0x3c9   : > { %2080 = vmatpush3.bf16.msra.mxu0 %v2246_v47 }
 0x3cb   : > { %2098 = vmatpush3.bf16.msra.mxu1 %v2258_v5 }
 0x3cc   : > { %2099 = vmatprep.subr.bf16.mxu1 %v2259_v6 }
 0x3cf   : > { %2100 = vmatpush3.bf16.msra.mxu1 %v2260_v7 }
 0x3d0   : > { %2101 = vmatprep.subr.bf16.mxu1 %v2261_v16 }
 0x3d3   : > { %2102 = vmatpush3.bf16.msra.mxu1 %v2262_v19 }
 0x426   : > { %v869_v1 = vpop.f32.mrf.mxu1 }
 0x428   : > { %v2131_v42 = vpop.f32.mrf.mxu1 }
 0x42a   : > { %v872_v43 = vpop.f32.mrf.mxu1 }
 0x42c   : > { %v2132_v44 = vpop.f32.mrf.mxu1 }
 0x42d   : > { %v1997_v44 = vld [vmem:[%s2672_s6] ss:$0 sm:$0xff] }
 0x42e   : > { %v2594_v46 = vpop.f32.mrf.mxu1 }
 0x430   : > { %v2143_v48 = vpop.f32.mrf.mxu1 }
 0x432   : > { %v977_v49 = vpop.f32.mrf.mxu1 }
 0x434   : > { %v2144_v53 = vpop.f32.mrf.mxu1 }
 0x436   : > { %v1086_v55 = vpop.f32.mrf.mxu1 }
 0x437   : > { %v2218_v57 = vpack.i.bf16 %v869_v1, %v1086_v55 }
 0x438   : > { %v2155_v58 = vpop.f32.mrf.mxu1 }
 0x439   : > { %2219 = vrot.lane.b32.xlu1 %v2218_v57, %s2307_s17 }
 0x43a   : > { %v1089_v61 = vpop.f32.mrf.mxu1 }
 0x43c   : > { %v2156_v63 = vpop.f32.mrf.mxu1 }
 0x45e   : > { %v1191_v8 = vpop.f32.mrf.mxu1 }
 0x460   : > { %v2167_v9 = vpop.f32.mrf.mxu1 }
 0x462   : > { %v1194_v10 = vpop.f32.mrf.mxu1 }
 0x464   : > { %v2168_v11 = vpop.f32.mrf.mxu1 }
 0x466   : > { %v1303_v12 = vpop.f32.mrf.mxu1 }
 0x468   : > { %v2179_v13 = vpop.f32.mrf.mxu1 }
 0x46a   : > { %v1306_v14 = vpop.f32.mrf.mxu1 }
 0x46c   : > { %v2180_v15 = vpop.f32.mrf.mxu1 }
 0x46e   : > { %v1408_v18 = vpop.f32.mrf.mxu1 }
 0x470   : > { %v2191_v20 = vpop.f32.mrf.mxu1 }
 0x472   : > { %v1411_v21 = vpop.f32.mrf.mxu1 }
 0x474   : > { %v2192_v22 = vpop.f32.mrf.mxu1 }
 0x476   : > { %v1520_v23 = vpop.f32.mrf.mxu1 }
 0x477   : > { %v2223_v24 = vpack.i.bf16 %v1303_v12, %v1520_v23 }
 0x478   : > { %v2203_v26 = vpop.f32.mrf.mxu1 }
 0x479   : > { %2224 = vrot.lane.b32.xlu1 %v2223_v24, %s2307_s17 }
 0x47a   : > { %v1523_v27 = vpop.f32.mrf.mxu1 }
 0x47c   : > { %v2204_v28 = vpop.f32.mrf.mxu1 }
 0x4ab   : > { %v2220_v29 = vpop.permute.xlu1 %2219 }
 0x4ac   : > { %v2222_v30 = vunpack.i.h.bf16 %v2220_v29  ;;  %v2221_v31 = vunpack.i.l.bf16 %v2220_v29 }
 0x4ae   : > { %v1542_v32 = vsel %vm657_vm3, %v2546_v25, %v2222_v30  ;;  %v1543_v33 = vsel %vm657_vm3, %v2594_v46, %v2221_v31 }
 0x4af   : > { %v1546_v34 = vpack.c.bf16 %v1542_v32, %v1542_v32  ;;  %v1547_v35 = vpack.c.bf16 %v1543_v33, %v1543_v33 }
 0x4b1   : > { %1845 = vmatprep.mubr.bf16.mxu0 %v1547_v35 }
 0x4b2   : > { %1846 = vmatmul.mubr.bf16.vlgmr.msra.gmra.mxu0 %v1546_v34 }
 0x4eb   : > { %v2225_v36 = vpop.permute.xlu1 %2224 }
 0x4ec   : > { %v2227_v37 = vunpack.i.h.bf16 %v2225_v36  ;;  %v2226_v38 = vunpack.i.l.bf16 %v2225_v36 }
 0x4ee   : > { %v1544_v39 = vsel %vm657_vm3, %v1191_v8, %v2227_v37  ;;  %v1545_v60 = vsel %vm657_vm3, %v1408_v18, %v2226_v38 }
 0x4ef   : > { %v1548_v17 = vpack.c.bf16 %v1544_v39, %v1544_v39  ;;  %v1549_v40 = vpack.c.bf16 %v1545_v60, %v1545_v60 }
 0x4f1   : > { %1885 = vmatprep.mubr.bf16.mxu1 %v1549_v40 }
 0x4f2   : > { %1886 = vmatmul.mubr.bf16.vlgmr.msra.gmra.mxu1 %v1548_v17 }
 0x572   : > { %v2081_v25 = vpop.f32.mrf.mxu0 }
 0x574   : > { %v2082_v41 = vpop.f32.mrf.mxu0 }
 0x575   : > { %v2083_v43 = vadd.f32 %v2082_v41, %v2081_v25 }
 0x576   : > { %v2084_v1 = vpop.f32.mrf.mxu0 }
 0x577   : > { %v1848_v47 = vadd.f32 %v2083_v43, %v1997_v44 }
 0x578   : > { %v2085_v42 = vpop.f32.mrf.mxu0 }
 0x5b2   : > { %v2103_v45 = vpop.f32.mrf.mxu1 }
 0x5b4   : > { %v2104_v46 = vpop.f32.mrf.mxu1 }
 0x5b5   : > { %v2105_v48 = vadd.f32 %v2104_v46, %v2103_v45 }
 0x5b6   : > { %v2106_v49 = vpop.f32.mrf.mxu1 }
 0x5b7   : > { %v1888_v50 = vadd.f32 %v2105_v48, %v1848_v47 }
 0x5b8   : > { %v2107_v51 = vpop.f32.mrf.mxu1 }
 0x5b9   : > { %1894 = vst.msk [vmem:[%s293_s8] sm:$0x1f] %vm1893_vm6, %v1888_v50 }
 0x5ba PF: > { %s17_s24 = sadd.s32 1, %s2301_s24  }
 0x5bb   : > { %p14_p4 = scmp.ge.s32.totalorder %s17_s24, 4  }
 0x5bd   :  { %16 = sbr.rel (!%p14_p4) target bundleno = 1 (0x1), region = 81 }

</bundles_post_ra>
